<compile_context>
chip_gen: v7x
topology: tpu7x:2x2x1
jax: 0.10.0
libtpu: 0.0.40
codegen_flags: <defaults>
</compile_context>

<pallas_src>
import jax
import jax.numpy as jnp
from jax import lax
from jax.experimental import pallas as pl
from jax.experimental.pallas import tpu as pltpu


def _round_up(a, m):
    return -(-a // m) * m


def _make_kernel(D, H, W, num_bins, depth_min, depth_max, tile_n, tile_k,
                 n_tiles, fast):
    OOB = -2.0
    # LID discretization (CaDDN default)
    bin_size = 2.0 * (depth_max - depth_min) / (num_bins * (1 + num_bins))
    inv_bin8 = 8.0 / bin_size
    HW = H * W
    # corner order: c = 4*dz + 2*dy + dx ; offset of corner c from the base index
    OFF = [dz * HW + dy * W + dx for dz in (0, 1) for dy in (0, 1) for dx in (0, 1)]

    def kernel(shape_ref, kstart_ref, kend_ref, cam_ref, feat_ref, out_ref,
               acc_ref, flat_sc, wgt_sc):
        # shape_ref  : SMEM (2,) int32, max-over-batch [H_image, W_image]
        # kstart_ref : SMEM (B*n_tiles,) int32, first DHW chunk touched by tile
        # kend_ref   : SMEM (B*n_tiles,) int32, last  DHW chunk touched by tile
        # cam_ref    : (1, 3, tile_n) f32, projected voxel centers (u*w, v*w, w)
        # feat_ref   : (1, C, tile_k) f32, DHW-chunk of channels-major features
        # out_ref    : (1, C, tile_n) f32
        # acc_ref    : VMEM (C, tile_n) f32 accumulator
        # flat_sc    : VMEM (1 or 8, tile_n) int32  base / per-corner flat index
        # wgt_sc     : VMEM (8, tile_n) f32  per-corner weight (0 if invalid)
        n = pl.program_id(0)
        b = pl.program_id(1)
        k = pl.program_id(2)
        t = b * n_tiles + n

        @pl.when(k == 0)
        def _init():
            acc_ref[...] = jnp.zeros_like(acc_ref)

            cam = cam_ref[0]                          # (3, tile_n), lane-major
            w = cam[2:3, :]                           # (1, tile_n)
            inv_w = 1.0 / w
            u = cam[0:1, :] * inv_w
            v = cam[1:2, :] * inv_w
            # depth -> continuous LID bin index
            d_bin = -0.5 + 0.5 * jnp.sqrt(1.0 + (w - depth_min) * inv_bin8)

            # normalize_coords (shape = [num_bins, H_img, W_img], flipped)
            h_img = shape_ref[0].astype(jnp.float32)
            w_img = shape_ref[1].astype(jnp.float32)
            gx = u / (w_img - 1.0) * 2.0 - 1.0
            gy = v / (h_img - 1.0) * 2.0 - 1.0
            gz = d_bin * (2.0 / (float(num_bins) - 1.0)) - 1.0

            def _fin(a):  # non-finite -> out-of-bounds sentinel (-2)
                return jnp.where(jnp.abs(a) < jnp.inf, a, OOB)

            gx, gy, gz = _fin(gx), _fin(gy), _fin(gz)

            # grid_sample un-normalization, align_corners=False
            ix = ((gx + 1.0) * W - 1.0) * 0.5
            iy = ((gy + 1.0) * H - 1.0) * 0.5
            iz = ((gz + 1.0) * D - 1.0) * 0.5
            x0, y0, z0 = jnp.floor(ix), jnp.floor(iy), jnp.floor(iz)
            fx, fy, fz = ix - x0, iy - y0, iz - z0

            c = 0
            for dz in (0, 1):
                zc = z0 + float(dz)
                wz = fz if dz else (1.0 - fz)
                vz = (zc >= 0.0) & (zc <= float(D - 1))
                zi = None if fast else jnp.clip(zc, 0.0, float(D - 1)).astype(jnp.int32)
                for dy in (0, 1):
                    yc = y0 + float(dy)
                    wy = fy if dy else (1.0 - fy)
                    vy = (yc >= 0.0) & (yc <= float(H - 1))
                    yi = None if fast else jnp.clip(yc, 0.0, float(H - 1)).astype(jnp.int32)
                    wzy = wz * wy
                    vzy = vz & vy
                    for dx in (0, 1):
                        xc = x0 + float(dx)
                        wx = fx if dx else (1.0 - fx)
                        vx = (xc >= 0.0) & (xc <= float(W - 1))
                        # fold validity into the narrow weight (zeros-padding)
                        wgt_sc[c:c + 1, :] = jnp.where(vzy & vx, wzy * wx, 0.0)
                        if not fast:
                            xi = jnp.clip(xc, 0.0, float(W - 1)).astype(jnp.int32)
                            flat_sc[c:c + 1, :] = (zi * H + yi) * W + xi
                        c += 1

            if fast:
                # Single clamped base index; every *valid* corner c scatters to
                # base + OFF[c] (the clamp to [-1, dim-1] never fires for a
                # voxel that has any in-bounds corner, so offsets stay exact;
                # invalid corners carry zero weight, so their index is moot).
                zb = jnp.clip(z0, -1.0, float(D - 1)).astype(jnp.int32)
                yb = jnp.clip(y0, -1.0, float(H - 1)).astype(jnp.int32)
                xb = jnp.clip(x0, -1.0, float(W - 1)).astype(jnp.int32)
                flat_sc[0:1, :] = (zb * H + yb) * W + xb

        # ---- data-dependent chunk window: skip chunks this tile never touches.
        # The feature index_map clamps to kend, so skipped steps re-use the
        # previous block and incur no new HBM DMA -- only the grid-step cost.
        @pl.when(k <= kend_ref[t] - kstart_ref[t])
        def _scatter():
            base = (kstart_ref[t] + k) * tile_k
            row = lax.broadcasted_iota(jnp.int32, (tile_k, tile_n), 0)
            if fast:
                # 17 wide passes (1 sub + 8 cmp + 8 select), single fused
                # select chain; offsets are pairwise distinct for W>=2, H>=2 so
                # at most one branch matches per element (== summing corners).
                d = row - (flat_sc[0:1, :] - base)
                oh = jnp.where(d == OFF[7], wgt_sc[7:8, :], 0.0)
                for c in range(6, -1, -1):
                    oh = jnp.where(d == OFF[c], wgt_sc[c:c + 1, :], oh)
            else:
                # degenerate W<2 / H<2 fallback: per-corner clipped indices
                oh = jnp.where(row == flat_sc[0:1, :] - base, wgt_sc[0:1, :], 0.0)
                for c in range(1, 8):
                    oh = oh + jnp.where(row == flat_sc[c:c + 1, :] - base,
                                        wgt_sc[c:c + 1, :], 0.0)
            acc_ref[...] += jnp.dot(feat_ref[0], oh,
                                    preferred_element_type=jnp.float32)

        @pl.when(k == pl.num_programs(2) - 1)
        def _store():
            out_ref[0] = acc_ref[...].astype(out_ref.dtype)

    return kernel


def _prepare(frustum_features, lidar_to_cam, cam_to_img, image_shape, grid_size, pc_range):
    """Glue: constant meshgrid, transform fusion, channels-major feature view."""
    B, C, D, H, W = frustum_features.shape
    X, Y, Z = grid_size
    pc = jnp.asarray(pc_range, jnp.float32)
    pc_min = pc[:3]
    voxel_size = (pc[3:] - pc[:3]) / jnp.asarray(grid_size, jnp.float32)
    grid_to_lidar = jnp.concatenate(
        [jnp.concatenate([jnp.diag(voxel_size), pc_min[:, None]], axis=1),
         jnp.array([[0.0, 0.0, 0.0, 1.0]], jnp.float32)], axis=0)              # (4, 4)

    # lidar_to_cam is affine (last row [0,0,0,1]) -> fusing the chain into a
    # single (3,4) projection matches kornia transform_points + project_to_image.
    trans = jnp.einsum('bij,jk->bik', lidar_to_cam.astype(jnp.float32), grid_to_lidar)
    proj = jnp.einsum('bij,bjk->bik', cam_to_img.astype(jnp.float32), trans)   # (B, 3, 4)

    xs = jnp.arange(X, dtype=jnp.float32) + 0.5
    ys = jnp.arange(Y, dtype=jnp.float32) + 0.5
    zs = jnp.arange(Z, dtype=jnp.float32) + 0.5
    mx, my, mz = jnp.meshgrid(xs, ys, zs, indexing='ij')
    pts = jnp.stack([mx, my, mz, jnp.ones_like(mx)], axis=-1).reshape(X * Y * Z, 4)

    # Project all voxel centers once in the wrapper: (B, 3, N), lane-dense on N.
    cam = jnp.einsum('bij,nj->bin', proj, pts)

    # Channels-major flatten of (B, C, D, H, W) -> (B, C, DHW): a free reshape.
    feat = frustum_features.reshape(B, C, D * H * W).astype(jnp.float32)

    # Matches the original FrustumGridGenerator: image_shape = max over batch
    # (`image_shape, _ = torch.max(image_shape, dim=0)` before normalize_coords).
    img_hw_max = jnp.max(image_shape.astype(jnp.int32), axis=0)   # (2,) [H, W]
    return cam, feat, img_hw_max


def _tile_k_window(cam, img_hw, D, H, W, num_bins, depth_min, depth_max,
                   tile_n, tile_k, n_tiles, k_blocks):
    """Per (batch, voxel-tile) chunk window [kstart, kend] along flattened DHW
    guaranteed to contain every frustum cell the tile's trilinear scatter
    touches (conservative: widened by one full 8-corner footprint)."""
    B = cam.shape[0]
    w = cam[:, 2, :]
    u = cam[:, 0, :] / w
    v = cam[:, 1, :] / w
    bin_size = 2.0 * (depth_max - depth_min) / (num_bins * (1 + num_bins))
    d_bin = -0.5 + 0.5 * jnp.sqrt(1.0 + 8.0 * (w - depth_min) / bin_size)
    h_img = img_hw[0].astype(jnp.float32)
    w_img = img_hw[1].astype(jnp.float32)
    fin = lambda a: jnp.where(jnp.isfinite(a), a, -2.0)
    gx = fin(u / (w_img - 1.0) * 2.0 - 1.0)
    gy = fin(v / (h_img - 1.0) * 2.0 - 1.0)
    gz = fin(d_bin / (num_bins - 1.0) * 2.0 - 1.0)
    x0 = jnp.floor(((gx + 1.0) * W - 1.0) * 0.5)
    y0 = jnp.floor(((gy + 1.0) * H - 1.0) * 0.5)
    z0 = jnp.floor(((gz + 1.0) * D - 1.0) * 0.5)
    inside = ((z0 >= -1.0) & (z0 <= D - 1.0) & (y0 >= -1.0) & (y0 <= H - 1.0)
              & (x0 >= -1.0) & (x0 <= W - 1.0))
    zb = jnp.clip(z0, -1.0, D - 1.0).astype(jnp.int32)
    yb = jnp.clip(y0, -1.0, H - 1.0).astype(jnp.int32)
    xb = jnp.clip(x0, -1.0, W - 1.0).astype(jnp.int32)
    f = (zb * H + yb) * W + xb                                   # (B, N_pad)
    span = H * W + W + 1                                         # 8-corner footprint
    DHW = D * H * W
    fmin = jnp.where(inside, f, DHW + span).reshape(B, n_tiles, tile_n).min(-1)
    fmax = jnp.where(inside, f + span, -1 - span).reshape(B, n_tiles, tile_n).max(-1)
    margin = span    # absorbs ulp-level floor() disagreements with the kernel
    kstart = jnp.clip((fmin - margin) // tile_k, 0, k_blocks - 1)
    kend = jnp.clip((fmax + margin) // tile_k, 0, k_blocks - 1)
    kend = jnp.maximum(kend, kstart)
    return (kstart.reshape(-1).astype(jnp.int32),
            kend.reshape(-1).astype(jnp.int32))


def frustum_to_voxel(frustum_features, lidar_to_cam, cam_to_img, image_shape,
                     grid_size, pc_range, disc_cfg, tile_n=1024, tile_k=512):
    """JAX/Pallas equivalent of FrustumToVoxel.forward (use_depth=True)."""
    B, C, D, H, W = frustum_features.shape
    X, Y, Z = grid_size
    N = X * Y * Z
    DHW = D * H * W
    num_bins = int(disc_cfg['num_bins'])
    # TODO(synk): UD / SID depth discretization modes not wired in (LID only).
    assert disc_cfg.get('mode', 'LID') == 'LID'
    assert num_bins == D
    depth_min = float(disc_cfg['depth_min'])
    depth_max = float(disc_cfg['depth_max'])

    # Tile sizing: lane-aligned, capped at the (padded) problem size.
    tile_n = _round_up(min(tile_n, _round_up(N, 128)), 128)
    tile_k = _round_up(min(tile_k, _round_up(DHW, 128)), 128)
    N_pad = _round_up(N, tile_n)
    DHW_pad = _round_up(DHW, tile_k)
    n_tiles = N_pad // tile_n
    k_blocks = DHW_pad // tile_k

    cam, feat, img_hw_max = _prepare(
        frustum_features, lidar_to_cam, cam_to_img, image_shape, grid_size, pc_range)
    if N_pad != N:       # padded voxels project with w=0 -> all weights zero
        cam = jnp.pad(cam, ((0, 0), (0, 0), (0, N_pad - N)))
    if DHW_pad != DHW:   # padded frustum cells are never addressed (< DHW)
        feat = jnp.pad(feat, ((0, 0), (0, 0), (0, DHW_pad - DHW)))

    kstart, kend = _tile_k_window(cam, img_hw_max, D, H, W, num_bins,
                                  depth_min, depth_max, tile_n, tile_k,
                                  n_tiles, k_blocks)

    fast = (W >= 2) and (H >= 2)
    kernel = _make_kernel(D, H, W, num_bins, depth_min, depth_max,
                          tile_n, tile_k, n_tiles, fast)

    def _cam_map(n, b, k, shp, ks, ke):
        return (b, 0, n)

    def _feat_map(n, b, k, shp, ks, ke):
        t = b * n_tiles + n
        # clamp to the tile's last chunk: out-of-window steps repeat the same
        # block index, so the pipeline does not re-DMA the feature block.
        return (b, 0, jnp.minimum(ks[t] + k, ke[t]))

    def _out_map(n, b, k, shp, ks, ke):
        return (b, 0, n)

    out = pl.pallas_call(
        kernel,
        out_shape=jax.ShapeDtypeStruct((B, C, N_pad), jnp.float32),
        grid_spec=pltpu.PrefetchScalarGridSpec(
            num_scalar_prefetch=3,          # image shape + per-tile k window
            # voxel-tile axis leads so v7x's 2 TensorCores both get work
            grid=(n_tiles, B, k_blocks),
            in_specs=[
                pl.BlockSpec((1, 3, tile_n), _cam_map),      # projected centers
                pl.BlockSpec((1, C, tile_k), _feat_map),     # feature chunk
            ],
            out_specs=pl.BlockSpec((1, C, tile_n), _out_map),
            scratch_shapes=[
                pltpu.VMEM((C, tile_n), jnp.float32),            # accumulator
                pltpu.VMEM((1 if fast else 8, tile_n), jnp.int32),  # flat index
                pltpu.VMEM((8, tile_n), jnp.float32),            # corner weights
            ],
        ),
        compiler_params=pltpu.CompilerParams(
            dimension_semantics=("parallel", "parallel", "arbitrary")),
    )(img_hw_max, kstart, kend, cam, feat)

    vox = out[:, :, :N].reshape(B, C, X, Y, Z)
    # grid_sample output would be (B, C, X, Y, Z); module then permutes (0,1,4,3,2).
    return jnp.transpose(vox, (0, 1, 4, 3, 2))       # (B, C, Z, Y, X)


def reference_f2v(frustum_features, lidar_to_cam, cam_to_img, image_shape,
                  grid_size, pc_range, disc_cfg):
    """Pure-JAX reference (gather-based trilinear grid_sample) for sanity checking."""
    B, C, D, H, W = frustum_features.shape
    X, Y, Z = grid_size
    num_bins = int(disc_cfg['num_bins'])
    depth_min = float(disc_cfg['depth_min'])
    depth_max = float(disc_cfg['depth_max'])
    cam, feat, img_hw_max = _prepare(
        frustum_features, lidar_to_cam, cam_to_img, image_shape, grid_size, pc_range)

    w = cam[:, 2, :]                                 # (B, N)
    u = cam[:, 0, :] / w
    v = cam[:, 1, :] / w
    bin_size = 2.0 * (depth_max - depth_min) / (num_bins * (1 + num_bins))
    d_bin = -0.5 + 0.5 * jnp.sqrt(1.0 + 8.0 * (w - depth_min) / bin_size)
    h_img = img_hw_max[0].astype(jnp.float32)
    w_img = img_hw_max[1].astype(jnp.float32)
    fin = lambda a: jnp.where(jnp.isfinite(a), a, -2.0)
    gx = fin(u / (w_img - 1.0) * 2.0 - 1.0)
    gy = fin(v / (h_img - 1.0) * 2.0 - 1.0)
    gz = fin(d_bin / (num_bins - 1.0) * 2.0 - 1.0)

    ix = ((gx + 1.0) * W - 1.0) * 0.5
    iy = ((gy + 1.0) * H - 1.0) * 0.5
    iz = ((gz + 1.0) * D - 1.0) * 0.5
    x0, y0, z0 = jnp.floor(ix), jnp.floor(iy), jnp.floor(iz)
    fx, fy, fz = ix - x0, iy - y0, iz - z0

    out = jnp.zeros((B, C, X * Y * Z), jnp.float32)
    for dz in (0, 1):
        zc = z0 + dz; wz = fz if dz else 1.0 - fz; vz = (zc >= 0) & (zc <= D - 1)
        for dy in (0, 1):
            yc = y0 + dy; wy = fy if dy else 1.0 - fy; vy = (yc >= 0) & (yc <= H - 1)
            for dx in (0, 1):
                xc = x0 + dx; wx = fx if dx else 1.0 - fx; vx = (xc >= 0) & (xc <= W - 1)
                valid = vz & vy & vx
                zi = jnp.clip(zc, 0, D - 1).astype(jnp.int32)
                yi = jnp.clip(yc, 0, H - 1).astype(jnp.int32)
                xi = jnp.clip(xc, 0, W - 1).astype(jnp.int32)
                flat = (zi * H + yi) * W + xi                      # (B, N)
                wgt = jnp.where(valid, wz * wy * wx, 0.0)
                gathered = jnp.take_along_axis(feat, flat[:, None, :], axis=2)  # (B, C, N)
                out = out + wgt[:, None, :] * gathered
    vox = out.reshape(B, C, X, Y, Z)
    return jnp.transpose(vox, (0, 1, 4, 3, 2))       # (B, C, Z, Y, X)


if __name__ == "__main__":
    key = jax.random.PRNGKey(0)
    kf, kr, kt, kk, kf2, kk2 = jax.random.split(key, 6)

    # ---------------- test 1: divisible shapes, explicit small tiles ----------
    B, C, D, H, W = 2, 4, 8, 16, 16                  # frustum: (B, C, D, H_image, W_image)
    grid_size = (16, 16, 4)                          # [X, Y, Z]
    pc_range = [2.0, -10.0, -3.0, 46.8, 10.0, 1.0]   # [xmin, ymin, zmin, xmax, ymax, zmax]
    disc_cfg = dict(mode='LID', num_bins=D, depth_min=2.0, depth_max=46.8)

    frustum = jax.random.normal(kf, (B, C, D, H, W), jnp.float32)

    # lidar_to_cam: affine (last row [0,0,0,1]); LiDAR->camera axis swap + small noise
    R = jnp.array([[0.0, -1.0, 0.0],
                   [0.0, 0.0, -1.0],
                   [1.0, 0.0, 0.0]], jnp.float32)
    Rb = R[None, :, :] + 0.01 * jax.random.normal(kr, (B, 3, 3), jnp.float32)
    tb = jnp.array([0.1, -0.2, 0.3], jnp.float32)[None, :] + \
        0.05 * jax.random.normal(kt, (B, 3), jnp.float32)
    lidar_to_cam = jnp.concatenate(
        [jnp.concatenate([Rb, tb[:, :, None]], axis=2),
         jnp.tile(jnp.array([[[0.0, 0.0, 0.0, 1.0]]], jnp.float32), (B, 1, 1))], axis=1)

    Kmat = jnp.array([[6.0, 0.0, 7.5, 0.0],
                      [0.0, 6.0, 7.5, 0.0],
                      [0.0, 0.0, 1.0, 0.0]], jnp.float32)
    cam_to_img = Kmat[None] + 0.001 * jax.random.normal(kk, (B, 3, 4), jnp.float32)

    image_shape = jnp.array([[H, W]] * B, jnp.int32)

    vox = frustum_to_voxel(frustum, lidar_to_cam, cam_to_img, image_shape,
                           grid_size, pc_range, disc_cfg, tile_n=256, tile_k=256)
    vox = jax.block_until_ready(vox)
    assert vox.shape == (B, C, grid_size[2], grid_size[1], grid_size[0]), vox.shape

    ref = reference_f2v(frustum, lidar_to_cam, cam_to_img, image_shape,
                        grid_size, pc_range, disc_cfg)
    err = float(jnp.max(jnp.abs(vox - ref)))
    assert err < 1e-3, f"max abs err (test 1) = {err}"

    # ------- test 2: non-divisible shapes exercise padding + default tiles ----
    D2, H2, W2 = 8, 10, 12
    grid_size2 = (12, 10, 5)                         # N = 600 (not tile-aligned)
    disc_cfg2 = dict(mode='LID', num_bins=D2, depth_min=2.0, depth_max=46.8)
    frustum2 = jax.random.normal(kf2, (B, C, D2, H2, W2), jnp.float32)
    K2 = jnp.array([[5.0, 0.0, 5.5, 0.0],
                    [0.0, 5.0, 4.5, 0.0],
                    [0.0, 0.0, 1.0, 0.0]], jnp.float32)
    cam_to_img2 = K2[None] + 0.001 * jax.random.normal(kk2, (B, 3, 4), jnp.float32)
    image_shape2 = jnp.array([[H2, W2]] * B, jnp.int32)

    vox2 = frustum_to_voxel(frustum2, lidar_to_cam, cam_to_img2, image_shape2,
                            grid_size2, pc_range, disc_cfg2)
    vox2 = jax.block_until_ready(vox2)
    assert vox2.shape == (B, C, grid_size2[2], grid_size2[1], grid_size2[0]), vox2.shape

    ref2 = reference_f2v(frustum2, lidar_to_cam, cam_to_img2, image_shape2,
                         grid_size2, pc_range, disc_cfg2)
    err2 = float(jnp.max(jnp.abs(vox2 - ref2)))
    assert err2 < 1e-3, f"max abs err (test 2) = {err2}"

    print("KERNEL_OK")
</pallas_src>

<mosaic_0001>
module attributes {stable_mosaic.version = 11 : i64} {
  func.func @kernel(%arg0: i32, %arg1: i32, %arg2: i32, %arg3: memref<2xi32, #tpu.memory_space<smem>>, %arg4: memref<8xi32, #tpu.memory_space<smem>>, %arg5: memref<8xi32, #tpu.memory_space<smem>>, %arg6: memref<1x3x256xf32, #tpu.memory_space<vmem>>, %arg7: memref<1x4x256xf32, #tpu.memory_space<vmem>>, %arg8: memref<1x4x256xf32, #tpu.memory_space<vmem>>, %arg9: memref<4x256xf32, #tpu.memory_space<vmem>>, %arg10: memref<1x256xi32, #tpu.memory_space<vmem>>, %arg11: memref<8x256xf32, #tpu.memory_space<vmem>>) attributes {dimension_semantics = [#tpu.dimension_semantics<parallel>, #tpu.dimension_semantics<parallel>, #tpu.dimension_semantics<arbitrary>], iteration_bounds = array<i64: 4, 2, 8>, scalar_prefetch = 3 : i64, scratch_operands = 3 : i64, tpu.core_type = #tpu.core_type<tc>, window_params = [{transform_indices = @transform_0, window_bounds = array<i64: 1, 3, 256>}, {transform_indices = @transform_1, window_bounds = array<i64: 1, 4, 256>}, {transform_indices = @transform_2, window_bounds = array<i64: 1, 4, 256>}]} {
    %c4_i32 = arith.constant 4 : i32
    %0 = arith.muli %arg1, %c4_i32 : i32
    %1 = arith.addi %0, %arg0 : i32
    %c0_i32 = arith.constant 0 : i32
    %2 = arith.cmpi eq, %arg2, %c0_i32 : i32
    %3 = arith.extui %2 : i1 to i32
    %c0_i32_0 = arith.constant 0 : i32
    %4 = arith.cmpi ne, %3, %c0_i32_0 : i32
    scf.if %4 {
      %cst = arith.constant 0.000000e+00 : f32
      %16 = vector.broadcast %cst : f32 to vector<4x256xf32>
      %c0 = arith.constant 0 : index
      %c0_3 = arith.constant 0 : index
      %17 = vector.load %arg9[%c0, %c0_3] : memref<4x256xf32, #tpu.memory_space<vmem>>, vector<4x256xf32>
      tpu.vector_store %arg9[%c0, %c0_3], %16 {strides = array<i32>} : memref<4x256xf32, #tpu.memory_space<vmem>>, vector<4x256xf32>,
      %c0_4 = arith.constant 0 : index
      %c0_5 = arith.constant 0 : index
      %c0_6 = arith.constant 0 : index
      %18 = vector.load %arg6[%c0_4, %c0_5, %c0_6] : memref<1x3x256xf32, #tpu.memory_space<vmem>>, vector<1x3x256xf32>
      %19 = vector.shape_cast %18 : vector<1x3x256xf32> to vector<3x256xf32>
      %20 = vector.extract_strided_slice %19 {offsets = [2, 0], sizes = [1, 256], strides = [1, 1]} : vector<3x256xf32> to vector<1x256xf32>
      %cst_7 = arith.constant 1.000000e+00 : f32
      %21 = vector.broadcast %cst_7 : f32 to vector<1x256xf32>
      %22 = arith.divf %21, %20 : vector<1x256xf32>
      %23 = vector.extract_strided_slice %19 {offsets = [0, 0], sizes = [1, 256], strides = [1, 1]} : vector<3x256xf32> to vector<1x256xf32>
      %24 = arith.mulf %23, %22 : vector<1x256xf32>
      %25 = vector.extract_strided_slice %19 {offsets = [1, 0], sizes = [1, 256], strides = [1, 1]} : vector<3x256xf32> to vector<1x256xf32>
      %26 = arith.mulf %25, %22 : vector<1x256xf32>
      %cst_8 = arith.constant 2.000000e+00 : f32
      %27 = vector.broadcast %cst_8 : f32 to vector<1x256xf32>
      %28 = arith.subf %20, %27 : vector<1x256xf32>
      %cst_9 = arith.constant 6.42857122 : f32
      %29 = vector.broadcast %cst_9 : f32 to vector<1x256xf32>
      %30 = arith.mulf %28, %29 : vector<1x256xf32>
      %cst_10 = arith.constant 1.000000e+00 : f32
      %31 = vector.broadcast %cst_10 : f32 to vector<1x256xf32>
      %32 = arith.addf %31, %30 : vector<1x256xf32>
      %33 = math.sqrt %32 : vector<1x256xf32>
      %cst_11 = arith.constant 5.000000e-01 : f32
      %34 = vector.broadcast %cst_11 : f32 to vector<1x256xf32>
      %35 = arith.mulf %34, %33 : vector<1x256xf32>
      %cst_12 = arith.constant -5.000000e-01 : f32
      %36 = vector.broadcast %cst_12 : f32 to vector<1x256xf32>
      %37 = arith.addf %36, %35 : vector<1x256xf32>
      %c0_13 = arith.constant 0 : index
      %38 = memref.load %arg3[%c0_13] : memref<2xi32, #tpu.memory_space<smem>>
      %39 = arith.sitofp %38 : i32 to f32
      %c1 = arith.constant 1 : index
      %40 = memref.load %arg3[%c1] : memref<2xi32, #tpu.memory_space<smem>>
      %41 = arith.sitofp %40 : i32 to f32
      %cst_14 = arith.constant 1.000000e+00 : f32
      %42 = arith.subf %41, %cst_14 : f32
      %43 = vector.broadcast %42 : f32 to vector<1x256xf32>
      %44 = arith.divf %24, %43 : vector<1x256xf32>
      %cst_15 = arith.constant 2.000000e+00 : f32
      %45 = vector.broadcast %cst_15 : f32 to vector<1x256xf32>
      %46 = arith.mulf %44, %45 : vector<1x256xf32>
      %cst_16 = arith.constant 1.000000e+00 : f32
      %47 = vector.broadcast %cst_16 : f32 to vector<1x256xf32>
      %48 = arith.subf %46, %47 : vector<1x256xf32>
      %cst_17 = arith.constant 1.000000e+00 : f32
      %49 = arith.subf %39, %cst_17 : f32
      %50 = vector.broadcast %49 : f32 to vector<1x256xf32>
      %51 = arith.divf %26, %50 : vector<1x256xf32>
      %cst_18 = arith.constant 2.000000e+00 : f32
      %52 = vector.broadcast %cst_18 : f32 to vector<1x256xf32>
      %53 = arith.mulf %51, %52 : vector<1x256xf32>
      %cst_19 = arith.constant 1.000000e+00 : f32
      %54 = vector.broadcast %cst_19 : f32 to vector<1x256xf32>
      %55 = arith.subf %53, %54 : vector<1x256xf32>
      %cst_20 = arith.constant 0.285714298 : f32
      %56 = vector.broadcast %cst_20 : f32 to vector<1x256xf32>
      %57 = arith.mulf %37, %56 : vector<1x256xf32>
      %cst_21 = arith.constant 1.000000e+00 : f32
      %58 = vector.broadcast %cst_21 : f32 to vector<1x256xf32>
      %59 = arith.subf %57, %58 : vector<1x256xf32>
      %60 = math.absf %48 : vector<1x256xf32>
      %cst_22 = arith.constant 0x7F800000 : f32
      %61 = vector.broadcast %cst_22 : f32 to vector<1x256xf32>
      %62 = arith.cmpf olt, %60, %61 : vector<1x256xf32>
      %cst_23 = arith.constant -2.000000e+00 : f32
      %63 = vector.broadcast %cst_23 : f32 to vector<1x256xf32>
      %64 = arith.select %62, %48, %63 : vector<1x256xi1>, vector<1x256xf32>
      %65 = math.absf %55 : vector<1x256xf32>
      %cst_24 = arith.constant 0x7F800000 : f32
      %66 = vector.broadcast %cst_24 : f32 to vector<1x256xf32>
      %67 = arith.cmpf olt, %65, %66 : vector<1x256xf32>
      %cst_25 = arith.constant -2.000000e+00 : f32
      %68 = vector.broadcast %cst_25 : f32 to vector<1x256xf32>
      %69 = arith.select %67, %55, %68 : vector<1x256xi1>, vector<1x256xf32>
      %70 = math.absf %59 : vector<1x256xf32>
      %cst_26 = arith.constant 0x7F800000 : f32
      %71 = vector.broadcast %cst_26 : f32 to vector<1x256xf32>
      %72 = arith.cmpf olt, %70, %71 : vector<1x256xf32>
      %cst_27 = arith.constant -2.000000e+00 : f32
      %73 = vector.broadcast %cst_27 : f32 to vector<1x256xf32>
      %74 = arith.select %72, %59, %73 : vector<1x256xi1>, vector<1x256xf32>
      %cst_28 = arith.constant 1.000000e+00 : f32
      %75 = vector.broadcast %cst_28 : f32 to vector<1x256xf32>
      %76 = arith.addf %64, %75 : vector<1x256xf32>
      %cst_29 = arith.constant 1.600000e+01 : f32
      %77 = vector.broadcast %cst_29 : f32 to vector<1x256xf32>
      %78 = arith.mulf %76, %77 : vector<1x256xf32>
      %cst_30 = arith.constant 1.000000e+00 : f32
      %79 = vector.broadcast %cst_30 : f32 to vector<1x256xf32>
      %80 = arith.subf %78, %79 : vector<1x256xf32>
      %cst_31 = arith.constant 5.000000e-01 : f32
      %81 = vector.broadcast %cst_31 : f32 to vector<1x256xf32>
      %82 = arith.mulf %80, %81 : vector<1x256xf32>
      %cst_32 = arith.constant 1.000000e+00 : f32
      %83 = vector.broadcast %cst_32 : f32 to vector<1x256xf32>
      %84 = arith.addf %69, %83 : vector<1x256xf32>
      %cst_33 = arith.constant 1.600000e+01 : f32
      %85 = vector.broadcast %cst_33 : f32 to vector<1x256xf32>
      %86 = arith.mulf %84, %85 : vector<1x256xf32>
      %cst_34 = arith.constant 1.000000e+00 : f32
      %87 = vector.broadcast %cst_34 : f32 to vector<1x256xf32>
      %88 = arith.subf %86, %87 : vector<1x256xf32>
      %cst_35 = arith.constant 5.000000e-01 : f32
      %89 = vector.broadcast %cst_35 : f32 to vector<1x256xf32>
      %90 = arith.mulf %88, %89 : vector<1x256xf32>
      %cst_36 = arith.constant 1.000000e+00 : f32
      %91 = vector.broadcast %cst_36 : f32 to vector<1x256xf32>
      %92 = arith.addf %74, %91 : vector<1x256xf32>
      %cst_37 = arith.constant 8.000000e+00 : f32
      %93 = vector.broadcast %cst_37 : f32 to vector<1x256xf32>
      %94 = arith.mulf %92, %93 : vector<1x256xf32>
      %cst_38 = arith.constant 1.000000e+00 : f32
      %95 = vector.broadcast %cst_38 : f32 to vector<1x256xf32>
      %96 = arith.subf %94, %95 : vector<1x256xf32>
      %cst_39 = arith.constant 5.000000e-01 : f32
      %97 = vector.broadcast %cst_39 : f32 to vector<1x256xf32>
      %98 = arith.mulf %96, %97 : vector<1x256xf32>
      %99 = math.floor %82 : vector<1x256xf32>
      %100 = math.floor %90 : vector<1x256xf32>
      %101 = math.floor %98 : vector<1x256xf32>
      %102 = arith.subf %82, %99 : vector<1x256xf32>
      %103 = arith.subf %90, %100 : vector<1x256xf32>
      %104 = arith.subf %98, %101 : vector<1x256xf32>
      %cst_40 = arith.constant 0.000000e+00 : f32
      %105 = vector.broadcast %cst_40 : f32 to vector<1x256xf32>
      %106 = arith.addf %101, %105 : vector<1x256xf32>
      %cst_41 = arith.constant 1.000000e+00 : f32
      %107 = vector.broadcast %cst_41 : f32 to vector<1x256xf32>
      %108 = arith.subf %107, %104 : vector<1x256xf32>
      %cst_42 = arith.constant 0.000000e+00 : f32
      %109 = vector.broadcast %cst_42 : f32 to vector<1x256xf32>
      %110 = arith.cmpf oge, %106, %109 : vector<1x256xf32>
      %cst_43 = arith.constant 7.000000e+00 : f32
      %111 = vector.broadcast %cst_43 : f32 to vector<1x256xf32>
      %112 = arith.cmpf ole, %106, %111 : vector<1x256xf32>
      %113 = arith.andi %110, %112 : vector<1x256xi1>
      %cst_44 = arith.constant 0.000000e+00 : f32
      %114 = vector.broadcast %cst_44 : f32 to vector<1x256xf32>
      %115 = arith.addf %100, %114 : vector<1x256xf32>
      %cst_45 = arith.constant 1.000000e+00 : f32
      %116 = vector.broadcast %cst_45 : f32 to vector<1x256xf32>
      %117 = arith.subf %116, %103 : vector<1x256xf32>
      %cst_46 = arith.constant 0.000000e+00 : f32
      %118 = vector.broadcast %cst_46 : f32 to vector<1x256xf32>
      %119 = arith.cmpf oge, %115, %118 : vector<1x256xf32>
      %cst_47 = arith.constant 1.500000e+01 : f32
      %120 = vector.broadcast %cst_47 : f32 to vector<1x256xf32>
      %121 = arith.cmpf ole, %115, %120 : vector<1x256xf32>
      %122 = arith.andi %119, %121 : vector<1x256xi1>
      %123 = arith.mulf %108, %117 : vector<1x256xf32>
      %124 = arith.andi %113, %122 : vector<1x256xi1>
      %cst_48 = arith.constant 0.000000e+00 : f32
      %125 = vector.broadcast %cst_48 : f32 to vector<1x256xf32>
      %126 = arith.addf %99, %125 : vector<1x256xf32>
      %cst_49 = arith.constant 1.000000e+00 : f32
      %127 = vector.broadcast %cst_49 : f32 to vector<1x256xf32>
      %128 = arith.subf %127, %102 : vector<1x256xf32>
      %cst_50 = arith.constant 0.000000e+00 : f32
      %129 = vector.broadcast %cst_50 : f32 to vector<1x256xf32>
      %130 = arith.cmpf oge, %126, %129 : vector<1x256xf32>
      %cst_51 = arith.constant 1.500000e+01 : f32
      %131 = vector.broadcast %cst_51 : f32 to vector<1x256xf32>
      %132 = arith.cmpf ole, %126, %131 : vector<1x256xf32>
      %133 = arith.andi %130, %132 : vector<1x256xi1>
      %134 = arith.andi %124, %133 : vector<1x256xi1>
      %135 = arith.mulf %123, %128 : vector<1x256xf32>
      %cst_52 = arith.constant 0.000000e+00 : f32
      %136 = vector.broadcast %cst_52 : f32 to vector<1x256xf32>
      %137 = arith.select %134, %135, %136 : vector<1x256xi1>, vector<1x256xf32>
      %c0_53 = arith.constant 0 : index
      %c0_54 = arith.constant 0 : index
      %138 = vector.load %arg11[%c0_53, %c0_54] : memref<8x256xf32, #tpu.memory_space<vmem>>, vector<1x256xf32>
      tpu.vector_store %arg11[%c0_53, %c0_54], %137 {strides = array<i32>} : memref<8x256xf32, #tpu.memory_space<vmem>>, vector<1x256xf32>,
      %cst_55 = arith.constant 1.000000e+00 : f32
      %139 = vector.broadcast %cst_55 : f32 to vector<1x256xf32>
      %140 = arith.addf %99, %139 : vector<1x256xf32>
      %cst_56 = arith.constant 0.000000e+00 : f32
      %141 = vector.broadcast %cst_56 : f32 to vector<1x256xf32>
      %142 = arith.cmpf oge, %140, %141 : vector<1x256xf32>
      %cst_57 = arith.constant 1.500000e+01 : f32
      %143 = vector.broadcast %cst_57 : f32 to vector<1x256xf32>
      %144 = arith.cmpf ole, %140, %143 : vector<1x256xf32>
      %145 = arith.andi %142, %144 : vector<1x256xi1>
      %146 = arith.andi %124, %145 : vector<1x256xi1>
      %147 = arith.mulf %123, %102 : vector<1x256xf32>
      %cst_58 = arith.constant 0.000000e+00 : f32
      %148 = vector.broadcast %cst_58 : f32 to vector<1x256xf32>
      %149 = arith.select %146, %147, %148 : vector<1x256xi1>, vector<1x256xf32>
      %c1_59 = arith.constant 1 : index
      %c0_60 = arith.constant 0 : index
      %150 = vector.load %arg11[%c1_59, %c0_60] : memref<8x256xf32, #tpu.memory_space<vmem>>, vector<1x256xf32>
      tpu.vector_store %arg11[%c1_59, %c0_60], %149 {strides = array<i32>} : memref<8x256xf32, #tpu.memory_space<vmem>>, vector<1x256xf32>,
      %cst_61 = arith.constant 1.000000e+00 : f32
      %151 = vector.broadcast %cst_61 : f32 to vector<1x256xf32>
      %152 = arith.addf %100, %151 : vector<1x256xf32>
      %cst_62 = arith.constant 0.000000e+00 : f32
      %153 = vector.broadcast %cst_62 : f32 to vector<1x256xf32>
      %154 = arith.cmpf oge, %152, %153 : vector<1x256xf32>
      %cst_63 = arith.constant 1.500000e+01 : f32
      %155 = vector.broadcast %cst_63 : f32 to vector<1x256xf32>
      %156 = arith.cmpf ole, %152, %155 : vector<1x256xf32>
      %157 = arith.andi %154, %156 : vector<1x256xi1>
      %158 = arith.mulf %108, %103 : vector<1x256xf32>
      %159 = arith.andi %113, %157 : vector<1x256xi1>
      %cst_64 = arith.constant 0.000000e+00 : f32
      %160 = vector.broadcast %cst_64 : f32 to vector<1x256xf32>
      %161 = arith.addf %99, %160 : vector<1x256xf32>
      %cst_65 = arith.constant 1.000000e+00 : f32
      %162 = vector.broadcast %cst_65 : f32 to vector<1x256xf32>
      %163 = arith.subf %162, %102 : vector<1x256xf32>
      %cst_66 = arith.constant 0.000000e+00 : f32
      %164 = vector.broadcast %cst_66 : f32 to vector<1x256xf32>
      %165 = arith.cmpf oge, %161, %164 : vector<1x256xf32>
      %cst_67 = arith.constant 1.500000e+01 : f32
      %166 = vector.broadcast %cst_67 : f32 to vector<1x256xf32>
      %167 = arith.cmpf ole, %161, %166 : vector<1x256xf32>
      %168 = arith.andi %165, %167 : vector<1x256xi1>
      %169 = arith.andi %159, %168 : vector<1x256xi1>
      %170 = arith.mulf %158, %163 : vector<1x256xf32>
      %cst_68 = arith.constant 0.000000e+00 : f32
      %171 = vector.broadcast %cst_68 : f32 to vector<1x256xf32>
      %172 = arith.select %169, %170, %171 : vector<1x256xi1>, vector<1x256xf32>
      %c2 = arith.constant 2 : index
      %c0_69 = arith.constant 0 : index
      %173 = vector.load %arg11[%c2, %c0_69] : memref<8x256xf32, #tpu.memory_space<vmem>>, vector<1x256xf32>
      tpu.vector_store %arg11[%c2, %c0_69], %172 {strides = array<i32>} : memref<8x256xf32, #tpu.memory_space<vmem>>, vector<1x256xf32>,
      %cst_70 = arith.constant 1.000000e+00 : f32
      %174 = vector.broadcast %cst_70 : f32 to vector<1x256xf32>
      %175 = arith.addf %99, %174 : vector<1x256xf32>
      %cst_71 = arith.constant 0.000000e+00 : f32
      %176 = vector.broadcast %cst_71 : f32 to vector<1x256xf32>
      %177 = arith.cmpf oge, %175, %176 : vector<1x256xf32>
      %cst_72 = arith.constant 1.500000e+01 : f32
      %178 = vector.broadcast %cst_72 : f32 to vector<1x256xf32>
      %179 = arith.cmpf ole, %175, %178 : vector<1x256xf32>
      %180 = arith.andi %177, %179 : vector<1x256xi1>
      %181 = arith.andi %159, %180 : vector<1x256xi1>
      %182 = arith.mulf %158, %102 : vector<1x256xf32>
      %cst_73 = arith.constant 0.000000e+00 : f32
      %183 = vector.broadcast %cst_73 : f32 to vector<1x256xf32>
      %184 = arith.select %181, %182, %183 : vector<1x256xi1>, vector<1x256xf32>
      %c3 = arith.constant 3 : index
      %c0_74 = arith.constant 0 : index
      %185 = vector.load %arg11[%c3, %c0_74] : memref<8x256xf32, #tpu.memory_space<vmem>>, vector<1x256xf32>
      tpu.vector_store %arg11[%c3, %c0_74], %184 {strides = array<i32>} : memref<8x256xf32, #tpu.memory_space<vmem>>, vector<1x256xf32>,
      %cst_75 = arith.constant 1.000000e+00 : f32
      %186 = vector.broadcast %cst_75 : f32 to vector<1x256xf32>
      %187 = arith.addf %101, %186 : vector<1x256xf32>
      %cst_76 = arith.constant 0.000000e+00 : f32
      %188 = vector.broadcast %cst_76 : f32 to vector<1x256xf32>
      %189 = arith.cmpf oge, %187, %188 : vector<1x256xf32>
      %cst_77 = arith.constant 7.000000e+00 : f32
      %190 = vector.broadcast %cst_77 : f32 to vector<1x256xf32>
      %191 = arith.cmpf ole, %187, %190 : vector<1x256xf32>
      %192 = arith.andi %189, %191 : vector<1x256xi1>
      %cst_78 = arith.constant 0.000000e+00 : f32
      %193 = vector.broadcast %cst_78 : f32 to vector<1x256xf32>
      %194 = arith.addf %100, %193 : vector<1x256xf32>
      %cst_79 = arith.constant 1.000000e+00 : f32
      %195 = vector.broadcast %cst_79 : f32 to vector<1x256xf32>
      %196 = arith.subf %195, %103 : vector<1x256xf32>
      %cst_80 = arith.constant 0.000000e+00 : f32
      %197 = vector.broadcast %cst_80 : f32 to vector<1x256xf32>
      %198 = arith.cmpf oge, %194, %197 : vector<1x256xf32>
      %cst_81 = arith.constant 1.500000e+01 : f32
      %199 = vector.broadcast %cst_81 : f32 to vector<1x256xf32>
      %200 = arith.cmpf ole, %194, %199 : vector<1x256xf32>
      %201 = arith.andi %198, %200 : vector<1x256xi1>
      %202 = arith.mulf %104, %196 : vector<1x256xf32>
      %203 = arith.andi %192, %201 : vector<1x256xi1>
      %cst_82 = arith.constant 0.000000e+00 : f32
      %204 = vector.broadcast %cst_82 : f32 to vector<1x256xf32>
      %205 = arith.addf %99, %204 : vector<1x256xf32>
      %cst_83 = arith.constant 1.000000e+00 : f32
      %206 = vector.broadcast %cst_83 : f32 to vector<1x256xf32>
      %207 = arith.subf %206, %102 : vector<1x256xf32>
      %cst_84 = arith.constant 0.000000e+00 : f32
      %208 = vector.broadcast %cst_84 : f32 to vector<1x256xf32>
      %209 = arith.cmpf oge, %205, %208 : vector<1x256xf32>
      %cst_85 = arith.constant 1.500000e+01 : f32
      %210 = vector.broadcast %cst_85 : f32 to vector<1x256xf32>
      %211 = arith.cmpf ole, %205, %210 : vector<1x256xf32>
      %212 = arith.andi %209, %211 : vector<1x256xi1>
      %213 = arith.andi %203, %212 : vector<1x256xi1>
      %214 = arith.mulf %202, %207 : vector<1x256xf32>
      %cst_86 = arith.constant 0.000000e+00 : f32
      %215 = vector.broadcast %cst_86 : f32 to vector<1x256xf32>
      %216 = arith.select %213, %214, %215 : vector<1x256xi1>, vector<1x256xf32>
      %c4 = arith.constant 4 : index
      %c0_87 = arith.constant 0 : index
      %217 = vector.load %arg11[%c4, %c0_87] : memref<8x256xf32, #tpu.memory_space<vmem>>, vector<1x256xf32>
      tpu.vector_store %arg11[%c4, %c0_87], %216 {strides = array<i32>} : memref<8x256xf32, #tpu.memory_space<vmem>>, vector<1x256xf32>,
      %cst_88 = arith.constant 1.000000e+00 : f32
      %218 = vector.broadcast %cst_88 : f32 to vector<1x256xf32>
      %219 = arith.addf %99, %218 : vector<1x256xf32>
      %cst_89 = arith.constant 0.000000e+00 : f32
      %220 = vector.broadcast %cst_89 : f32 to vector<1x256xf32>
      %221 = arith.cmpf oge, %219, %220 : vector<1x256xf32>
      %cst_90 = arith.constant 1.500000e+01 : f32
      %222 = vector.broadcast %cst_90 : f32 to vector<1x256xf32>
      %223 = arith.cmpf ole, %219, %222 : vector<1x256xf32>
      %224 = arith.andi %221, %223 : vector<1x256xi1>
      %225 = arith.andi %203, %224 : vector<1x256xi1>
      %226 = arith.mulf %202, %102 : vector<1x256xf32>
      %cst_91 = arith.constant 0.000000e+00 : f32
      %227 = vector.broadcast %cst_91 : f32 to vector<1x256xf32>
      %228 = arith.select %225, %226, %227 : vector<1x256xi1>, vector<1x256xf32>
      %c5 = arith.constant 5 : index
      %c0_92 = arith.constant 0 : index
      %229 = vector.load %arg11[%c5, %c0_92] : memref<8x256xf32, #tpu.memory_space<vmem>>, vector<1x256xf32>
      tpu.vector_store %arg11[%c5, %c0_92], %228 {strides = array<i32>} : memref<8x256xf32, #tpu.memory_space<vmem>>, vector<1x256xf32>,
      %cst_93 = arith.constant 1.000000e+00 : f32
      %230 = vector.broadcast %cst_93 : f32 to vector<1x256xf32>
      %231 = arith.addf %100, %230 : vector<1x256xf32>
      %cst_94 = arith.constant 0.000000e+00 : f32
      %232 = vector.broadcast %cst_94 : f32 to vector<1x256xf32>
      %233 = arith.cmpf oge, %231, %232 : vector<1x256xf32>
      %cst_95 = arith.constant 1.500000e+01 : f32
      %234 = vector.broadcast %cst_95 : f32 to vector<1x256xf32>
      %235 = arith.cmpf ole, %231, %234 : vector<1x256xf32>
      %236 = arith.andi %233, %235 : vector<1x256xi1>
      %237 = arith.mulf %104, %103 : vector<1x256xf32>
      %238 = arith.andi %192, %236 : vector<1x256xi1>
      %cst_96 = arith.constant 0.000000e+00 : f32
      %239 = vector.broadcast %cst_96 : f32 to vector<1x256xf32>
      %240 = arith.addf %99, %239 : vector<1x256xf32>
      %cst_97 = arith.constant 1.000000e+00 : f32
      %241 = vector.broadcast %cst_97 : f32 to vector<1x256xf32>
      %242 = arith.subf %241, %102 : vector<1x256xf32>
      %cst_98 = arith.constant 0.000000e+00 : f32
      %243 = vector.broadcast %cst_98 : f32 to vector<1x256xf32>
      %244 = arith.cmpf oge, %240, %243 : vector<1x256xf32>
      %cst_99 = arith.constant 1.500000e+01 : f32
      %245 = vector.broadcast %cst_99 : f32 to vector<1x256xf32>
      %246 = arith.cmpf ole, %240, %245 : vector<1x256xf32>
      %247 = arith.andi %244, %246 : vector<1x256xi1>
      %248 = arith.andi %238, %247 : vector<1x256xi1>
      %249 = arith.mulf %237, %242 : vector<1x256xf32>
      %cst_100 = arith.constant 0.000000e+00 : f32
      %250 = vector.broadcast %cst_100 : f32 to vector<1x256xf32>
      %251 = arith.select %248, %249, %250 : vector<1x256xi1>, vector<1x256xf32>
      %c6 = arith.constant 6 : index
      %c0_101 = arith.constant 0 : index
      %252 = vector.load %arg11[%c6, %c0_101] : memref<8x256xf32, #tpu.memory_space<vmem>>, vector<1x256xf32>
      tpu.vector_store %arg11[%c6, %c0_101], %251 {strides = array<i32>} : memref<8x256xf32, #tpu.memory_space<vmem>>, vector<1x256xf32>,
      %cst_102 = arith.constant 1.000000e+00 : f32
      %253 = vector.broadcast %cst_102 : f32 to vector<1x256xf32>
      %254 = arith.addf %99, %253 : vector<1x256xf32>
      %cst_103 = arith.constant 0.000000e+00 : f32
      %255 = vector.broadcast %cst_103 : f32 to vector<1x256xf32>
      %256 = arith.cmpf oge, %254, %255 : vector<1x256xf32>
      %cst_104 = arith.constant 1.500000e+01 : f32
      %257 = vector.broadcast %cst_104 : f32 to vector<1x256xf32>
      %258 = arith.cmpf ole, %254, %257 : vector<1x256xf32>
      %259 = arith.andi %256, %258 : vector<1x256xi1>
      %260 = arith.andi %238, %259 : vector<1x256xi1>
      %261 = arith.mulf %237, %102 : vector<1x256xf32>
      %cst_105 = arith.constant 0.000000e+00 : f32
      %262 = vector.broadcast %cst_105 : f32 to vector<1x256xf32>
      %263 = arith.select %260, %261, %262 : vector<1x256xi1>, vector<1x256xf32>
      %c7 = arith.constant 7 : index
      %c0_106 = arith.constant 0 : index
      %264 = vector.load %arg11[%c7, %c0_106] : memref<8x256xf32, #tpu.memory_space<vmem>>, vector<1x256xf32>
      tpu.vector_store %arg11[%c7, %c0_106], %263 {strides = array<i32>} : memref<8x256xf32, #tpu.memory_space<vmem>>, vector<1x256xf32>,
      %cst_107 = arith.constant -1.000000e+00 : f32
      %cst_108 = arith.constant 7.000000e+00 : f32
      %265 = vector.broadcast %cst_107 : f32 to vector<1x256xf32>
      %266 = arith.maximumf %265, %101 : vector<1x256xf32>
      %267 = vector.broadcast %cst_108 : f32 to vector<1x256xf32>
      %268 = arith.minimumf %267, %266 : vector<1x256xf32>
      %269 = arith.fptosi %268 : vector<1x256xf32> to vector<1x256xi32>
      %cst_109 = arith.constant -1.000000e+00 : f32
      %cst_110 = arith.constant 1.500000e+01 : f32
      %270 = vector.broadcast %cst_109 : f32 to vector<1x256xf32>
      %271 = arith.maximumf %270, %100 : vector<1x256xf32>
      %272 = vector.broadcast %cst_110 : f32 to vector<1x256xf32>
      %273 = arith.minimumf %272, %271 : vector<1x256xf32>
      %274 = arith.fptosi %273 : vector<1x256xf32> to vector<1x256xi32>
      %cst_111 = arith.constant -1.000000e+00 : f32
      %cst_112 = arith.constant 1.500000e+01 : f32
      %275 = vector.broadcast %cst_111 : f32 to vector<1x256xf32>
      %276 = arith.maximumf %275, %99 : vector<1x256xf32>
      %277 = vector.broadcast %cst_112 : f32 to vector<1x256xf32>
      %278 = arith.minimumf %277, %276 : vector<1x256xf32>
      %279 = arith.fptosi %278 : vector<1x256xf32> to vector<1x256xi32>
      %c16_i32 = arith.constant 16 : i32
      %280 = vector.broadcast %c16_i32 : i32 to vector<1x256xi32>
      %281 = arith.muli %269, %280 : vector<1x256xi32>
      %282 = arith.addi %281, %274 : vector<1x256xi32>
      %c16_i32_113 = arith.constant 16 : i32
      %283 = vector.broadcast %c16_i32_113 : i32 to vector<1x256xi32>
      %284 = arith.muli %282, %283 : vector<1x256xi32>
      %285 = arith.addi %284, %279 : vector<1x256xi32>
      %c0_114 = arith.constant 0 : index
      %c0_115 = arith.constant 0 : index
      %286 = vector.load %arg10[%c0_114, %c0_115] : memref<1x256xi32, #tpu.memory_space<vmem>>, vector<1x256xi32>
      tpu.vector_store %arg10[%c0_114, %c0_115], %285 {strides = array<i32>} : memref<1x256xi32, #tpu.memory_space<vmem>>, vector<1x256xi32>,
    } else {
    }
    %5 = arith.index_cast %1 : i32 to index
    %6 = memref.load %arg5[%5] : memref<8xi32, #tpu.memory_space<smem>>
    %7 = arith.index_cast %1 : i32 to index
    %8 = memref.load %arg4[%7] : memref<8xi32, #tpu.memory_space<smem>>
    %9 = arith.subi %6, %8 : i32
    %10 = arith.cmpi sle, %arg2, %9 : i32
    %11 = arith.extui %10 : i1 to i32
    %c0_i32_1 = arith.constant 0 : i32
    %12 = arith.cmpi ne, %11, %c0_i32_1 : i32
    scf.if %12 {
      %16 = arith.index_cast %1 : i32 to index
      %17 = memref.load %arg4[%16] : memref<8xi32, #tpu.memory_space<smem>>
      %18 = arith.addi %17, %arg2 : i32
      %c256_i32 = arith.constant 256 : i32
      %19 = arith.muli %18, %c256_i32 : i32
      %20 = tpu.iota {dimensions = array<i32: 0>} : vector<256x256xi32>
      %c0 = arith.constant 0 : index
      %c0_3 = arith.constant 0 : index
      %21 = vector.load %arg10[%c0, %c0_3] : memref<1x256xi32, #tpu.memory_space<vmem>>, vector<1x256xi32>
      %22 = vector.broadcast %19 : i32 to vector<1x256xi32>
      %23 = arith.subi %21, %22 : vector<1x256xi32>
      %24 = vector.broadcast %23 : vector<1x256xi32> to vector<256x256xi32>
      %25 = arith.subi %20, %24 : vector<256x256xi32>
      %c273_i32 = arith.constant 273 : i32
      %26 = vector.broadcast %c273_i32 : i32 to vector<256x256xi32>
      %27 = arith.cmpi eq, %25, %26 : vector<256x256xi32>
      %c7 = arith.constant 7 : index
      %c0_4 = arith.constant 0 : index
      %28 = vector.load %arg11[%c7, %c0_4] : memref<8x256xf32, #tpu.memory_space<vmem>>, vector<1x256xf32>
      %cst = arith.constant 0.000000e+00 : f32
      %29 = vector.shape_cast %28 : vector<1x256xf32> to vector<1x256xf32>
      %30 = vector.broadcast %29 : vector<1x256xf32> to vector<256x256xf32>
      %31 = vector.broadcast %cst : f32 to vector<256x256xf32>
      %32 = arith.select %27, %30, %31 : vector<256x256xi1>, vector<256x256xf32>
      %c272_i32 = arith.constant 272 : i32
      %33 = vector.broadcast %c272_i32 : i32 to vector<256x256xi32>
      %34 = arith.cmpi eq, %25, %33 : vector<256x256xi32>
      %c6 = arith.constant 6 : index
      %c0_5 = arith.constant 0 : index
      %35 = vector.load %arg11[%c6, %c0_5] : memref<8x256xf32, #tpu.memory_space<vmem>>, vector<1x256xf32>
      %36 = vector.shape_cast %35 : vector<1x256xf32> to vector<1x256xf32>
      %37 = vector.broadcast %36 : vector<1x256xf32> to vector<256x256xf32>
      %38 = arith.select %34, %37, %32 : vector<256x256xi1>, vector<256x256xf32>
      %c257_i32 = arith.constant 257 : i32
      %39 = vector.broadcast %c257_i32 : i32 to vector<256x256xi32>
      %40 = arith.cmpi eq, %25, %39 : vector<256x256xi32>
      %c5 = arith.constant 5 : index
      %c0_6 = arith.constant 0 : index
      %41 = vector.load %arg11[%c5, %c0_6] : memref<8x256xf32, #tpu.memory_space<vmem>>, vector<1x256xf32>
      %42 = vector.shape_cast %41 : vector<1x256xf32> to vector<1x256xf32>
      %43 = vector.broadcast %42 : vector<1x256xf32> to vector<256x256xf32>
      %44 = arith.select %40, %43, %38 : vector<256x256xi1>, vector<256x256xf32>
      %c256_i32_7 = arith.constant 256 : i32
      %45 = vector.broadcast %c256_i32_7 : i32 to vector<256x256xi32>
      %46 = arith.cmpi eq, %25, %45 : vector<256x256xi32>
      %c4 = arith.constant 4 : index
      %c0_8 = arith.constant 0 : index
      %47 = vector.load %arg11[%c4, %c0_8] : memref<8x256xf32, #tpu.memory_space<vmem>>, vector<1x256xf32>
      %48 = vector.shape_cast %47 : vector<1x256xf32> to vector<1x256xf32>
      %49 = vector.broadcast %48 : vector<1x256xf32> to vector<256x256xf32>
      %50 = arith.select %46, %49, %44 : vector<256x256xi1>, vector<256x256xf32>
      %c17_i32 = arith.constant 17 : i32
      %51 = vector.broadcast %c17_i32 : i32 to vector<256x256xi32>
      %52 = arith.cmpi eq, %25, %51 : vector<256x256xi32>
      %c3 = arith.constant 3 : index
      %c0_9 = arith.constant 0 : index
      %53 = vector.load %arg11[%c3, %c0_9] : memref<8x256xf32, #tpu.memory_space<vmem>>, vector<1x256xf32>
      %54 = vector.shape_cast %53 : vector<1x256xf32> to vector<1x256xf32>
      %55 = vector.broadcast %54 : vector<1x256xf32> to vector<256x256xf32>
      %56 = arith.select %52, %55, %50 : vector<256x256xi1>, vector<256x256xf32>
      %c16_i32 = arith.constant 16 : i32
      %57 = vector.broadcast %c16_i32 : i32 to vector<256x256xi32>
      %58 = arith.cmpi eq, %25, %57 : vector<256x256xi32>
      %c2 = arith.constant 2 : index
      %c0_10 = arith.constant 0 : index
      %59 = vector.load %arg11[%c2, %c0_10] : memref<8x256xf32, #tpu.memory_space<vmem>>, vector<1x256xf32>
      %60 = vector.shape_cast %59 : vector<1x256xf32> to vector<1x256xf32>
      %61 = vector.broadcast %60 : vector<1x256xf32> to vector<256x256xf32>
      %62 = arith.select %58, %61, %56 : vector<256x256xi1>, vector<256x256xf32>
      %c1_i32 = arith.constant 1 : i32
      %63 = vector.broadcast %c1_i32 : i32 to vector<256x256xi32>
      %64 = arith.cmpi eq, %25, %63 : vector<256x256xi32>
      %c1 = arith.constant 1 : index
      %c0_11 = arith.constant 0 : index
      %65 = vector.load %arg11[%c1, %c0_11] : memref<8x256xf32, #tpu.memory_space<vmem>>, vector<1x256xf32>
      %66 = vector.shape_cast %65 : vector<1x256xf32> to vector<1x256xf32>
      %67 = vector.broadcast %66 : vector<1x256xf32> to vector<256x256xf32>
      %68 = arith.select %64, %67, %62 : vector<256x256xi1>, vector<256x256xf32>
      %c0_i32_12 = arith.constant 0 : i32
      %69 = vector.broadcast %c0_i32_12 : i32 to vector<256x256xi32>
      %70 = arith.cmpi eq, %25, %69 : vector<256x256xi32>
      %c0_13 = arith.constant 0 : index
      %c0_14 = arith.constant 0 : index
      %71 = vector.load %arg11[%c0_13, %c0_14] : memref<8x256xf32, #tpu.memory_space<vmem>>, vector<1x256xf32>
      %72 = vector.shape_cast %71 : vector<1x256xf32> to vector<1x256xf32>
      %73 = vector.broadcast %72 : vector<1x256xf32> to vector<256x256xf32>
      %74 = arith.select %70, %73, %68 : vector<256x256xi1>, vector<256x256xf32>
      %c0_15 = arith.constant 0 : index
      %c0_16 = arith.constant 0 : index
      %75 = vector.load %arg9[%c0_15, %c0_16] : memref<4x256xf32, #tpu.memory_space<vmem>>, vector<4x256xf32>
      %c0_17 = arith.constant 0 : index
      %c0_18 = arith.constant 0 : index
      %c0_19 = arith.constant 0 : index
      %76 = vector.load %arg7[%c0_17, %c0_18, %c0_19] : memref<1x4x256xf32, #tpu.memory_space<vmem>>, vector<1x4x256xf32>
      %77 = vector.shape_cast %76 : vector<1x4x256xf32> to vector<4x256xf32>
      %cst_20 = arith.constant dense<0.000000e+00> : vector<4x256xf32>
      %78 = tpu.matmul %77, %74, %cst_20 {dimension_numbers = #tpu.dot_dimension_numbers<[1], [0], [0], [1], [0, 0, 1, 1], [], []>} : vector<4x256xf32>, vector<256x256xf32>, vector<4x256xf32> -> vector<4x256xf32>
      %79 = arith.addf %75, %78 : vector<4x256xf32>
      %c0_21 = arith.constant 0 : index
      %c0_22 = arith.constant 0 : index
      %80 = vector.load %arg9[%c0_21, %c0_22] : memref<4x256xf32, #tpu.memory_space<vmem>>, vector<4x256xf32>
      tpu.vector_store %arg9[%c0_21, %c0_22], %79 {strides = array<i32>} : memref<4x256xf32, #tpu.memory_space<vmem>>, vector<4x256xf32>,
    } else {
    }
    %c7_i32 = arith.constant 7 : i32
    %13 = arith.cmpi eq, %arg2, %c7_i32 : i32
    %14 = arith.extui %13 : i1 to i32
    %c0_i32_2 = arith.constant 0 : i32
    %15 = arith.cmpi ne, %14, %c0_i32_2 : i32
    scf.if %15 {
      %c0 = arith.constant 0 : index
      %c0_3 = arith.constant 0 : index
      %16 = vector.load %arg9[%c0, %c0_3] : memref<4x256xf32, #tpu.memory_space<vmem>>, vector<4x256xf32>
      %c0_4 = arith.constant 0 : index
      %c0_5 = arith.constant 0 : index
      %c0_6 = arith.constant 0 : index
      %17 = vector.load %arg8[%c0_4, %c0_5, %c0_6] : memref<1x4x256xf32, #tpu.memory_space<vmem>>, vector<1x4x256xf32>
      %18 = vector.shape_cast %17 : vector<1x4x256xf32> to vector<4x256xf32>
      %19 = vector.shape_cast %16 : vector<4x256xf32> to vector<1x4x256xf32>
      tpu.vector_store %arg8[%c0_4, %c0_5, %c0_6], %19 {strides = array<i32>} : memref<1x4x256xf32, #tpu.memory_space<vmem>>, vector<1x4x256xf32>,
    } else {
    }
    return
  }
  func.func @transform_0(%arg0: i32, %arg1: i32, %arg2: i32, %arg3: memref<2xi32, #tpu.memory_space<smem>>, %arg4: memref<8xi32, #tpu.memory_space<smem>>, %arg5: memref<8xi32, #tpu.memory_space<smem>>) -> (i32, i32, i32) {
    %c0_i32 = arith.constant 0 : i32
    %c0_i32_0 = arith.constant 0 : i32
    return %arg1, %c0_i32, %arg0 : i32, i32, i32
  }
  func.func @transform_1(%arg0: i32, %arg1: i32, %arg2: i32, %arg3: memref<2xi32, #tpu.memory_space<smem>>, %arg4: memref<8xi32, #tpu.memory_space<smem>>, %arg5: memref<8xi32, #tpu.memory_space<smem>>) -> (i32, i32, i32) {
    %c4_i32 = arith.constant 4 : i32
    %0 = arith.muli %arg1, %c4_i32 : i32
    %1 = arith.addi %0, %arg0 : i32
    %2 = arith.index_cast %1 : i32 to index
    %3 = memref.load %arg4[%2] : memref<8xi32, #tpu.memory_space<smem>>
    %4 = arith.addi %3, %arg2 : i32
    %5 = arith.index_cast %1 : i32 to index
    %6 = memref.load %arg5[%5] : memref<8xi32, #tpu.memory_space<smem>>
    %7 = arith.minsi %4, %6 : i32
    %c0_i32 = arith.constant 0 : i32
    %c0_i32_0 = arith.constant 0 : i32
    return %arg1, %c0_i32, %7 : i32, i32, i32
  }
  func.func @transform_2(%arg0: i32, %arg1: i32, %arg2: i32, %arg3: memref<2xi32, #tpu.memory_space<smem>>, %arg4: memref<8xi32, #tpu.memory_space<smem>>, %arg5: memref<8xi32, #tpu.memory_space<smem>>) -> (i32, i32, i32) {
    %c0_i32 = arith.constant 0 : i32
    %c0_i32_0 = arith.constant 0 : i32
    return %arg1, %c0_i32, %arg0 : i32, i32, i32
  }
}

</mosaic_0001>

<bundles_post_ra>
// kernel: tpu_custom_call.1
= control target key start
LH: loop header
LB: loop body
LE: loop exit
PB: predicated region body
PF: predicated region fallthrough
CT: control target
= control target key end

     0   :  { %s4104_s0 = inlined_call_operand.vmem [shape: s32[2], index: 0, kind: input, shape index: {}]   ;;  %s4105_s3 = inlined_call_operand.vmem [shape: f32[2,3,1024], index: 3, kind: input, shape index: {}]   ;;  %s4106_s4 = inlined_call_operand.hbm [shape: f32[2,4,2048], index: 4, kind: input, shape index: {}]   ;;  %s4107_s5 = inlined_call_operand.hbm [shape: f32[2,4,1024], index: 5, kind: output, shape index: {}]   ;;  %s4108_s1 = inlined_call_operand.vmem [shape: s32[8], index: 1, kind: input, shape index: {}]   ;;  %s4109_s2 = inlined_call_operand.vmem [shape: s32[8], index: 2, kind: input, shape index: {}]  }
   0x1   :  { %s10_s20 = sshll.u32 %s4104_s0, 4  ;;  %s14_s23 = sshll.u32 %s4108_s1, 4  ;;  %s11_s20 = int_to_ptr.vmem [resolvable:$true] %s10_s20  ;;  %s15_s23 = int_to_ptr.vmem [resolvable:$true] %s14_s23 }
   0x2   :  { %s2333_s24 = scalar_lea.vmem %s11_s20, 16  ;;  %p2338_p1 = scmp.lt.s32.totalorder %s11_s20, %s11_s20 }
   0x3   :  { %p2334_p0 = scmp.ne.s32.totalorder %s11_s20, %s2333_s24  ;;  %p2339_p2 = scmp.lt.s32.totalorder %s2333_s24, %s2333_s24 }
   0x5   :  { %p2340_p3 = por %p2339_p2, %p2338_p1 }
   0x7   :  { %p2341_p4 = pnand %p2340_p3, %p2334_p0 }
   0x9   :  { %2344 = shalt.err (!%p2341_p4)  }
   0xa   :  { %s2541_s25 = smov [#allocation6]   ;;  %s2345_s26 = scalar_lea.vmem %s15_s23, 16 }
   0xb   :  { %13 = dma.vmem_to_smem %s11_s20, 16, %s2541_s25, [#allocation5] }
   0xc   :  { %p2346_p5 = scmp.ne.s32.totalorder %s15_s23, %s2345_s26  ;;  %p2350_p6 = scmp.lt.s32.totalorder %s15_s23, %s15_s23 }
   0xd   :  { %p2351_p7 = scmp.lt.s32.totalorder %s2345_s26, %s2345_s26 }
   0xf   :  { %p2352_p8 = por %p2351_p7, %p2350_p6 }
  0x11   :  { %p2353_p9 = pnand %p2352_p8, %p2346_p5 }
  0x13   :  { %2356 = shalt.err (!%p2353_p9)  }
  0x14   :  { %s2542_s0 = smov [#allocation7]   ;;  %s18_s28 = sshll.u32 %s4109_s2, 4  ;;  %s19_s28 = int_to_ptr.vmem [resolvable:$true] %s18_s28 }
  0x15   :  { %17 = dma.vmem_to_smem %s15_s23, 16, %s2542_s0, [#allocation5] }
  0x16   :  { %s2357_s29 = scalar_lea.vmem %s19_s28, 16  ;;  %p2362_p11 = scmp.lt.s32.totalorder %s19_s28, %s19_s28 }
  0x17   :  { %p2358_p10 = scmp.ne.s32.totalorder %s19_s28, %s2357_s29  ;;  %p2363_p12 = scmp.lt.s32.totalorder %s2357_s29, %s2357_s29 }
  0x19   :  { %p2364_p13 = por %p2363_p12, %p2362_p11 }
  0x1b   :  { %p2365_p0 = pnand %p2364_p13, %p2358_p10 }
  0x1d   :  { %2368 = shalt.err (!%p2365_p0)  }
  0x1e   :  { %s2543_s30 = smov [#allocation8]  }
  0x1f   :  { %21 = dma.vmem_to_smem %s19_s28, 16, %s2543_s30, [#allocation5] }
  0x20   :  { %2479 = dma.done.wait [#allocation5], 48 }
  0x21   :  { %2480 = vsyncadd [#allocation5], 4294967248 }
  0x22   :  { %23 = sfence }
  0x23   :  { %24 = vsyncpa [#allocation10], 0 }
  0x24   :  { %26 = vsyncpa [#allocation10 + $0x1], 0 }
  0x25   :  { %27 = vsyncpa [#allocation11], 0 }
  0x26   :  { %29 = vsyncpa [#allocation11 + $0x1], 0  ;;  %s2588_s6 = smov 0   ;;  %s2590_s2 = smov 0  }
  0x27   :  { %s2592_s7 = smov 0   ;;  %s2594_s8 = smov 0  }
  0x28   :  { %s2596_s9 = smov 0   ;;  %s2598_s10 = smov 0  }
  0x29   :  { %s2600_s11 = smov 0   ;;  %s2602_s12 = smov 0  }
  0x2a   :  { %s2604_s13 = smov 0   ;;  %s2606_s14 = smov 0  }
  0x2b   :  { %s2608_s15 = smov 0   ;;  %s2610_s16 = smov 0  }
  0x2c   :  { %s2612_s17 = smov 0  }
  0x2d LB: > { %4119 = sst [smem:[#allocation20_spill]] %s2499_s7  ;;  %s2082_s18 = sadd.s32 4294967295, %s2539_s17   ;;  %s2539_s17 = sphi %s2612_s17, %s35_s17   ;;  %s2535_s16 = sphi %s2610_s16, %s4161_s16   ;;  %s2531_s15 = sphi %s2608_s15, %s4167_s15   ;;  %s2527_s14 = sphi %s2606_s14, %s4159_s14   ;;  %s2523_s13 = sphi %s2604_s13, %s4158_s13   ;;  %s2519_s12 = sphi %s2602_s12, %s4166_s12   ;;  %s2515_s11 = sphi %s2600_s11, %s4157_s11   ;;  %s2511_s10 = sphi %s2598_s10, %s4156_s10   ;;  %s2507_s9 = sphi %s2596_s9, %s4165_s9   ;;  %s2503_s8 = sphi %s2594_s8, %s4164_s8   ;;  %s2499_s7 = sphi %s2592_s7, %s4154_s7   ;;  %s2495_s2 = sphi %s2590_s2, %s4163_s2   ;;  %s2491_s6 = sphi %s2588_s6, %s4162_s6  }
  0x2e   : > { %4120 = sst [smem:[#allocation21_spill]] %s2511_s10  ;;  %s47_s19 = sadd.s32 1, %s2527_s14 }
  0x2f   : > { %4121 = sst [smem:[#allocation22_spill]] %s2527_s14  ;;  %p48_p1 = scmp.ge.s32.totalorder %s47_s19, 8 }
  0x30   : > { %4122 = sst [smem:[#allocation23_spill]] %s2535_s16  ;;  %s50_s20 = sadd.s32 1, %s2531_s15 }
  0x31   : > { %s2084_s22 = sshll.u32 %s2531_s15, 2  ;;  %s4169_s19 = smov (%p48_p1, %s47_s19), 0 }
  0x32   : > { %4123 = sst [smem:[#allocation24_spill]] %s4169_s19  ;;  %s4171_s20 = smov (!%p48_p1, %s50_s20), %s2531_s15 }
  0x33   : > { %s54_s23 = sadd.s32 1, %s2535_s16  ;;  %s2663_s24 = sadd.s32 %s2535_s16, %s2084_s22 }
  0x34   : > { %p52_p2 = scmp.ge.s32.totalorder %s4171_s20, 2  ;;  %s88_s25 = sld [smem:[#allocation7 + %s2663_s24]] }
  0x35   : > { %s90_s26 = sld [smem:[#allocation8 + %s2663_s24]]  ;;  %p112_p3 = scmp.ne.s32.totalorder %s2511_s10, %s2507_s9 }
  0x36   : > { %s4173_s20 = smov (%p52_p2, %s4171_s20), 0  ;;  %s4175_s23 = smov (!%p52_p2, %s54_s23), %s2535_s16 }
  0x37   : > { %4124 = sst [smem:[#allocation25_spill]] %s4173_s20  ;;  %s2085_s0 = sshll.u32 %s4173_s20, 2 }
  0x38   : > { %p113_p4 = scmp.eq.s32.totalorder %s2539_s17, 0  ;;  %p56_p5 = scmp.ge.s32.totalorder %s4175_s23, 4 }
  0x39   : > { %s100_s1 = ssub.s32 %s2531_s15, %s4173_s20  ;;  %p118_p6 = scmp.ne.s32.totalorder %s2507_s9, %s2503_s8 }
  0x3a   : > { %s89_s27 = sadd.s32 %s2527_s14, %s88_s25  ;;  %s4177_s23 = smov (%p56_p5, %s4175_s23), 0 }
  0x3b   : > { %4125 = sst [smem:[#allocation26_spill]] %s4177_s23  ;;  %p91_p7 = scmp.lt.s32.totalorder %s89_s27, %s90_s26 }
  0x3c   : > { %p119_p8 = scmp.eq.s32.totalorder %s2082_s18, 0  ;;  %s94_s28 = sadd.s32 %s2085_s0, %s4177_s23 }
  0x3d   : > { %s129_s29 = ssub.s32 %s2535_s16, %s4177_s23  ;;  %s4179_s27 = smov (!%p91_p7, %s89_s27), %s90_s26 }
  0x3e   : > { %s95_s30 = sld [smem:[#allocation7 + %s94_s28]]  ;;  %p2686_p9 = por %p119_p8, %p118_p6 }
  0x3f   : > { %s97_s22 = sld [smem:[#allocation8 + %s94_s28]]  ;;  %s130_s25 = sor.u32 %s129_s29, %s100_s1 }
  0x40   : > { %s4126_s8 = scalar_select %p2686_p9, 1, 0 }
  0x41   : > { %p131_p10 = scmp.eq.s32.totalorder %s130_s25, 0  ;;  %s133_s21 = sadd.s32 1, %s2499_s7 }
  0x42   : > { %p143_p11 = scmp.ne.s32.totalorder %s2499_s7, %s2495_s2  ;;  %p144_p12 = scmp.eq.s32.totalorder %s2082_s18, 63 }
  0x43   : > { %s2696_s0 = scalar_select %p131_p10, %s2499_s7, %s133_s21  }
  0x44   : > { %p2698_p13 = por %p144_p12, %p143_p11  ;;  %p149_p0 = scmp.ne.s32.totalorder %s2495_s2, %s2491_s6 }
  0x45   : > { %4127 = sst [smem:[#allocation27_spill]] %s2696_s0  ;;  %s96_s28 = sadd.s32 %s95_s30, %s4169_s19 }
  0x46   : > { %s4128_s26 = scalar_select %p2698_p13, 1, 0 }
  0x47   : > { %s4129_s23 = sadd.s32 4294967294, %s2539_s17   ;;  %p98_p2 = scmp.lt.s32.totalorder %s96_s28, %s97_s22 }
  0x48   : > { %p150_p1 = scmp.eq.s32.totalorder %s4129_s23, 63  ;;  %p2716_p6 = por %p113_p4, %p112_p3 }
  0x49   : > { %s4181_s28 = smov (!%p98_p2, %s96_s28), %s97_s22  ;;  %s105_s30 = sadd.s32 1, %s2511_s10 }
  0x4a   : > { %p2707_p5 = por %p150_p1, %p149_p0  ;;  %s101_s21 = ssub.s32 %s4179_s27, %s4181_s28 }
  0x4b   : > { %s102_s23 = sor.u32 %s101_s21, %s100_s1  ;;  %p2212_p7 = scmp.lt.s32.totalorder %s2539_s17, 64 }
  0x4c   : > { %s4130_s29 = scalar_select %p2707_p5, 1, 0 }
  0x4d   : > { %p103_p8 = scmp.eq.s32.totalorder %s102_s23, 0  ;;  %s183_s25 = sand.u32 1, %s2511_s10  }
  0x4e   : > { %s2192_s22 = scalar_select %p2716_p6, [#allocation7], [#allocation13] }
  0x4f   : > { %s2726_s20 = scalar_select %p103_p8, %s2511_s10, %s105_s30  }
  0x50   : > { %s4183_s24 = smov (!%p2716_p6, %s2663_s24), 0  ;;  %s4185_s22 = smov (!%p2212_p7, %s2192_s22), [#allocation15] }
  0x51   : > { %4132 = sst [smem:[#allocation28_spill]] %s2726_s20  ;;  %s4187_s24 = smov (!%p2212_p7, %s4183_s24), 0 }
  0x52   : > { %s2194_s19 = scalar_select %p2716_p6, [#allocation8], [#allocation14] }
  0x53   : > { %s190_s27 = sld [smem:[%s4185_s22 + %s4187_s24]]  ;;  %s2088_s28 = sshll.u32 %s183_s25, 3 }
  0x54   : > { %s4189_s19 = smov (!%p2212_p7, %s2194_s19), [#allocation16]  ;;  %p2735_p3 = pnand %p2212_p7, %p2716_p6 }
  0x55   : > { %s192_s21 = sld [smem:[%s4189_s19 + %s4187_s24]]  ;;  %p2093_p4 = scmp.ge.s32.totalorder %s2539_s17, 1 }
  0x56   : > { %p209_p10 = scmp.lt.s32.totalorder %s2539_s17, 65  ;;  %s2091_s16 = sshll.u32 %s2531_s15, 4 }
  0x57   : > { %s187_s22 = scalar_lea.vmem [#allocation9], %s2088_s28  ;;  %p2371_p1 = pneg %p2735_p3 }
  0x58   : > { %p2742_p11 = pnand %p2093_p4, %p209_p10  ;;  %s204_s20 = sshll.u32 %s187_s22, 4  ;;  %s2747_s20 = int_to_ptr.vmem [resolvable:$true] %s204_s20 }
  0x59   : > { %s191_s30 = sadd.s32 %s2527_s14, %s190_s27  ;;  %s184_s27 = scalar_lea.sflag [#allocation10], %s183_s25 }
  0x5a   : > { %s2374_s28 = scalar_lea.hbm %s4106_s4, 2048 }
  0x5b   : > { %p193_p12 = scmp.lt.s32.totalorder %s191_s30, %s192_s21 }
  0x5d   : > { %s4191_s30 = smov (!%p193_p12, %s191_s30), %s192_s21 }
  0x5e   : > { %s2090_s18 = sshll.u32 %s4191_s30, 1 }
  0x5f   : > { %s200_s10 = sadd.s32 %s2091_s16, %s2090_s18 }
  0x60   : > { %s2092_s0 = sshll.u32 %s200_s10, 6 }
  0x61   : > { %s2752_s7 = scalar_lea.hbm %s4106_s4, %s2092_s0 }
  0x62   : > { %s2369_s14 = scalar_lea.hbm %s2752_s7, 128  ;;  %p2375_p7 = scmp.lt.u32.totalorder %s2752_s7, %s4106_s4 }
  0x63   : > { %p2370_p0 = scmp.ne.s32.totalorder %s2752_s7, %s2369_s14  ;;  %p2376_p8 = scmp.lt.u32.totalorder %s2374_s28, %s2369_s14 }
  0x64   : > { %p2378_p10 = scmp.lt.u32.totalorder %s2369_s14, %s2752_s7 }
  0x65   : > { %p2372_p2 = pnand %p2371_p1, %p2370_p0  ;;  %p2377_p4 = por %p2376_p8, %p2375_p7 }
  0x67   : > { %p2373_p6 = pneg %p2372_p2  ;;  %p2379_p12 = por %p2378_p10, %p2377_p4 }
  0x69   : > { %p2380_p5 = pnand %p2379_p12, %p2373_p6 }
  0x6b   : > { %2383 = shalt.err (!%p2380_p5)
}
  0x6c   : > { %s2384_s25 = scalar_lea.vmem %s2747_s20, 128  ;;  %s2544_s30 = smov [#allocation9]  }
  0x6d   : > { %p2385_p0 = scmp.ne.s32.totalorder %s2747_s20, %s2384_s25  ;;  %s2389_s22 = sshll.u32 %s2544_s30, 4  ;;  %s2390_s22 = int_to_ptr.vmem [resolvable:$false] %s2389_s22 }
  0x6e   : > { %s2391_s18 = scalar_lea.vmem %s2390_s22, 256  ;;  %p2392_p9 = scmp.lt.s32.totalorder %s2747_s20, %s2390_s22 }
  0x6f   : > { %p2387_p2 = pnand %p2385_p0, %p2371_p1  ;;  %p2393_p7 = scmp.lt.s32.totalorder %s2391_s18, %s2384_s25 }
  0x71   : > { %p2388_p13 = pneg %p2387_p2  ;;  %p2394_p8 = por %p2393_p7, %p2392_p9 }
  0x73   : > { %p2395_p4 = pnand %p2394_p8, %p2388_p13 }
  0x75   : > { %2398 = shalt.err (!%p2395_p4)
}
  0x76   : > { %2207 = dma.hbm_to_vmem [thread:$0]  (!%p2735_p3), %s2752_s7, 128, %s2747_s20, %s184_s27  }
  0x77   : > { %213 = sbr.rel (%p2742_p11) target bundleno = 780 (0x30c), region = 28  ;;  %s215_s14 = sand.u32 (!%p2742_p11), 1, %s2507_s9  }
  0x78   : > { %s2782_s19 = sshll.u32 (!%p2742_p11), %s215_s14, 3  ;;  %s216_s24 = scalar_lea.sflag (!%p2742_p11), [#allocation10], %s215_s14 }
  0x79   : > { %s219_s16 = scalar_lea.vmem (!%p2742_p11), [#allocation9], %s2782_s19  ;;  %p4135_p5 = scmp.ne.s32.totalorder (!%p2742_p11), %s4126_s8, 0 }
  0x7e   : > { %2482 = dma.done.wait (%p4135_p5), %s216_s24, 128  }
  0x7f   : > { %2484 = vsyncadd (%p4135_p5), %s216_s24, 4294967168  ;;  %s246_s7 = sand.u32 1, %s2495_s2   ;;  %s2791_s20 = sshll.u32 %s2523_s13, 1 }
  0x80   : > { %s2795_s1 = sshll.u32 %s246_s7, 3  ;;  %p250_p9 = scmp.lt.s32.totalorder %s2519_s12, 1 }
  0x81   : > { %p252_p13 = scmp.lt.s32.totalorder %s2791_s20, 7  ;;  %s2099_s10 = sshll.u32 %s2519_s12, 2 }
  0x82   : > { %s251_s8 = scalar_select %p250_p9, %s2519_s12, 1 }
  0x83   : > { %s253_s23 = scalar_select %p252_p13, %s2791_s20, 7 }
  0x84   : > { %s2097_s27 = sshll.u32 %s251_s8, 3  ;;  %s2803_s21 = sadd.s32 %s2523_s13, %s2099_s10 }
  0x85   : > { %s255_s28 = sadd.s32 %s2097_s27, %s253_s23  ;;  %s248_s18 = scalar_lea.vmem [#allocation12], %s2795_s1 }
  0x86   : > { %s2098_s0 = sshll.u32 %s255_s28, 2  ;;  %p2100_p3 = scmp.ne.s32.totalorder %s2515_s11, 0 }
  0x87   : > { %s257_s22 = scalar_lea.vmem %s4105_s3, %s2098_s0  ;;  %s299_s14 = sld [smem:[#allocation6]] (!%p2100_p3)  ;;  %v2545_v1 = vmov (!%p2100_p3), 0.0   ;;  %v2546_v37 = vmov (!%p2100_p3), 1966171168   ;;  %v380_v39 = vlaneseq (!%p2100_p3)  ;;  %v2547_v61 = vmov (!%p2100_p3), 0  }
  0x88   : > { %273 = sbr.rel (%p2100_p3) target bundleno = 214 (0xd6), region = 36  ;;  %v275_v0 = vld [vmem:[%s257_s22] sm:$0x77] (!%p2100_p3)  ;;  %274 = vst [vmem:[#allocation2] sm:$0xff] (!%p2100_p3), %v2545_v1  ;;  %s2104_s24 = sld [smem:[#allocation6 + $0x1]] (!%p2100_p3)  ;;  %v378_v38 = vunpack.c.l.s4 (!%p2100_p3), %v2546_v37 }
  0x89   : > { %2324 = vrcp.f32 (!%p2100_p3), %v275_v0  ;;  %v2103_v2 = vadd.f32 (!%p2100_p3), -2.0, %v275_v0  ;;  %v381_v47 = vshrl.u32 (!%p2100_p3), %v380_v39, 7 }
  0x8a   : > { %v379_v46 = vunpack.c.0.s8 (!%p2100_p3), %v378_v38 }
  0x8b   : > { %v288_v3 = vmul.f32 (!%p2100_p3), 6.428571, %v2103_v2 }
  0x8c   : > { %v2815_v54 = vsub.s32 (!%p2100_p3), %v379_v46, %v381_v47 }
  0x8d   : > { %v289_v4 = vadd.f32 (!%p2100_p3), 1.0, %v288_v3  ;;  %s300_s13 = scvt.s32.f32 (!%p2100_p3), %s299_s14 }
  0x8e   : > { %s302_s8 = scvt.s32.f32 (!%p2100_p3), %s2104_s24 }
  0x8f   : > { %2326 = vrsqrt.f32 %v289_v4  ;;  %s2107_s23 = sadd.f32 -1.0, %s300_s13  ;;  %vm292_vm0 = vcmp.eq.f32.partialorder %v289_v4, inf  ;;  %v295_v11 = vand.u32 2147483648, %v289_v4  ;;  %vm294_vm1 = vcmp.eq.f32.partialorder %v289_v4, 0.0 }
  0x90   : > { %s2105_s27 = sadd.f32 -1.0, %s302_s8 }
  0x91   : > { %v310_v5 = vstv %s2107_s23 }
  0x92   : > { %v304_v7 = vstv %s2105_s27  ;;  %2328 = vrcp.f32 %v310_v5 }
  0x93   : > { %v2325_v6 = vpop.eup %2324  ;;  %2330 = vrcp.f32 %v304_v7 }
  0x94   : > { %v2102_v8 = vrot.slane %v2325_v6, 9  ;;  %v2101_v9 = vrot.slane %v2325_v6, 10 }
  0x96   : > { %v286_v12 = vmul.f32 %v2102_v8, %v275_v0  ;;  %v282_v14 = vmul.f32 %v2101_v9, %v275_v0 }
  0x99   : > { %v2327_v10 = vpop.eup %2326 }
  0x9a   : > { %v291_v13 = vmul.f32 %v2327_v10, %v289_v4 }
  0x9c   : > { %v293_v15 = vsel %vm292_vm0, %v289_v4, %v291_v13  ;;  %v2329_v16 = vpop.eup %2328 }
  0x9d   : > { %v296_v17 = vsel %vm294_vm1, %v295_v11, %v293_v15  ;;  %v2331_v18 = vpop.eup %2330  ;;  %v312_v20 = vmul.f32 %v2329_v16, %v286_v12 }
  0x9e   : > { %v297_v19 = vmul.f32 0.5, %v296_v17  ;;  %v306_v21 = vmul.f32 %v2331_v18, %v282_v14 }
  0x9f   : > { %v313_v23 = vmul.f32 2.0, %v312_v20 }
  0xa0   : > { %v298_v22 = vadd.f32 -0.5, %v297_v19  ;;  %v307_v24 = vmul.f32 2.0, %v306_v21 }
  0xa1   : > { %v2108_v25 = vadd.f32 -1.0, %v313_v23 }
  0xa2   : > { %v315_v26 = vmul.f32 0.2857143, %v298_v22  ;;  %v2106_v27 = vadd.f32 -1.0, %v307_v24 }
  0xa3   : > { %v320_v29 = vand.u32 2147483647, %v2108_v25 }
  0xa4   : > { %v2109_v28 = vadd.f32 -1.0, %v315_v26  ;;  %v317_v30 = vand.u32 2147483647, %v2106_v27 }
  0xa5   : > { %vm321_vm2 = vcmp.lt.f32.partialorder %v320_v29, inf }
  0xa6   : > { %v323_v31 = vand.u32 2147483647, %v2109_v28  ;;  %vm318_vm3 = vcmp.lt.f32.partialorder %v317_v30, inf  ;;  %v322_v32 = vsel %vm321_vm2, %v2108_v25, -2.0 }
  0xa7   : > { %v319_v33 = vsel %vm318_vm3, %v2106_v27, -2.0  ;;  %v330_v34 = vadd.f32 1.0, %v322_v32 }
  0xa8   : > { %vm324_vm4 = vcmp.lt.f32.partialorder %v323_v31, inf  ;;  %v326_v36 = vadd.f32 1.0, %v319_v33 }
  0xa9   : > { %v325_v35 = vsel %vm324_vm4, %v2109_v28, -2.0  ;;  %v331_v40 = vmul.f32 16.0, %v330_v34 }
  0xaa   : > { %v334_v41 = vadd.f32 1.0, %v325_v35  ;;  %v327_v42 = vmul.f32 16.0, %v326_v36 }
  0xab   : > { %v2111_v43 = vadd.f32 -1.0, %v331_v40 }
  0xac   : > { %v335_v44 = vmul.f32 8.0, %v334_v41  ;;  %v2110_v45 = vadd.f32 -1.0, %v327_v42 }
  0xad   : > { %v333_v48 = vmul.f32 0.5, %v2111_v43 }
  0xae   : > { %v2112_v49 = vadd.f32 -1.0, %v335_v44  ;;  %v329_v50 = vmul.f32 0.5, %v2110_v45 }
  0xaf   : > { %v2811_v52 = vfloor.f32 %v333_v48 }
  0xb0   : > { %v337_v51 = vmul.f32 0.5, %v2112_v49  ;;  %v2813_v53 = vfloor.f32 %v329_v50 }
  0xb1   : > { %v342_v56 = vsub.f32 %v333_v48, %v2811_v52  ;;  %vm351_vm5 = vcmp.ge.f32.partialorder %v2811_v52, 0.0  ;;  %vm352_vm6 = vcmp.le.f32.partialorder %v2811_v52, 15.0  ;;  %v432_v8 = vadd.f32 1.0, %v2811_v52 }
  0xb2   : > { %v2817_v55 = vfloor.f32 %v337_v51  ;;  %v341_v57 = vsub.f32 %v329_v50, %v2813_v53  ;;  %vm353_vm7 = vmand %vm351_vm5, %vm352_vm6  ;;  %vm364_vm8 = vcmp.ge.f32.partialorder %v2813_v53, 0.0  ;;  %vm365_vm9 = vcmp.le.f32.partialorder %v2813_v53, 15.0 }
  0xb3   : > { %v399_v58 = vadd.f32 1.0, %v2813_v53  ;;  %v350_v60 = vsub.f32 1.0, %v342_v56  ;;  %vm366_vm12 = vmand %vm364_vm8, %vm365_vm9  ;;  %v358_v62 = vsel %vm353_vm7, 1, %v2547_v61  ;;  %v437_v12 = vrot.slane %v342_v56, 7 }
  0xb4   : > { %v343_v59 = vsub.f32 %v337_v51, %v2817_v55  ;;  %vm346_vm10 = vcmp.ge.f32.partialorder %v2817_v55, 0.0  ;;  %vm347_vm11 = vcmp.le.f32.partialorder %v2817_v55, 7.0  ;;  %v363_v63 = vsub.f32 1.0, %v341_v57 }
  0xb5   : > { %v367_v0 = vsel %vm366_vm12, 1, %v2547_v61  ;;  %vm400_vm13 = vcmp.ge.f32.partialorder %v399_v58, 0.0  ;;  %vm2829_vm14 = vmand %vm346_vm10, %vm347_vm11  ;;  %v355_v3 = vrot.slane %v350_v60, 7  ;;  %v359_v4 = vrot.slane %v358_v62, 7 }
  0xb6   : > { %v345_v1 = vsub.f32 1.0, %v343_v59  ;;  %v368_v5 = vrot.slane %v367_v0, 6  ;;  %v372_v6 = vrot.slane %v363_v63, 6  ;;  %vm401_vm15 = vcmp.le.f32.partialorder %v399_v58, 15.0 }
  0xb7   : > { %v408_v7 = vrot.slane %v341_v57, 6  ;;  %vm2834_vm0 = vcmp.ne.s32.totalorder %v359_v4, 0  ;;  %vm402_vm2 = vmand %vm400_vm13, %vm401_vm15  ;;  %vm433_vm4 = vcmp.ge.f32.partialorder %v432_v8, 0.0  ;;  %vm434_vm5 = vcmp.le.f32.partialorder %v432_v8, 15.0 }
  0xb8   : > { %v357_v9 = vmul.f32 %v355_v3, %v345_v1  ;;  %vm2838_vm1 = vcmp.ne.s32.totalorder %v368_v5, 0  ;;  %vm361_vm3 = vmand %vm2829_vm14, %vm2834_vm0  ;;  %v403_v13 = vsel %vm402_vm2, 1, %v2547_v61  ;;  %v490_v14 = vadd.f32 1.0, %v2817_v55 }
  0xb9   : > { %vm370_vm6 = vmand %vm361_vm3, %vm2838_vm1  ;;  %v404_v16 = vrot.slane %v403_v13, 6  ;;  %v439_v18 = vmul.f32 %v437_v12, %v345_v1  ;;  %v494_v19 = vmul.f32 %v355_v3, %v343_v59  ;;  %v542_v24 = vmul.f32 %v437_v12, %v343_v59 }
  0xba   : > { %v374_v15 = vmul.f32 %v372_v6, %v357_v9  ;;  %v410_v17 = vmul.f32 %v408_v7, %v357_v9  ;;  %vm435_vm7 = vmand %vm433_vm4, %vm434_vm5  ;;  %vm491_vm8 = vcmp.ge.f32.partialorder %v490_v14, 0.0  ;;  %vm492_vm9 = vcmp.le.f32.partialorder %v490_v14, 7.0 }
  0xbb   : > { %vm2854_vm10 = vcmp.ne.s32.totalorder %v404_v16, 0  ;;  %v440_v22 = vsel %vm435_vm7, 1, %v2547_v61  ;;  %vm2858_vm11 = vmand %vm491_vm8, %vm492_vm9  ;;  %vm2864_vm12 = vcmp.lt.s32.totalorder %v380_v39, 256  ;;  %v497_v28 = vmul.f32 %v494_v19, %v372_v6 }
  0xbc   : > { %v375_v20 = vsel %vm370_vm6, %v374_v15, 0.0  ;;  %vm406_vm13 = vmand %vm361_vm3, %vm2854_vm10  ;;  %v441_v27 = vrot.slane %v440_v22, 7  ;;  %v445_v30 = vmul.f32 %v439_v18, %v372_v6  ;;  %v468_v31 = vmul.f32 %v439_v18, %v408_v7 }
  0xbd   : > { %v383_v25 = vrot.slane %v375_v20, %v2815_v54  ;;  %v411_v29 = vsel %vm406_vm13, %v410_v17, 0.0  ;;  %vm495_vm15 = vmand %vm2858_vm11, %vm2834_vm0  ;;  %v520_v32 = vmul.f32 %v494_v19, %v408_v7  ;;  %v590_v36 = vmax.f32 %v2817_v55, -1.0 }
  0xbe   : > { %v419_v34 = vrot.slane %v411_v29, %v2815_v54  ;;  %vm2881_vm2 = vcmp.ne.s32.totalorder %v441_v27, 0  ;;  %vm496_vm3 = vmand %vm495_vm15, %vm2838_vm1  ;;  %v545_v38 = vmul.f32 %v542_v24, %v372_v6  ;;  %v593_v39 = vmax.f32 %v2811_v52, -1.0 }
  0xbf   : > { %v390_v33 = vrot.slane %v383_v25, %v2815_v54  ;;  %vm443_vm4 = vmand %vm2829_vm14, %vm2881_vm2  ;;  %v498_v37 = vsel %vm496_vm3, %v497_v28, 0.0  ;;  %v596_v40 = vmax.f32 %v2813_v53, -1.0  ;;  %v591_v44 = vmin.f32 %v590_v36, 7.0 }
  0xc0   : > { %v426_v42 = vrot.slane %v419_v34, %v2815_v54  ;;  %vm444_vm5 = vmand %vm443_vm4, %vm2838_vm1  ;;  %v506_v43 = vrot.slane %v498_v37, %v2815_v54  ;;  %v568_v46 = vmul.f32 %v542_v24, %v408_v7  ;;  %v594_v47 = vmin.f32 %v593_v39, 15.0 }
  0xc1   : > { %v391_v41 = vcombine.high %v390_v33, %v390_v33  ;;  %v446_v45 = vsel %vm444_vm5, %v445_v30, 0.0  ;;  %vm467_vm6 = vmand %vm443_vm4, %vm2854_vm10  ;;  %v597_v48 = vmin.f32 %v596_v40, 15.0  ;;  %v2186_v56 = vtrunc.f32 %v591_v44 }
  0xc2   : > { %v427_v49 = vcombine.high %v426_v42, %v426_v42  ;;  %v454_v50 = vrot.slane %v446_v45, %v2815_v54  ;;  %v469_v51 = vsel %vm467_vm6, %v468_v31, 0.0  ;;  %v513_v52 = vrot.slane %v506_v43, %v2815_v54  ;;  %vm519_vm14 = vmand %vm495_vm15, %vm2854_vm10 }
  0xc3   : > { %397 = vst.msk [vmem:[#allocation4] ss:$8 sm:$0x3] %vm2864_vm12, %v391_v41  ;;  %v477_v53 = vrot.slane %v469_v51, %v2815_v54  ;;  %v521_v55 = vsel %vm519_vm14, %v520_v32, 0.0  ;;  %vm543_vm7 = vmand %vm2858_vm11, %vm2881_vm2  ;;  %v2188_v57 = vtrunc.f32 %v594_v47  ;;  %v2190_v61 = vtrunc.f32 %v597_v48 }
  0xc4   : > { %430 = vst.msk [vmem:[#allocation4 + $0x1] ss:$8 sm:$0x3] %vm2864_vm12, %v427_v49  ;;  %v461_v58 = vrot.slane %v454_v50, %v2815_v54  ;;  %v514_v59 = vcombine.high %v513_v52, %v513_v52  ;;  %v529_v60 = vrot.slane %v521_v55, %v2815_v54  ;;  %vm544_vm0 = vmand %vm543_vm7, %vm2838_vm1  ;;  %v2187_v0 = vcvt.f32.s32 %v2186_v56 }
  0xc5   : > { %v484_v62 = vrot.slane %v477_v53, %v2815_v54  ;;  %v546_v63 = vsel %vm544_vm0, %v545_v38, 0.0  ;;  %vm567_vm8 = vmand %vm543_vm7, %vm2854_vm10  ;;  %v2189_v1 = vcvt.f32.s32 %v2188_v57  ;;  %v2191_v8 = vcvt.f32.s32 %v2190_v61 }
  0xc6   : > { %v462_v2 = vcombine.high %v461_v58, %v461_v58  ;;  %517 = vst.msk [vmem:[#allocation4 + $0x4] ss:$8 sm:$0x3] %vm2864_vm12, %v514_v59  ;;  %v536_v3 = vrot.slane %v529_v60, %v2815_v54  ;;  %v554_v4 = vrot.slane %v546_v63, %v2815_v54  ;;  %v569_v5 = vsel %vm567_vm8, %v568_v46, 0.0 }
  0xc7   : > { %v485_v6 = vcombine.high %v484_v62, %v484_v62  ;;  %v577_v7 = vrot.slane %v569_v5, %v2815_v54  ;;  %v599_v9 = vmul.u32 16, %v2187_v0  ;;  %v600_v12 = vrot.slane %v2189_v1, 7 }
  0xc8   : > { %465 = vst.msk [vmem:[#allocation4 + $0x2] ss:$8 sm:$0x3] %vm2864_vm12, %v462_v2  ;;  %v537_v10 = vcombine.high %v536_v3, %v536_v3  ;;  %v561_v11 = vrot.slane %v554_v4, %v2815_v54  ;;  %v603_v16 = vrot.slane %v2191_v8, 6 }
  0xc9   : > { %488 = vst.msk [vmem:[#allocation4 + $0x3] ss:$8 sm:$0x3] %vm2864_vm12, %v485_v6  ;;  %v584_v13 = vrot.slane %v577_v7, %v2815_v54  ;;  %v601_v15 = vadd.s32 %v600_v12, %v599_v9 }
  0xca   : > { %540 = vst.msk [vmem:[#allocation4 + $0x5] ss:$8 sm:$0x3] %vm2864_vm12, %v537_v10  ;;  %v562_v14 = vcombine.high %v561_v11, %v561_v11 }
  0xcb   : > { %v585_v17 = vcombine.high %v584_v13, %v584_v13  ;;  %v602_v18 = vmul.u32 16, %v601_v15 }
  0xcc   : > { %565 = vst.msk [vmem:[#allocation4 + $0x6] ss:$8 sm:$0x3] %vm2864_vm12, %v562_v14 }
  0xcd   : > { %588 = vst.msk [vmem:[#allocation4 + $0x7] ss:$8 sm:$0x3] %vm2864_vm12, %v585_v17  ;;  %v604_v19 = vadd.s32 %v603_v16, %v602_v18 }
  0xcf   : > { %v611_v20 = vrot.slane %v604_v19, %v2815_v54 }
  0xd1   : > { %v618_v21 = vrot.slane %v611_v20, %v2815_v54 }
  0xd3   : > { %v619_v22 = vcombine.high %v618_v21, %v618_v21 }
  0xd5   : > { %620 = vst.msk [vmem:[#allocation3] sm:$0x3] %vm2864_vm12, %v619_v22 }
  0xd6 PF: > { %s621_s10 = sld [smem:[#allocation8 + %s2803_s21]] }
  0xd7   : > { %s622_s28 = sld [smem:[#allocation7 + %s2803_s21]] }
  0xdd   : > { %s623_s0 = ssub.s32 %s621_s10, %s622_s28 }
  0xde   : > { %p2113_p11 = scmp.gt.s32.totalorder %s2515_s11, %s623_s0 }
  0xdf   : > { %s628_s25 = sld [smem:[#allocation7 + %s2803_s21]] (!%p2113_p11)  ;;  %v631_v23 = vlaneseq (!%p2113_p11)  ;;  %v804_v24 = vld [vmem:[#allocation4 + $0x7] ss:$8 sm:$0x3] (!%p2113_p11)  ;;  %v664_v38 = vld [vmem:[#allocation3] sm:$0x3] (!%p2113_p11) }
  0xe0   : > { %627 = sbr.rel (%p2113_p11) target bundleno = 745 (0x2e9), region = 40  ;;  %v945_v25 = vld [vmem:[#allocation4 + $0x6] ss:$8 sm:$0x3] (!%p2113_p11) }
  0xe1   : > { %v1086_v54 = vld [vmem:[#allocation4 + $0x5] ss:$8 sm:$0x3] (!%p2113_p11)  ;;  %v2955_v27 = vshrl.u32 (!%p2113_p11), %v631_v23, 7 }
  0xe2   : > { %v1227_v26 = vld [vmem:[#allocation4 + $0x4] ss:$8 sm:$0x3] (!%p2113_p11)  ;;  %v1368_v28 = vld [vmem:[#allocation4 + $0x3] ss:$8 sm:$0x3] (!%p2113_p11) }
  0xe3   : > { %v1509_v29 = vld [vmem:[#allocation4 + $0x2] ss:$8 sm:$0x3] (!%p2113_p11)  ;;  %v633_v30 = vadd.s32 (!%p2113_p11), 8, %v2955_v27  ;;  %v673_v31 = vsub.s32 (!%p2113_p11), 1, %v2955_v27  ;;  %v669_v33 = vsub.s32 (!%p2113_p11), 0, %v2955_v27 }
  0xe4   : > { %v1650_v32 = vld [vmem:[#allocation4 + $0x1] ss:$8 sm:$0x3] (!%p2113_p11)  ;;  %v1790_v34 = vld [vmem:[#allocation4] ss:$8 sm:$0x3] (!%p2113_p11) }
  0xe5   : > { %v634_v35 = vadd.s32 (!%p2113_p11), 16, %v2955_v27  ;;  %v635_v36 = vadd.s32 (!%p2113_p11), 24, %v2955_v27  ;;  %v2963_v37 = vadd.s32 (!%p2113_p11), 32, %v2955_v27  ;;  %s629_s21 = sadd.s32 (!%p2113_p11), %s2515_s11, %s628_s25  ;;  %v2966_v39 = vrot.slane (!%p2113_p11), %v804_v24, %v673_v31 }
  0xe6   : > { %v2968_v40 = vrot.slane (!%p2113_p11), %v945_v25, %v673_v31  ;;  %v2970_v41 = vrot.slane (!%p2113_p11), %v1086_v54, %v673_v31  ;;  %v2972_v42 = vrot.slane (!%p2113_p11), %v1227_v26, %v673_v31  ;;  %s2114_s30 = sshll.u32 (!%p2113_p11), %s629_s21, 8  ;;  %v2974_v43 = vrot.slane (!%p2113_p11), %v1368_v28, %v673_v31 }
  0xe7   : > { %v2976_v44 = vrot.slane %v1509_v29, %v673_v31  ;;  %v2978_v45 = vrot.slane %v1650_v32, %v673_v31  ;;  %v2980_v46 = vrot.slane %v1790_v34, %v673_v31  ;;  %v665_v47 = vstv %s2114_s30 }
  0xe8   : > { %v2982_v48 = vrot.slane %v804_v24, %v669_v33  ;;  %v2984_v49 = vrot.slane %v945_v25, %v669_v33  ;;  %v2986_v50 = vrot.slane %v1086_v54, %v669_v33  ;;  %v666_v51 = vsub.s32 %v664_v38, %v665_v47 }
  0xe9   : > { %v2988_v52 = vrot.slane %v1227_v26, %v669_v33  ;;  %v2990_v53 = vrot.slane %v1368_v28, %v669_v33  ;;  %v2992_v55 = vrot.slane %v1509_v29, %v669_v33  ;;  %v2994_v56 = vrot.slane %v1650_v32, %v669_v33 }
  0xea   : > { %v2996_v57 = vrot.slane %v1790_v34, %v669_v33  ;;  %v2999_v58 = vadd.s32 40, %v2955_v27  ;;  %v3002_v59 = vadd.s32 48, %v2955_v27  ;;  %v3004_v60 = vrot.slane %v666_v51, %v673_v31 }
  0xeb   : > { %v3006_v61 = vrot.slane %v666_v51, %v669_v33  ;;  %v3009_v62 = vadd.s32 56, %v2955_v27  ;;  %v3012_v63 = vadd.s32 64, %v2955_v27  ;;  %v3015_v0 = vadd.s32 72, %v2955_v27 }
  0xec   : > { %v3018_v1 = vadd.s32 80, %v2955_v27  ;;  %v3021_v2 = vadd.s32 88, %v2955_v27  ;;  %v3024_v3 = vadd.s32 96, %v2955_v27  ;;  %v676_v4 = vsub.s32 %v2955_v27, %v3004_v60 }
  0xed   : > { %v678_v5 = vsub.s32 %v633_v30, %v3004_v60  ;;  %v3031_v6 = vsub.s32 %v2955_v27, %v3006_v61  ;;  %v3034_v7 = vsub.s32 %v633_v30, %v3006_v61  ;;  %v3037_v8 = vsub.s32 %v634_v35, %v3004_v60 }
  0xee   : > { %v3040_v9 = vsub.s32 %v635_v36, %v3004_v60  ;;  %v3043_v10 = vsub.s32 %v634_v35, %v3006_v61  ;;  %v3046_v11 = vsub.s32 %v635_v36, %v3006_v61  ;;  %vm740_vm1 = vcmp.eq.s32.totalorder %v676_v4, 273 }
  0xef   : > { %vm742_vm9 = vcmp.eq.s32.totalorder %v678_v5, 273  ;;  %vm881_vm10 = vcmp.eq.s32.totalorder %v676_v4, 272  ;;  %vm883_vm11 = vcmp.eq.s32.totalorder %v678_v5, 272  ;;  %v817_v12 = vsel %vm740_vm1, %v2966_v39, 0.0 }
  0xf0   : > { %v819_v13 = vsel %vm742_vm9, %v2966_v39, 0.0  ;;  %vm1022_vm12 = vcmp.eq.s32.totalorder %v676_v4, 257  ;;  %vm1024_vm13 = vcmp.eq.s32.totalorder %v678_v5, 257  ;;  %v958_v14 = vsel %vm881_vm10, %v2968_v40, %v817_v12 }
  0xf1   : > { %v960_v15 = vsel %vm883_vm11, %v2968_v40, %v819_v13  ;;  %vm1163_vm15 = vcmp.eq.s32.totalorder %v676_v4, 256  ;;  %vm1165_vm2 = vcmp.eq.s32.totalorder %v678_v5, 256  ;;  %v1099_v16 = vsel %vm1022_vm12, %v2970_v41, %v958_v14 }
  0xf2   : > { %v1101_v17 = vsel %vm1024_vm13, %v2970_v41, %v960_v15  ;;  %vm1304_vm3 = vcmp.eq.s32.totalorder %v676_v4, 17  ;;  %vm1306_vm4 = vcmp.eq.s32.totalorder %v678_v5, 17  ;;  %v1240_v18 = vsel %vm1163_vm15, %v2972_v42, %v1099_v16 }
  0xf3   : > { %v1242_v19 = vsel %vm1165_vm2, %v2972_v42, %v1101_v17  ;;  %vm1445_vm5 = vcmp.eq.s32.totalorder %v676_v4, 16  ;;  %vm1447_vm6 = vcmp.eq.s32.totalorder %v678_v5, 16  ;;  %v1381_v20 = vsel %vm1304_vm3, %v2974_v43, %v1240_v18 }
  0xf4   : > { %v1383_v21 = vsel %vm1306_vm4, %v2974_v43, %v1242_v19  ;;  %vm1586_vm14 = vcmp.eq.s32.totalorder %v676_v4, 1  ;;  %vm1588_vm7 = vcmp.eq.s32.totalorder %v678_v5, 1  ;;  %v1522_v22 = vsel %vm1445_vm5, %v2976_v44, %v1381_v20 }
  0xf5   : > { %v1524_v23 = vsel %vm1447_vm6, %v2976_v44, %v1383_v21  ;;  %vm1727_vm0 = vcmp.eq.s32.totalorder %v676_v4, 0  ;;  %vm1729_vm8 = vcmp.eq.s32.totalorder %v678_v5, 0  ;;  %v1663_v24 = vsel %vm1586_vm14, %v2978_v45, %v1522_v22 }
  0xf6   : > { %v1665_v25 = vsel %vm1588_vm7, %v2978_v45, %v1524_v23  ;;  %vm739_vm1 = vcmp.eq.s32.totalorder %v3031_v6, 273  ;;  %vm741_vm9 = vcmp.eq.s32.totalorder %v3034_v7, 273  ;;  %v1803_v54 = vsel %vm1727_vm0, %v2980_v46, %v1663_v24 }
  0xf7   : > { %v1805_v26 = vsel %vm1729_vm8, %v2980_v46, %v1665_v25  ;;  %v816_v28 = vsel %vm739_vm1, %v2982_v48, 0.0  ;;  %v818_v29 = vsel %vm741_vm9, %v2982_v48, 0.0  ;;  %vm880_vm10 = vcmp.eq.s32.totalorder %v3031_v6, 272 }
  0xf8   : > { %v2122_v30 = vpack.c.bf16 %v1805_v26, %v1803_v54  ;;  %vm882_vm11 = vcmp.eq.s32.totalorder %v3034_v7, 272  ;;  %vm1021_vm12 = vcmp.eq.s32.totalorder %v3031_v6, 257  ;;  %v957_v31 = vsel %vm880_vm10, %v2984_v49, %v816_v28 }
  0xf9   : > { %v959_v32 = vsel %vm882_vm11, %v2984_v49, %v818_v29  ;;  %vm1023_vm13 = vcmp.eq.s32.totalorder %v3034_v7, 257  ;;  %vm1162_vm15 = vcmp.eq.s32.totalorder %v3031_v6, 256  ;;  %v1098_v33 = vsel %vm1021_vm12, %v2986_v50, %v957_v31 }
  0xfa   : > { %2123 = vmatprep.subr.bf16.mxu0 %v2122_v30  ;;  %v1100_v34 = vsel %vm1023_vm13, %v2986_v50, %v959_v32  ;;  %vm1164_vm2 = vcmp.eq.s32.totalorder %v3034_v7, 256  ;;  %vm1303_vm3 = vcmp.eq.s32.totalorder %v3031_v6, 17  ;;  %v1239_v35 = vsel %vm1162_vm15, %v2988_v52, %v1098_v33 }
  0xfb   : > { %v1241_v36 = vsel %vm1164_vm2, %v2988_v52, %v1100_v34  ;;  %vm1305_vm4 = vcmp.eq.s32.totalorder %v3034_v7, 17  ;;  %vm1444_vm5 = vcmp.eq.s32.totalorder %v3031_v6, 16  ;;  %v1380_v38 = vsel %vm1303_vm3, %v2990_v53, %v1239_v35 }
  0xfc   : > { %v1382_v47 = vsel %vm1305_vm4, %v2990_v53, %v1241_v36  ;;  %vm1446_vm6 = vcmp.eq.s32.totalorder %v3034_v7, 16  ;;  %vm1585_vm14 = vcmp.eq.s32.totalorder %v3031_v6, 1  ;;  %v1521_v51 = vsel %vm1444_vm5, %v2992_v55, %v1380_v38 }
  0xfd   : > { %v1523_v4 = vsel %vm1446_vm6, %v2992_v55, %v1382_v47  ;;  %vm1587_vm7 = vcmp.eq.s32.totalorder %v3034_v7, 1  ;;  %vm1726_vm0 = vcmp.eq.s32.totalorder %v3031_v6, 0  ;;  %v1662_v5 = vsel %vm1585_vm14, %v2994_v56, %v1521_v51 }
  0xfe   : > { %v1664_v12 = vsel %vm1587_vm7, %v2994_v56, %v1523_v4  ;;  %vm1728_vm8 = vcmp.eq.s32.totalorder %v3034_v7, 0  ;;  %vm744_vm1 = vcmp.eq.s32.totalorder %v3037_v8, 273  ;;  %v1802_v13 = vsel %vm1726_vm0, %v2996_v57, %v1662_v5 }
  0xff   : > { %v1804_v14 = vsel %vm1728_vm8, %v2996_v57, %v1664_v12  ;;  %vm746_vm9 = vcmp.eq.s32.totalorder %v3040_v9, 273  ;;  %v821_v15 = vsel %vm744_vm1, %v2966_v39, 0.0  ;;  %vm885_vm10 = vcmp.eq.s32.totalorder %v3037_v8, 272 }
 0x100   : > { %v2124_v16 = vpack.c.bf16 %v1804_v14, %v1802_v13  ;;  %v823_v17 = vsel %vm746_vm9, %v2966_v39, 0.0  ;;  %vm887_vm11 = vcmp.eq.s32.totalorder %v3040_v9, 272  ;;  %v962_v6 = vsel %vm885_vm10, %v2968_v40, %v821_v15 }
 0x101   : > { %v964_v7 = vsel %vm887_vm11, %v2968_v40, %v823_v17  ;;  %vm1026_vm12 = vcmp.eq.s32.totalorder %v3037_v8, 257  ;;  %vm1028_vm13 = vcmp.eq.s32.totalorder %v3040_v9, 257  ;;  %vm1167_vm15 = vcmp.eq.s32.totalorder %v3037_v8, 256 }
 0x102   : > { %2125 = vmatpush1.bf16.msra.mxu0 %v2124_v16  ;;  %v1103_v18 = vsel %vm1026_vm12, %v2970_v41, %v962_v6  ;;  %v1105_v19 = vsel %vm1028_vm13, %v2970_v41, %v964_v7  ;;  %vm1169_vm2 = vcmp.eq.s32.totalorder %v3040_v9, 256  ;;  %vm1308_vm3 = vcmp.eq.s32.totalorder %v3037_v8, 17 }
 0x103   : > { %v1244_v20 = vsel %vm1167_vm15, %v2972_v42, %v1103_v18  ;;  %v1246_v21 = vsel %vm1169_vm2, %v2972_v42, %v1105_v19  ;;  %vm1310_vm4 = vcmp.eq.s32.totalorder %v3040_v9, 17  ;;  %vm1449_vm5 = vcmp.eq.s32.totalorder %v3037_v8, 16 }
 0x104   : > { %v1385_v22 = vsel %vm1308_vm3, %v2974_v43, %v1244_v20  ;;  %v1387_v23 = vsel %vm1310_vm4, %v2974_v43, %v1246_v21  ;;  %vm1451_vm6 = vcmp.eq.s32.totalorder %v3040_v9, 16  ;;  %vm1590_vm14 = vcmp.eq.s32.totalorder %v3037_v8, 1 }
 0x105   : > { %v1526_v24 = vsel %vm1449_vm5, %v2976_v44, %v1385_v22  ;;  %v1528_v25 = vsel %vm1451_vm6, %v2976_v44, %v1387_v23  ;;  %vm1592_vm7 = vcmp.eq.s32.totalorder %v3040_v9, 1  ;;  %vm1731_vm0 = vcmp.eq.s32.totalorder %v3037_v8, 0 }
 0x106   : > { %v1667_v54 = vsel %vm1590_vm14, %v2978_v45, %v1526_v24  ;;  %v1669_v26 = vsel %vm1592_vm7, %v2978_v45, %v1528_v25  ;;  %vm1733_vm8 = vcmp.eq.s32.totalorder %v3040_v9, 0  ;;  %vm743_vm1 = vcmp.eq.s32.totalorder %v3043_v10, 273 }
 0x107   : > { %v1807_v28 = vsel %vm1731_vm0, %v2980_v46, %v1667_v54  ;;  %v1809_v29 = vsel %vm1733_vm8, %v2980_v46, %v1669_v26  ;;  %vm745_vm9 = vcmp.eq.s32.totalorder %v3046_v11, 273  ;;  %v820_v31 = vsel %vm743_vm1, %v2982_v48, 0.0 }
 0x108   : > { %v2126_v30 = vpack.c.bf16 %v1809_v29, %v1807_v28  ;;  %v822_v32 = vsel %vm745_vm9, %v2982_v48, 0.0  ;;  %vm884_vm10 = vcmp.eq.s32.totalorder %v3043_v10, 272  ;;  %vm886_vm11 = vcmp.eq.s32.totalorder %v3046_v11, 272 }
 0x109   : > { %v961_v8 = vsel %vm884_vm10, %v2984_v49, %v820_v31  ;;  %vm1025_vm12 = vcmp.eq.s32.totalorder %v3043_v10, 257  ;;  %vm1027_vm13 = vcmp.eq.s32.totalorder %v3046_v11, 257  ;;  %v963_v9 = vsel %vm886_vm11, %v2984_v49, %v822_v32 }
 0x10a   : > { %2127 = vmatprep.subr.bf16.mxu0 %v2126_v30  ;;  %v1102_v33 = vsel %vm1025_vm12, %v2986_v50, %v961_v8  ;;  %vm1166_vm15 = vcmp.eq.s32.totalorder %v3043_v10, 256  ;;  %vm1168_vm2 = vcmp.eq.s32.totalorder %v3046_v11, 256  ;;  %v1104_v34 = vsel %vm1027_vm13, %v2986_v50, %v963_v9 }
 0x10b   : > { %v1243_v35 = vsel %vm1166_vm15, %v2988_v52, %v1102_v33  ;;  %vm1307_vm3 = vcmp.eq.s32.totalorder %v3043_v10, 17  ;;  %vm1309_vm4 = vcmp.eq.s32.totalorder %v3046_v11, 17  ;;  %v1245_v36 = vsel %vm1168_vm2, %v2988_v52, %v1104_v34 }
 0x10c   : > { %v1384_v38 = vsel %vm1307_vm3, %v2990_v53, %v1243_v35  ;;  %vm1448_vm5 = vcmp.eq.s32.totalorder %v3043_v10, 16  ;;  %vm1450_vm6 = vcmp.eq.s32.totalorder %v3046_v11, 16  ;;  %v1386_v47 = vsel %vm1309_vm4, %v2990_v53, %v1245_v36 }
 0x10d   : > { %v1525_v51 = vsel %vm1448_vm5, %v2992_v55, %v1384_v38  ;;  %vm1589_vm14 = vcmp.eq.s32.totalorder %v3043_v10, 1  ;;  %vm1591_vm7 = vcmp.eq.s32.totalorder %v3046_v11, 1  ;;  %v1527_v4 = vsel %vm1450_vm6, %v2992_v55, %v1386_v47 }
 0x10e   : > { %v1666_v5 = vsel %vm1589_vm14, %v2994_v56, %v1525_v51  ;;  %vm1730_vm0 = vcmp.eq.s32.totalorder %v3043_v10, 0  ;;  %vm1732_vm8 = vcmp.eq.s32.totalorder %v3046_v11, 0  ;;  %v1668_v12 = vsel %vm1591_vm7, %v2994_v56, %v1527_v4 }
 0x10f   : > { %v1806_v13 = vsel %vm1730_vm0, %v2996_v57, %v1666_v5  ;;  %v684_v14 = vsub.s32 %v2963_v37, %v3004_v60  ;;  %v686_v15 = vsub.s32 %v2999_v58, %v3004_v60  ;;  %v1808_v16 = vsel %vm1732_vm8, %v2996_v57, %v1668_v12 }
 0x110   : > { %v3166_v17 = vsub.s32 %v2963_v37, %v3006_v61  ;;  %v3170_v10 = vsub.s32 %v2999_v58, %v3006_v61  ;;  %v3174_v11 = vsub.s32 %v3002_v59, %v3004_v60  ;;  %v2128_v6 = vpack.c.bf16 %v1808_v16, %v1806_v13 }
 0x111   : > { %vm748_vm1 = vcmp.eq.s32.totalorder %v684_v14, 273  ;;  %vm750_vm9 = vcmp.eq.s32.totalorder %v686_v15, 273  ;;  %vm889_vm10 = vcmp.eq.s32.totalorder %v684_v14, 272  ;;  %vm891_vm11 = vcmp.eq.s32.totalorder %v686_v15, 272 }
 0x112   : > { %v825_v7 = vsel %vm748_vm1, %v2966_v39, 0.0  ;;  %v827_v18 = vsel %vm750_vm9, %v2966_v39, 0.0  ;;  %vm1030_vm12 = vcmp.eq.s32.totalorder %v684_v14, 257  ;;  %2129 = vmatpush1.bf16.msra.mxu0 %v2128_v6  ;;  %vm1032_vm13 = vcmp.eq.s32.totalorder %v686_v15, 257 }
 0x113   : > { %v966_v37 = vsel %vm889_vm10, %v2968_v40, %v825_v7  ;;  %v968_v58 = vsel %vm891_vm11, %v2968_v40, %v827_v18  ;;  %vm1171_vm15 = vcmp.eq.s32.totalorder %v684_v14, 256  ;;  %vm1173_vm2 = vcmp.eq.s32.totalorder %v686_v15, 256 }
 0x114   : > { %v1107_v19 = vsel %vm1030_vm12, %v2970_v41, %v966_v37  ;;  %v1109_v20 = vsel %vm1032_vm13, %v2970_v41, %v968_v58  ;;  %vm1312_vm3 = vcmp.eq.s32.totalorder %v684_v14, 17  ;;  %vm1314_vm4 = vcmp.eq.s32.totalorder %v686_v15, 17 }
 0x115   : > { %v1248_v21 = vsel %vm1171_vm15, %v2972_v42, %v1107_v19  ;;  %v1250_v22 = vsel %vm1173_vm2, %v2972_v42, %v1109_v20  ;;  %vm1453_vm5 = vcmp.eq.s32.totalorder %v684_v14, 16  ;;  %vm1455_vm6 = vcmp.eq.s32.totalorder %v686_v15, 16 }
 0x116   : > { %v1389_v23 = vsel %vm1312_vm3, %v2974_v43, %v1248_v21  ;;  %v1391_v24 = vsel %vm1314_vm4, %v2974_v43, %v1250_v22  ;;  %vm1594_vm14 = vcmp.eq.s32.totalorder %v684_v14, 1  ;;  %vm1596_vm7 = vcmp.eq.s32.totalorder %v686_v15, 1 }
 0x117   : > { %v1530_v25 = vsel %vm1453_vm5, %v2976_v44, %v1389_v23  ;;  %v1532_v54 = vsel %vm1455_vm6, %v2976_v44, %v1391_v24  ;;  %vm1735_vm0 = vcmp.eq.s32.totalorder %v684_v14, 0  ;;  %vm1737_vm8 = vcmp.eq.s32.totalorder %v686_v15, 0 }
 0x118   : > { %v1671_v26 = vsel %vm1594_vm14, %v2978_v45, %v1530_v25  ;;  %v1673_v28 = vsel %vm1596_vm7, %v2978_v45, %v1532_v54  ;;  %vm747_vm1 = vcmp.eq.s32.totalorder %v3166_v17, 273  ;;  %vm749_vm9 = vcmp.eq.s32.totalorder %v3170_v10, 273 }
 0x119   : > { %v1811_v29 = vsel %vm1735_vm0, %v2980_v46, %v1671_v26  ;;  %v1813_v30 = vsel %vm1737_vm8, %v2980_v46, %v1673_v28  ;;  %v824_v31 = vsel %vm747_vm1, %v2982_v48, 0.0  ;;  %v826_v8 = vsel %vm749_vm9, %v2982_v48, 0.0 }
 0x11a   : > { %v2130_v32 = vpack.c.bf16 %v1813_v30, %v1811_v29  ;;  %vm888_vm10 = vcmp.eq.s32.totalorder %v3166_v17, 272  ;;  %vm890_vm11 = vcmp.eq.s32.totalorder %v3170_v10, 272  ;;  %vm1029_vm12 = vcmp.eq.s32.totalorder %v3166_v17, 257 }
 0x11b   : > { %v965_v9 = vsel %vm888_vm10, %v2984_v49, %v824_v31  ;;  %v967_v33 = vsel %vm890_vm11, %v2984_v49, %v826_v8  ;;  %vm1031_vm13 = vcmp.eq.s32.totalorder %v3170_v10, 257  ;;  %vm1170_vm15 = vcmp.eq.s32.totalorder %v3166_v17, 256 }
 0x11c   : > { %2131 = vmatprep.subr.bf16.mxu0 %v2130_v32  ;;  %v1106_v34 = vsel %vm1029_vm12, %v2986_v50, %v965_v9  ;;  %v1108_v35 = vsel %vm1031_vm13, %v2986_v50, %v967_v33  ;;  %vm1172_vm2 = vcmp.eq.s32.totalorder %v3170_v10, 256  ;;  %vm1311_vm3 = vcmp.eq.s32.totalorder %v3166_v17, 17 }
 0x11d   : > { %v1247_v36 = vsel %vm1170_vm15, %v2988_v52, %v1106_v34  ;;  %v1249_v38 = vsel %vm1172_vm2, %v2988_v52, %v1108_v35  ;;  %vm1313_vm4 = vcmp.eq.s32.totalorder %v3170_v10, 17  ;;  %vm1452_vm5 = vcmp.eq.s32.totalorder %v3166_v17, 16 }
 0x11e   : > { %v1388_v47 = vsel %vm1311_vm3, %v2990_v53, %v1247_v36  ;;  %v1390_v51 = vsel %vm1313_vm4, %v2990_v53, %v1249_v38  ;;  %vm1454_vm6 = vcmp.eq.s32.totalorder %v3170_v10, 16  ;;  %vm1593_vm14 = vcmp.eq.s32.totalorder %v3166_v17, 1 }
 0x11f   : > { %v1529_v4 = vsel %vm1452_vm5, %v2992_v55, %v1388_v47  ;;  %v1531_v5 = vsel %vm1454_vm6, %v2992_v55, %v1390_v51  ;;  %vm1595_vm7 = vcmp.eq.s32.totalorder %v3170_v10, 1  ;;  %vm1734_vm0 = vcmp.eq.s32.totalorder %v3166_v17, 0 }
 0x120   : > { %v1670_v12 = vsel %vm1593_vm14, %v2994_v56, %v1529_v4  ;;  %v1672_v13 = vsel %vm1595_vm7, %v2994_v56, %v1531_v5  ;;  %vm1736_vm8 = vcmp.eq.s32.totalorder %v3170_v10, 0  ;;  %v690_v16 = vsub.s32 %v3009_v62, %v3004_v60 }
 0x121   : > { %v1810_v14 = vsel %vm1734_vm0, %v2996_v57, %v1670_v12  ;;  %v1812_v15 = vsel %vm1736_vm8, %v2996_v57, %v1672_v13  ;;  %vm752_vm1 = vcmp.eq.s32.totalorder %v3174_v11, 273  ;;  %vm893_vm9 = vcmp.eq.s32.totalorder %v3174_v11, 272 }
 0x122   : > { %v2132_v6 = vpack.c.bf16 %v1812_v15, %v1810_v14  ;;  %v829_v7 = vsel %vm752_vm1, %v2966_v39, 0.0  ;;  %vm1034_vm10 = vcmp.eq.s32.totalorder %v3174_v11, 257  ;;  %vm754_vm11 = vcmp.eq.s32.totalorder %v690_v16, 273 }
 0x123   : > { %vm895_vm12 = vcmp.eq.s32.totalorder %v690_v16, 272  ;;  %v970_v17 = vsel %vm893_vm9, %v2968_v40, %v829_v7  ;;  %vm1036_vm13 = vcmp.eq.s32.totalorder %v690_v16, 257  ;;  %v831_v10 = vsel %vm754_vm11, %v2966_v39, 0.0 }
 0x124   : > { %2133 = vmatpush1.bf16.msra.mxu0 %v2132_v6  ;;  %v1111_v18 = vsel %vm1034_vm10, %v2970_v41, %v970_v17  ;;  %vm1175_vm15 = vcmp.eq.s32.totalorder %v3174_v11, 256  ;;  %vm1177_vm2 = vcmp.eq.s32.totalorder %v690_v16, 256  ;;  %v972_v37 = vsel %vm895_vm12, %v2968_v40, %v831_v10 }
 0x125   : > { %v1252_v58 = vsel %vm1175_vm15, %v2972_v42, %v1111_v18  ;;  %vm1316_vm3 = vcmp.eq.s32.totalorder %v3174_v11, 17  ;;  %vm1318_vm4 = vcmp.eq.s32.totalorder %v690_v16, 17  ;;  %v1113_v19 = vsel %vm1036_vm13, %v2970_v41, %v972_v37 }
 0x126   : > { %v1393_v20 = vsel %vm1316_vm3, %v2974_v43, %v1252_v58  ;;  %vm1457_vm5 = vcmp.eq.s32.totalorder %v3174_v11, 16  ;;  %vm1459_vm6 = vcmp.eq.s32.totalorder %v690_v16, 16  ;;  %v1254_v21 = vsel %vm1177_vm2, %v2972_v42, %v1113_v19 }
 0x127   : > { %v1534_v22 = vsel %vm1457_vm5, %v2976_v44, %v1393_v20  ;;  %vm1598_vm14 = vcmp.eq.s32.totalorder %v3174_v11, 1  ;;  %vm1600_vm7 = vcmp.eq.s32.totalorder %v690_v16, 1  ;;  %v1395_v23 = vsel %vm1318_vm4, %v2974_v43, %v1254_v21 }
 0x128   : > { %v1675_v24 = vsel %vm1598_vm14, %v2978_v45, %v1534_v22  ;;  %vm1739_vm0 = vcmp.eq.s32.totalorder %v3174_v11, 0  ;;  %vm1741_vm8 = vcmp.eq.s32.totalorder %v690_v16, 0  ;;  %v1536_v25 = vsel %vm1459_vm6, %v2976_v44, %v1395_v23 }
 0x129   : > { %v1815_v54 = vsel %vm1739_vm0, %v2980_v46, %v1675_v24  ;;  %v687_v26 = vsub.s32 %v3002_v59, %v3006_v61  ;;  %v689_v28 = vsub.s32 %v3009_v62, %v3006_v61  ;;  %v1677_v29 = vsel %vm1600_vm7, %v2978_v45, %v1536_v25 }
 0x12a   : > { %v3255_v30 = vsub.s32 %v3012_v63, %v3004_v60  ;;  %v3259_v11 = vsub.s32 %v3015_v0, %v3004_v60  ;;  %v3263_v31 = vsub.s32 %v3012_v63, %v3006_v61  ;;  %v1817_v32 = vsel %vm1741_vm8, %v2980_v46, %v1677_v29 }
 0x12b   : > { %vm751_vm1 = vcmp.eq.s32.totalorder %v687_v26, 273  ;;  %vm753_vm9 = vcmp.eq.s32.totalorder %v689_v28, 273  ;;  %vm892_vm10 = vcmp.eq.s32.totalorder %v687_v26, 272  ;;  %v2134_v59 = vpack.c.bf16 %v1817_v32, %v1815_v54 }
 0x12c   : > { %v828_v62 = vsel %vm751_vm1, %v2982_v48, 0.0  ;;  %v830_v8 = vsel %vm753_vm9, %v2982_v48, 0.0  ;;  %vm894_vm11 = vcmp.eq.s32.totalorder %v689_v28, 272  ;;  %vm1033_vm12 = vcmp.eq.s32.totalorder %v687_v26, 257 }
 0x12d   : > { %v969_v9 = vsel %vm892_vm10, %v2984_v49, %v828_v62  ;;  %v971_v33 = vsel %vm894_vm11, %v2984_v49, %v830_v8  ;;  %vm1035_vm13 = vcmp.eq.s32.totalorder %v689_v28, 257  ;;  %2135 = vmatprep.subr.bf16.mxu0 %v2134_v59  ;;  %vm1174_vm15 = vcmp.eq.s32.totalorder %v687_v26, 256 }
 0x12e   : > { %v1110_v63 = vsel %vm1033_vm12, %v2986_v50, %v969_v9  ;;  %v1112_v34 = vsel %vm1035_vm13, %v2986_v50, %v971_v33  ;;  %vm1176_vm2 = vcmp.eq.s32.totalorder %v689_v28, 256  ;;  %vm1315_vm3 = vcmp.eq.s32.totalorder %v687_v26, 17 }
 0x12f   : > { %v1251_v35 = vsel %vm1174_vm15, %v2988_v52, %v1110_v63  ;;  %v1253_v36 = vsel %vm1176_vm2, %v2988_v52, %v1112_v34  ;;  %vm1317_vm4 = vcmp.eq.s32.totalorder %v689_v28, 17  ;;  %vm1456_vm5 = vcmp.eq.s32.totalorder %v687_v26, 16 }
 0x130   : > { %v1392_v38 = vsel %vm1315_vm3, %v2990_v53, %v1251_v35  ;;  %v1394_v47 = vsel %vm1317_vm4, %v2990_v53, %v1253_v36  ;;  %vm1458_vm6 = vcmp.eq.s32.totalorder %v689_v28, 16  ;;  %vm1597_vm14 = vcmp.eq.s32.totalorder %v687_v26, 1 }
 0x131   : > { %v1533_v51 = vsel %vm1456_vm5, %v2992_v55, %v1392_v38  ;;  %v1535_v4 = vsel %vm1458_vm6, %v2992_v55, %v1394_v47  ;;  %vm1599_vm7 = vcmp.eq.s32.totalorder %v689_v28, 1  ;;  %vm1738_vm0 = vcmp.eq.s32.totalorder %v687_v26, 0 }
 0x132   : > { %v1674_v5 = vsel %vm1597_vm14, %v2994_v56, %v1533_v51  ;;  %v1676_v12 = vsel %vm1599_vm7, %v2994_v56, %v1535_v4  ;;  %vm1740_vm8 = vcmp.eq.s32.totalorder %v689_v28, 0  ;;  %vm756_vm1 = vcmp.eq.s32.totalorder %v3255_v30, 273 }
 0x133   : > { %v1814_v13 = vsel %vm1738_vm0, %v2996_v57, %v1674_v5  ;;  %v1816_v14 = vsel %vm1740_vm8, %v2996_v57, %v1676_v12  ;;  %vm758_vm9 = vcmp.eq.s32.totalorder %v3259_v11, 273  ;;  %v833_v16 = vsel %vm756_vm1, %v2966_v39, 0.0 }
 0x134   : > { %v2136_v15 = vpack.c.bf16 %v1816_v14, %v1814_v13  ;;  %v835_v6 = vsel %vm758_vm9, %v2966_v39, 0.0  ;;  %vm897_vm10 = vcmp.eq.s32.totalorder %v3255_v30, 272  ;;  %vm899_vm11 = vcmp.eq.s32.totalorder %v3259_v11, 272 }
 0x135   : > { %v974_v7 = vsel %vm897_vm10, %v2968_v40, %v833_v16  ;;  %vm1038_vm12 = vcmp.eq.s32.totalorder %v3255_v30, 257  ;;  %vm1040_vm13 = vcmp.eq.s32.totalorder %v3259_v11, 257  ;;  %v976_v17 = vsel %vm899_vm11, %v2968_v40, %v835_v6 }
 0x136   : > { %2137 = vmatpush1.bf16.msra.mxu0 %v2136_v15  ;;  %v1115_v10 = vsel %vm1038_vm12, %v2970_v41, %v974_v7  ;;  %vm1179_vm15 = vcmp.eq.s32.totalorder %v3255_v30, 256  ;;  %vm1181_vm2 = vcmp.eq.s32.totalorder %v3259_v11, 256  ;;  %v1117_v18 = vsel %vm1040_vm13, %v2970_v41, %v976_v17 }
 0x137   : > { %v1256_v37 = vsel %vm1179_vm15, %v2972_v42, %v1115_v10  ;;  %vm1320_vm3 = vcmp.eq.s32.totalorder %v3255_v30, 17  ;;  %vm1322_vm4 = vcmp.eq.s32.totalorder %v3259_v11, 17  ;;  %v1258_v58 = vsel %vm1181_vm2, %v2972_v42, %v1117_v18 }
 0x138   : > { %v1397_v19 = vsel %vm1320_vm3, %v2974_v43, %v1256_v37  ;;  %vm1461_vm5 = vcmp.eq.s32.totalorder %v3255_v30, 16  ;;  %vm1463_vm6 = vcmp.eq.s32.totalorder %v3259_v11, 16  ;;  %v1399_v20 = vsel %vm1322_vm4, %v2974_v43, %v1258_v58 }
 0x139   : > { %v1538_v21 = vsel %vm1461_vm5, %v2976_v44, %v1397_v19  ;;  %vm1602_vm14 = vcmp.eq.s32.totalorder %v3255_v30, 1  ;;  %vm1604_vm7 = vcmp.eq.s32.totalorder %v3259_v11, 1  ;;  %v1540_v22 = vsel %vm1463_vm6, %v2976_v44, %v1399_v20 }
 0x13a   : > { %v1679_v23 = vsel %vm1602_vm14, %v2978_v45, %v1538_v21  ;;  %vm1743_vm0 = vcmp.eq.s32.totalorder %v3255_v30, 0  ;;  %vm1745_vm8 = vcmp.eq.s32.totalorder %v3259_v11, 0  ;;  %v1681_v24 = vsel %vm1604_vm7, %v2978_v45, %v1540_v22 }
 0x13b   : > { %v1819_v25 = vsel %vm1743_vm0, %v2980_v46, %v1679_v23  ;;  %v693_v54 = vsub.s32 %v3015_v0, %v3006_v61  ;;  %vm755_vm1 = vcmp.eq.s32.totalorder %v3263_v31, 273  ;;  %v1821_v26 = vsel %vm1745_vm8, %v2980_v46, %v1681_v24 }
 0x13c   : > { %v832_v28 = vsel %vm755_vm1, %v2982_v48, 0.0  ;;  %vm896_vm9 = vcmp.eq.s32.totalorder %v3263_v31, 272  ;;  %vm1037_vm10 = vcmp.eq.s32.totalorder %v3263_v31, 257  ;;  %v2138_v29 = vpack.c.bf16 %v1821_v26, %v1819_v25 }
 0x13d   : > { %vm757_vm11 = vcmp.eq.s32.totalorder %v693_v54, 273  ;;  %vm898_vm12 = vcmp.eq.s32.totalorder %v693_v54, 272  ;;  %v973_v30 = vsel %vm896_vm9, %v2984_v49, %v832_v28  ;;  %vm1039_vm13 = vcmp.eq.s32.totalorder %v693_v54, 257 }
 0x13e   : > { %v834_v11 = vsel %vm757_vm11, %v2982_v48, 0.0  ;;  %v1114_v0 = vsel %vm1037_vm10, %v2986_v50, %v973_v30  ;;  %vm1178_vm15 = vcmp.eq.s32.totalorder %v3263_v31, 256  ;;  %2139 = vmatprep.subr.bf16.mxu0 %v2138_v29  ;;  %vm1180_vm2 = vcmp.eq.s32.totalorder %v693_v54, 256 }
 0x13f   : > { %v975_v32 = vsel %vm898_vm12, %v2984_v49, %v834_v11  ;;  %v1255_v59 = vsel %vm1178_vm15, %v2988_v52, %v1114_v0  ;;  %vm1319_vm3 = vcmp.eq.s32.totalorder %v3263_v31, 17  ;;  %vm1321_vm4 = vcmp.eq.s32.totalorder %v693_v54, 17 }
 0x140   : > { %v1116_v62 = vsel %vm1039_vm13, %v2986_v50, %v975_v32  ;;  %v1396_v8 = vsel %vm1319_vm3, %v2990_v53, %v1255_v59  ;;  %vm1460_vm5 = vcmp.eq.s32.totalorder %v3263_v31, 16  ;;  %vm1462_vm6 = vcmp.eq.s32.totalorder %v693_v54, 16 }
 0x141   : > { %v1257_v9 = vsel %vm1180_vm2, %v2988_v52, %v1116_v62  ;;  %v1537_v33 = vsel %vm1460_vm5, %v2992_v55, %v1396_v8  ;;  %vm1601_vm14 = vcmp.eq.s32.totalorder %v3263_v31, 1  ;;  %vm1603_vm7 = vcmp.eq.s32.totalorder %v693_v54, 1 }
 0x142   : > { %v1398_v63 = vsel %vm1321_vm4, %v2990_v53, %v1257_v9  ;;  %v1678_v34 = vsel %vm1601_vm14, %v2994_v56, %v1537_v33  ;;  %vm1742_vm0 = vcmp.eq.s32.totalorder %v3263_v31, 0  ;;  %vm1744_vm8 = vcmp.eq.s32.totalorder %v693_v54, 0 }
 0x143   : > { %v1539_v35 = vsel %vm1462_vm6, %v2992_v55, %v1398_v63  ;;  %v1818_v36 = vsel %vm1742_vm0, %v2996_v57, %v1678_v34  ;;  %v696_v38 = vsub.s32 %v3018_v1, %v3004_v60  ;;  %v698_v51 = vsub.s32 %v3021_v2, %v3004_v60 }
 0x144   : > { %v1680_v47 = vsel %vm1603_vm7, %v2994_v56, %v1539_v35  ;;  %v3345_v4 = vsub.s32 %v3018_v1, %v3006_v61  ;;  %v3349_v31 = vsub.s32 %v3021_v2, %v3006_v61  ;;  %v645_v33 = vadd.s32 104, %v2955_v27 }
 0x145   : > { %v1820_v5 = vsel %vm1744_vm8, %v2996_v57, %v1680_v47  ;;  %vm760_vm1 = vcmp.eq.s32.totalorder %v696_v38, 273  ;;  %vm901_vm9 = vcmp.eq.s32.totalorder %v696_v38, 272  ;;  %vm1042_vm10 = vcmp.eq.s32.totalorder %v696_v38, 257 }
 0x146   : > { %v2140_v12 = vpack.c.bf16 %v1820_v5, %v1818_v36  ;;  %vm762_vm11 = vcmp.eq.s32.totalorder %v698_v51, 273  ;;  %v837_v13 = vsel %vm760_vm1, %v2966_v39, 0.0  ;;  %vm903_vm12 = vcmp.eq.s32.totalorder %v698_v51, 272 }
 0x147   : > { %v839_v14 = vsel %vm762_vm11, %v2966_v39, 0.0  ;;  %v978_v15 = vsel %vm901_vm9, %v2968_v40, %v837_v13  ;;  %vm1044_vm13 = vcmp.eq.s32.totalorder %v698_v51, 257  ;;  %vm1183_vm15 = vcmp.eq.s32.totalorder %v696_v38, 256 }
 0x148   : > { %2141 = vmatpush1.bf16.msra.mxu0 %v2140_v12  ;;  %v980_v1 = vsel %vm903_vm12, %v2968_v40, %v839_v14  ;;  %v1119_v2 = vsel %vm1042_vm10, %v2970_v41, %v978_v15  ;;  %vm1185_vm2 = vcmp.eq.s32.totalorder %v698_v51, 256  ;;  %vm1324_vm3 = vcmp.eq.s32.totalorder %v696_v38, 17 }
 0x149   : > { %v1121_v16 = vsel %vm1044_vm13, %v2970_v41, %v980_v1  ;;  %v1260_v6 = vsel %vm1183_vm15, %v2972_v42, %v1119_v2  ;;  %vm1326_vm4 = vcmp.eq.s32.totalorder %v698_v51, 17  ;;  %vm1465_vm5 = vcmp.eq.s32.totalorder %v696_v38, 16 }
 0x14a   : > { %v1262_v7 = vsel %vm1185_vm2, %v2972_v42, %v1121_v16  ;;  %v1401_v17 = vsel %vm1324_vm3, %v2974_v43, %v1260_v6  ;;  %vm1467_vm6 = vcmp.eq.s32.totalorder %v698_v51, 16  ;;  %vm1606_vm14 = vcmp.eq.s32.totalorder %v696_v38, 1 }
 0x14b   : > { %v1403_v10 = vsel %vm1326_vm4, %v2974_v43, %v1262_v7  ;;  %v1542_v18 = vsel %vm1465_vm5, %v2976_v44, %v1401_v17  ;;  %vm1608_vm7 = vcmp.eq.s32.totalorder %v698_v51, 1  ;;  %vm1747_vm0 = vcmp.eq.s32.totalorder %v696_v38, 0 }
 0x14c   : > { %v1544_v37 = vsel %vm1467_vm6, %v2976_v44, %v1403_v10  ;;  %v1683_v58 = vsel %vm1606_vm14, %v2978_v45, %v1542_v18  ;;  %vm1749_vm8 = vcmp.eq.s32.totalorder %v698_v51, 0  ;;  %vm759_vm1 = vcmp.eq.s32.totalorder %v3345_v4, 273 }
 0x14d   : > { %v1685_v19 = vsel %vm1608_vm7, %v2978_v45, %v1544_v37  ;;  %v1823_v20 = vsel %vm1747_vm0, %v2980_v46, %v1683_v58  ;;  %vm761_vm9 = vcmp.eq.s32.totalorder %v3349_v31, 273  ;;  %v836_v21 = vsel %vm759_vm1, %v2982_v48, 0.0 }
 0x14e   : > { %v1825_v22 = vsel %vm1749_vm8, %v2980_v46, %v1685_v19  ;;  %v838_v23 = vsel %vm761_vm9, %v2982_v48, 0.0  ;;  %vm900_vm10 = vcmp.eq.s32.totalorder %v3345_v4, 272  ;;  %vm902_vm11 = vcmp.eq.s32.totalorder %v3349_v31, 272 }
 0x14f   : > { %v2142_v24 = vpack.c.bf16 %v1825_v22, %v1823_v20  ;;  %v977_v25 = vsel %vm900_vm10, %v2984_v49, %v836_v21  ;;  %v979_v54 = vsel %vm902_vm11, %v2984_v49, %v838_v23  ;;  %vm1041_vm12 = vcmp.eq.s32.totalorder %v3345_v4, 257 }
 0x150   : > { %vm1043_vm13 = vcmp.eq.s32.totalorder %v3349_v31, 257  ;;  %v1118_v26 = vsel %vm1041_vm12, %v2986_v50, %v977_v25  ;;  %vm1182_vm15 = vcmp.eq.s32.totalorder %v3345_v4, 256  ;;  %vm1184_vm2 = vcmp.eq.s32.totalorder %v3349_v31, 256 }
 0x151   : > { %2143 = vmatprep.subr.bf16.mxu0 %v2142_v24  ;;  %v1120_v28 = vsel %vm1043_vm13, %v2986_v50, %v979_v54  ;;  %v1259_v29 = vsel %vm1182_vm15, %v2988_v52, %v1118_v26  ;;  %vm1323_vm3 = vcmp.eq.s32.totalorder %v3345_v4, 17  ;;  %vm1325_vm4 = vcmp.eq.s32.totalorder %v3349_v31, 17 }
 0x152   : > { %v1261_v30 = vsel %vm1184_vm2, %v2988_v52, %v1120_v28  ;;  %v1400_v11 = vsel %vm1323_vm3, %v2990_v53, %v1259_v29  ;;  %vm1464_vm5 = vcmp.eq.s32.totalorder %v3345_v4, 16  ;;  %vm1466_vm6 = vcmp.eq.s32.totalorder %v3349_v31, 16 }
 0x153   : > { %v1402_v0 = vsel %vm1325_vm4, %v2990_v53, %v1261_v30  ;;  %v1541_v32 = vsel %vm1464_vm5, %v2992_v55, %v1400_v11  ;;  %vm1605_vm14 = vcmp.eq.s32.totalorder %v3345_v4, 1  ;;  %vm1607_vm7 = vcmp.eq.s32.totalorder %v3349_v31, 1 }
 0x154   : > { %v1543_v59 = vsel %vm1466_vm6, %v2992_v55, %v1402_v0  ;;  %v1682_v62 = vsel %vm1605_vm14, %v2994_v56, %v1541_v32  ;;  %vm1746_vm0 = vcmp.eq.s32.totalorder %v3345_v4, 0  ;;  %vm1748_vm8 = vcmp.eq.s32.totalorder %v3349_v31, 0 }
 0x155   : > { %v1684_v8 = vsel %vm1607_vm7, %v2994_v56, %v1543_v59  ;;  %v1822_v9 = vsel %vm1746_vm0, %v2996_v57, %v1682_v62  ;;  %v700_v63 = vsub.s32 %v3024_v3, %v3004_v60  ;;  %v3405_v35 = vsub.s32 %v3024_v3, %v3006_v61 }
 0x156   : > { %v1824_v34 = vsel %vm1748_vm8, %v2996_v57, %v1684_v8  ;;  %v3408_v36 = vadd.s32 112, %v2955_v27  ;;  %v3411_v38 = vadd.s32 120, %v2955_v27  ;;  %v702_v51 = vsub.s32 %v645_v33, %v3004_v60 }
 0x157   : > { %v2144_v47 = vpack.c.bf16 %v1824_v34, %v1822_v9  ;;  %vm764_vm1 = vcmp.eq.s32.totalorder %v700_v63, 273  ;;  %vm905_vm9 = vcmp.eq.s32.totalorder %v700_v63, 272  ;;  %vm1046_vm10 = vcmp.eq.s32.totalorder %v700_v63, 257 }
 0x158   : > { %v841_v4 = vsel %vm764_vm1, %v2966_v39, 0.0  ;;  %vm1187_vm11 = vcmp.eq.s32.totalorder %v700_v63, 256  ;;  %vm1328_vm12 = vcmp.eq.s32.totalorder %v700_v63, 17  ;;  %vm766_vm13 = vcmp.eq.s32.totalorder %v702_v51, 273 }
 0x159   : > { %2145 = vmatpush1.bf16.msra.mxu0 %v2144_v47  ;;  %vm907_vm15 = vcmp.eq.s32.totalorder %v702_v51, 272  ;;  %v982_v3 = vsel %vm905_vm9, %v2968_v40, %v841_v4  ;;  %vm1048_vm2 = vcmp.eq.s32.totalorder %v702_v51, 257  ;;  %v843_v31 = vsel %vm766_vm13, %v2966_v39, 0.0 }
 0x15a   : > { %v1123_v5 = vsel %vm1046_vm10, %v2970_v41, %v982_v3  ;;  %vm1189_vm3 = vcmp.eq.s32.totalorder %v702_v51, 256  ;;  %vm1330_vm4 = vcmp.eq.s32.totalorder %v702_v51, 17  ;;  %v984_v12 = vsel %vm907_vm15, %v2968_v40, %v843_v31 }
 0x15b   : > { %v1264_v13 = vsel %vm1187_vm11, %v2972_v42, %v1123_v5  ;;  %vm1469_vm5 = vcmp.eq.s32.totalorder %v700_v63, 16  ;;  %vm1471_vm6 = vcmp.eq.s32.totalorder %v702_v51, 16  ;;  %v1125_v14 = vsel %vm1048_vm2, %v2970_v41, %v984_v12 }
 0x15c   : > { %v1405_v15 = vsel %vm1328_vm12, %v2974_v43, %v1264_v13  ;;  %vm1610_vm14 = vcmp.eq.s32.totalorder %v700_v63, 1  ;;  %vm1612_vm7 = vcmp.eq.s32.totalorder %v702_v51, 1  ;;  %v1266_v1 = vsel %vm1189_vm3, %v2972_v42, %v1125_v14 }
 0x15d   : > { %v1546_v2 = vsel %vm1469_vm5, %v2976_v44, %v1405_v15  ;;  %vm1751_vm0 = vcmp.eq.s32.totalorder %v700_v63, 0  ;;  %vm1753_vm8 = vcmp.eq.s32.totalorder %v702_v51, 0  ;;  %v1407_v16 = vsel %vm1330_vm4, %v2974_v43, %v1266_v1 }
 0x15e   : > { %v1687_v6 = vsel %vm1610_vm14, %v2978_v45, %v1546_v2  ;;  %v701_v7 = vsub.s32 %v645_v33, %v3006_v61  ;;  %vm763_vm1 = vcmp.eq.s32.totalorder %v3405_v35, 273  ;;  %v1548_v17 = vsel %vm1471_vm6, %v2976_v44, %v1407_v16 }
 0x15f   : > { %v1827_v10 = vsel %vm1751_vm0, %v2980_v46, %v1687_v6  ;;  %v840_v18 = vsel %vm763_vm1, %v2982_v48, 0.0  ;;  %vm904_vm9 = vcmp.eq.s32.totalorder %v3405_v35, 272  ;;  %v1689_v37 = vsel %vm1612_vm7, %v2978_v45, %v1548_v17 }
 0x160   : > { %vm765_vm10 = vcmp.eq.s32.totalorder %v701_v7, 273  ;;  %vm906_vm11 = vcmp.eq.s32.totalorder %v701_v7, 272  ;;  %v981_v58 = vsel %vm904_vm9, %v2984_v49, %v840_v18  ;;  %v1829_v19 = vsel %vm1753_vm8, %v2980_v46, %v1689_v37 }
 0x161   : > { %v842_v20 = vsel %vm765_vm10, %v2982_v48, 0.0  ;;  %vm1045_vm12 = vcmp.eq.s32.totalorder %v3405_v35, 257  ;;  %vm1047_vm13 = vcmp.eq.s32.totalorder %v701_v7, 257  ;;  %v2146_v21 = vpack.c.bf16 %v1829_v19, %v1827_v10 }
 0x162   : > { %v983_v22 = vsel %vm906_vm11, %v2984_v49, %v842_v20  ;;  %v1122_v23 = vsel %vm1045_vm12, %v2986_v50, %v981_v58  ;;  %vm1186_vm15 = vcmp.eq.s32.totalorder %v3405_v35, 256  ;;  %vm1188_vm2 = vcmp.eq.s32.totalorder %v701_v7, 256 }
 0x163   : > { %v1124_v24 = vsel %vm1047_vm13, %v2986_v50, %v983_v22  ;;  %v1263_v25 = vsel %vm1186_vm15, %v2988_v52, %v1122_v23  ;;  %vm1327_vm3 = vcmp.eq.s32.totalorder %v3405_v35, 17  ;;  %2147 = vmatprep.subr.bf16.mxu0 %v2146_v21  ;;  %vm1329_vm4 = vcmp.eq.s32.totalorder %v701_v7, 17 }
 0x164   : > { %v1265_v54 = vsel %vm1188_vm2, %v2988_v52, %v1124_v24  ;;  %v1404_v26 = vsel %vm1327_vm3, %v2990_v53, %v1263_v25  ;;  %vm1468_vm5 = vcmp.eq.s32.totalorder %v3405_v35, 16  ;;  %vm1470_vm6 = vcmp.eq.s32.totalorder %v701_v7, 16 }
 0x165   : > { %v1406_v28 = vsel %vm1329_vm4, %v2990_v53, %v1265_v54  ;;  %v1545_v29 = vsel %vm1468_vm5, %v2992_v55, %v1404_v26  ;;  %vm1609_vm14 = vcmp.eq.s32.totalorder %v3405_v35, 1  ;;  %vm1611_vm7 = vcmp.eq.s32.totalorder %v701_v7, 1 }
 0x166   : > { %v1547_v30 = vsel %vm1470_vm6, %v2992_v55, %v1406_v28  ;;  %v1686_v11 = vsel %vm1609_vm14, %v2994_v56, %v1545_v29  ;;  %vm1750_vm0 = vcmp.eq.s32.totalorder %v3405_v35, 0  ;;  %vm1752_vm8 = vcmp.eq.s32.totalorder %v701_v7, 0 }
 0x167   : > { %v1688_v0 = vsel %vm1611_vm7, %v2994_v56, %v1547_v30  ;;  %v1826_v32 = vsel %vm1750_vm0, %v2996_v57, %v1686_v11  ;;  %v704_v59 = vsub.s32 %v3408_v36, %v3004_v60  ;;  %v706_v8 = vsub.s32 %v3411_v38, %v3004_v60 }
 0x168   : > { %v1828_v62 = vsel %vm1752_vm8, %v2996_v57, %v1688_v0  ;;  %v3461_v9 = vsub.s32 %v3408_v36, %v3006_v61  ;;  %v3465_v33 = vsub.s32 %v3411_v38, %v3006_v61  ;;  %v648_v28 = vadd.s32 128, %v2955_v27 }
 0x169   : > { %v2148_v63 = vpack.c.bf16 %v1828_v62, %v1826_v32  ;;  %vm768_vm1 = vcmp.eq.s32.totalorder %v704_v59, 273  ;;  %vm909_vm9 = vcmp.eq.s32.totalorder %v704_v59, 272  ;;  %vm1050_vm10 = vcmp.eq.s32.totalorder %v704_v59, 257 }
 0x16a   : > { %vm770_vm11 = vcmp.eq.s32.totalorder %v706_v8, 273  ;;  %v845_v34 = vsel %vm768_vm1, %v2966_v39, 0.0  ;;  %vm911_vm12 = vcmp.eq.s32.totalorder %v706_v8, 272  ;;  %vm1052_vm13 = vcmp.eq.s32.totalorder %v706_v8, 257 }
 0x16b   : > { %2149 = vmatpush1.bf16.msra.mxu0 %v2148_v63  ;;  %v847_v35 = vsel %vm770_vm11, %v2966_v39, 0.0  ;;  %v986_v47 = vsel %vm909_vm9, %v2968_v40, %v845_v34  ;;  %vm1191_vm15 = vcmp.eq.s32.totalorder %v704_v59, 256  ;;  %vm1193_vm2 = vcmp.eq.s32.totalorder %v706_v8, 256 }
 0x16c   : > { %v988_v36 = vsel %vm911_vm12, %v2968_v40, %v847_v35  ;;  %v1127_v38 = vsel %vm1050_vm10, %v2970_v41, %v986_v47  ;;  %vm1332_vm3 = vcmp.eq.s32.totalorder %v704_v59, 17  ;;  %vm1334_vm4 = vcmp.eq.s32.totalorder %v706_v8, 17 }
 0x16d   : > { %v1129_v51 = vsel %vm1052_vm13, %v2970_v41, %v988_v36  ;;  %v1268_v4 = vsel %vm1191_vm15, %v2972_v42, %v1127_v38  ;;  %vm1473_vm5 = vcmp.eq.s32.totalorder %v704_v59, 16  ;;  %vm1475_vm6 = vcmp.eq.s32.totalorder %v706_v8, 16 }
 0x16e   : > { %v1270_v3 = vsel %vm1193_vm2, %v2972_v42, %v1129_v51  ;;  %v1409_v31 = vsel %vm1332_vm3, %v2974_v43, %v1268_v4  ;;  %vm1614_vm14 = vcmp.eq.s32.totalorder %v704_v59, 1  ;;  %vm1616_vm7 = vcmp.eq.s32.totalorder %v706_v8, 1 }
 0x16f   : > { %v1411_v5 = vsel %vm1334_vm4, %v2974_v43, %v1270_v3  ;;  %v1550_v12 = vsel %vm1473_vm5, %v2976_v44, %v1409_v31  ;;  %vm1755_vm0 = vcmp.eq.s32.totalorder %v704_v59, 0  ;;  %vm1757_vm8 = vcmp.eq.s32.totalorder %v706_v8, 0 }
 0x170   : > { %v1552_v13 = vsel %vm1475_vm6, %v2976_v44, %v1411_v5  ;;  %v1691_v14 = vsel %vm1614_vm14, %v2978_v45, %v1550_v12  ;;  %vm767_vm1 = vcmp.eq.s32.totalorder %v3461_v9, 273  ;;  %vm769_vm9 = vcmp.eq.s32.totalorder %v3465_v33, 273 }
 0x171   : > { %v1693_v15 = vsel %vm1616_vm7, %v2978_v45, %v1552_v13  ;;  %v1831_v1 = vsel %vm1755_vm0, %v2980_v46, %v1691_v14  ;;  %v844_v2 = vsel %vm767_vm1, %v2982_v48, 0.0  ;;  %v846_v16 = vsel %vm769_vm9, %v2982_v48, 0.0 }
 0x172   : > { %v1833_v6 = vsel %vm1757_vm8, %v2980_v46, %v1693_v15  ;;  %vm908_vm10 = vcmp.eq.s32.totalorder %v3461_v9, 272  ;;  %vm910_vm11 = vcmp.eq.s32.totalorder %v3465_v33, 272  ;;  %vm1049_vm12 = vcmp.eq.s32.totalorder %v3461_v9, 257 }
 0x173   : > { %v2150_v7 = vpack.c.bf16 %v1833_v6, %v1831_v1  ;;  %v985_v17 = vsel %vm908_vm10, %v2984_v49, %v844_v2  ;;  %v987_v10 = vsel %vm910_vm11, %v2984_v49, %v846_v16  ;;  %vm1051_vm13 = vcmp.eq.s32.totalorder %v3465_v33, 257 }
 0x174   : > { %v1126_v18 = vsel %vm1049_vm12, %v2986_v50, %v985_v17  ;;  %v1128_v37 = vsel %vm1051_vm13, %v2986_v50, %v987_v10  ;;  %vm1190_vm15 = vcmp.eq.s32.totalorder %v3461_v9, 256  ;;  %vm1192_vm2 = vcmp.eq.s32.totalorder %v3465_v33, 256 }
 0x175   : > { %2151 = vmatprep.subr.bf16.mxu0 %v2150_v7  ;;  %v1267_v58 = vsel %vm1190_vm15, %v2988_v52, %v1126_v18  ;;  %v1269_v19 = vsel %vm1192_vm2, %v2988_v52, %v1128_v37  ;;  %vm1331_vm3 = vcmp.eq.s32.totalorder %v3461_v9, 17  ;;  %vm1333_vm4 = vcmp.eq.s32.totalorder %v3465_v33, 17 }
 0x176   : > { %v1408_v20 = vsel %vm1331_vm3, %v2990_v53, %v1267_v58  ;;  %v1410_v21 = vsel %vm1333_vm4, %v2990_v53, %v1269_v19  ;;  %vm1472_vm5 = vcmp.eq.s32.totalorder %v3461_v9, 16  ;;  %vm1474_vm6 = vcmp.eq.s32.totalorder %v3465_v33, 16 }
 0x177   : > { %v1549_v22 = vsel %vm1472_vm5, %v2992_v55, %v1408_v20  ;;  %v1551_v23 = vsel %vm1474_vm6, %v2992_v55, %v1410_v21  ;;  %vm1613_vm14 = vcmp.eq.s32.totalorder %v3461_v9, 1  ;;  %vm1615_vm7 = vcmp.eq.s32.totalorder %v3465_v33, 1 }
 0x178   : > { %v1690_v24 = vsel %vm1613_vm14, %v2994_v56, %v1549_v22  ;;  %v1692_v25 = vsel %vm1615_vm7, %v2994_v56, %v1551_v23  ;;  %vm1754_vm0 = vcmp.eq.s32.totalorder %v3461_v9, 0  ;;  %vm1756_vm8 = vcmp.eq.s32.totalorder %v3465_v33, 0 }
 0x179   : > { %v1830_v54 = vsel %vm1754_vm0, %v2996_v57, %v1690_v24  ;;  %v1832_v26 = vsel %vm1756_vm8, %v2996_v57, %v1692_v25  ;;  %v649_v29 = vadd.s32 136, %v2955_v27  ;;  %v650_v11 = vadd.s32 144, %v2955_v27 }
 0x17a   : > { %v2152_v30 = vpack.c.bf16 %v1832_v26, %v1830_v54  ;;  %v651_v0 = vadd.s32 152, %v2955_v27  ;;  %v3520_v32 = vadd.s32 160, %v2955_v27  ;;  %v708_v59 = vsub.s32 %v648_v28, %v3004_v60 }
 0x17b   : > { %v710_v62 = vsub.s32 %v649_v29, %v3004_v60  ;;  %v3525_v8 = vsub.s32 %v648_v28, %v3006_v61  ;;  %v3528_v9 = vsub.s32 %v649_v29, %v3006_v61  ;;  %v3531_v33 = vsub.s32 %v650_v11, %v3004_v60 }
 0x17c   : > { %2153 = vmatpush1.bf16.msra.mxu0 %v2152_v30  ;;  %v3534_v63 = vsub.s32 %v651_v0, %v3004_v60  ;;  %v3537_v34 = vsub.s32 %v650_v11, %v3006_v61  ;;  %v3540_v35 = vsub.s32 %v651_v0, %v3006_v61  ;;  %vm772_vm1 = vcmp.eq.s32.totalorder %v708_v59, 273 }
 0x17d   : > { %vm774_vm9 = vcmp.eq.s32.totalorder %v710_v62, 273  ;;  %vm913_vm10 = vcmp.eq.s32.totalorder %v708_v59, 272  ;;  %vm915_vm11 = vcmp.eq.s32.totalorder %v710_v62, 272  ;;  %v849_v47 = vsel %vm772_vm1, %v2966_v39, 0.0 }
 0x17e   : > { %v851_v36 = vsel %vm774_vm9, %v2966_v39, 0.0  ;;  %vm1054_vm12 = vcmp.eq.s32.totalorder %v708_v59, 257  ;;  %vm1056_vm13 = vcmp.eq.s32.totalorder %v710_v62, 257  ;;  %v990_v38 = vsel %vm913_vm10, %v2968_v40, %v849_v47 }
 0x17f   : > { %v992_v51 = vsel %vm915_vm11, %v2968_v40, %v851_v36  ;;  %vm1195_vm15 = vcmp.eq.s32.totalorder %v708_v59, 256  ;;  %vm1197_vm2 = vcmp.eq.s32.totalorder %v710_v62, 256  ;;  %v1131_v4 = vsel %vm1054_vm12, %v2970_v41, %v990_v38 }
 0x180   : > { %v1133_v3 = vsel %vm1056_vm13, %v2970_v41, %v992_v51  ;;  %vm1336_vm3 = vcmp.eq.s32.totalorder %v708_v59, 17  ;;  %vm1338_vm4 = vcmp.eq.s32.totalorder %v710_v62, 17  ;;  %v1272_v31 = vsel %vm1195_vm15, %v2972_v42, %v1131_v4 }
 0x181   : > { %v1274_v5 = vsel %vm1197_vm2, %v2972_v42, %v1133_v3  ;;  %vm1477_vm5 = vcmp.eq.s32.totalorder %v708_v59, 16  ;;  %vm1479_vm6 = vcmp.eq.s32.totalorder %v710_v62, 16  ;;  %v1413_v12 = vsel %vm1336_vm3, %v2974_v43, %v1272_v31 }
 0x182   : > { %v1415_v13 = vsel %vm1338_vm4, %v2974_v43, %v1274_v5  ;;  %vm1618_vm14 = vcmp.eq.s32.totalorder %v708_v59, 1  ;;  %vm1620_vm7 = vcmp.eq.s32.totalorder %v710_v62, 1  ;;  %v1554_v14 = vsel %vm1477_vm5, %v2976_v44, %v1413_v12 }
 0x183   : > { %v1556_v15 = vsel %vm1479_vm6, %v2976_v44, %v1415_v13  ;;  %vm1759_vm0 = vcmp.eq.s32.totalorder %v708_v59, 0  ;;  %vm1761_vm8 = vcmp.eq.s32.totalorder %v710_v62, 0  ;;  %v1695_v1 = vsel %vm1618_vm14, %v2978_v45, %v1554_v14 }
 0x184   : > { %v1697_v2 = vsel %vm1620_vm7, %v2978_v45, %v1556_v15  ;;  %vm771_vm1 = vcmp.eq.s32.totalorder %v3525_v8, 273  ;;  %vm773_vm9 = vcmp.eq.s32.totalorder %v3528_v9, 273  ;;  %v1835_v16 = vsel %vm1759_vm0, %v2980_v46, %v1695_v1 }
 0x185   : > { %v1837_v6 = vsel %vm1761_vm8, %v2980_v46, %v1697_v2  ;;  %v848_v7 = vsel %vm771_vm1, %v2982_v48, 0.0  ;;  %v850_v17 = vsel %vm773_vm9, %v2982_v48, 0.0  ;;  %vm912_vm10 = vcmp.eq.s32.totalorder %v3525_v8, 272 }
 0x186   : > { %v2154_v10 = vpack.c.bf16 %v1837_v6, %v1835_v16  ;;  %vm914_vm11 = vcmp.eq.s32.totalorder %v3528_v9, 272  ;;  %vm1053_vm12 = vcmp.eq.s32.totalorder %v3525_v8, 257  ;;  %v989_v18 = vsel %vm912_vm10, %v2984_v49, %v848_v7 }
 0x187   : > { %v991_v37 = vsel %vm914_vm11, %v2984_v49, %v850_v17  ;;  %vm1055_vm13 = vcmp.eq.s32.totalorder %v3528_v9, 257  ;;  %vm1194_vm15 = vcmp.eq.s32.totalorder %v3525_v8, 256  ;;  %v1130_v58 = vsel %vm1053_vm12, %v2986_v50, %v989_v18 }
 0x188   : > { %2155 = vmatprep.subr.bf16.mxu0 %v2154_v10  ;;  %v1132_v19 = vsel %vm1055_vm13, %v2986_v50, %v991_v37  ;;  %vm1196_vm2 = vcmp.eq.s32.totalorder %v3528_v9, 256  ;;  %vm1335_vm3 = vcmp.eq.s32.totalorder %v3525_v8, 17  ;;  %v1271_v20 = vsel %vm1194_vm15, %v2988_v52, %v1130_v58 }
 0x189   : > { %v1273_v21 = vsel %vm1196_vm2, %v2988_v52, %v1132_v19  ;;  %vm1337_vm4 = vcmp.eq.s32.totalorder %v3528_v9, 17  ;;  %vm1476_vm5 = vcmp.eq.s32.totalorder %v3525_v8, 16  ;;  %v1412_v22 = vsel %vm1335_vm3, %v2990_v53, %v1271_v20 }
 0x18a   : > { %v1414_v23 = vsel %vm1337_vm4, %v2990_v53, %v1273_v21  ;;  %vm1478_vm6 = vcmp.eq.s32.totalorder %v3528_v9, 16  ;;  %vm1617_vm14 = vcmp.eq.s32.totalorder %v3525_v8, 1  ;;  %v1553_v24 = vsel %vm1476_vm5, %v2992_v55, %v1412_v22 }
 0x18b   : > { %v1555_v25 = vsel %vm1478_vm6, %v2992_v55, %v1414_v23  ;;  %vm1619_vm7 = vcmp.eq.s32.totalorder %v3528_v9, 1  ;;  %vm1758_vm0 = vcmp.eq.s32.totalorder %v3525_v8, 0  ;;  %v1694_v54 = vsel %vm1617_vm14, %v2994_v56, %v1553_v24 }
 0x18c   : > { %v1696_v26 = vsel %vm1619_vm7, %v2994_v56, %v1555_v25  ;;  %vm1760_vm8 = vcmp.eq.s32.totalorder %v3528_v9, 0  ;;  %vm776_vm1 = vcmp.eq.s32.totalorder %v3531_v33, 273  ;;  %v1834_v28 = vsel %vm1758_vm0, %v2996_v57, %v1694_v54 }
 0x18d   : > { %v1836_v29 = vsel %vm1760_vm8, %v2996_v57, %v1696_v26  ;;  %vm778_vm9 = vcmp.eq.s32.totalorder %v3534_v63, 273  ;;  %v853_v30 = vsel %vm776_vm1, %v2966_v39, 0.0  ;;  %vm917_vm10 = vcmp.eq.s32.totalorder %v3531_v33, 272 }
 0x18e   : > { %v2156_v11 = vpack.c.bf16 %v1836_v29, %v1834_v28  ;;  %v855_v0 = vsel %vm778_vm9, %v2966_v39, 0.0  ;;  %vm919_vm11 = vcmp.eq.s32.totalorder %v3534_v63, 272  ;;  %v994_v59 = vsel %vm917_vm10, %v2968_v40, %v853_v30 }
 0x18f   : > { %v996_v62 = vsel %vm919_vm11, %v2968_v40, %v855_v0  ;;  %vm1058_vm12 = vcmp.eq.s32.totalorder %v3531_v33, 257  ;;  %vm1060_vm13 = vcmp.eq.s32.totalorder %v3534_v63, 257  ;;  %vm1199_vm15 = vcmp.eq.s32.totalorder %v3531_v33, 256 }
 0x190   : > { %2157 = vmatpush1.bf16.msra.mxu0 %v2156_v11  ;;  %v1135_v8 = vsel %vm1058_vm12, %v2970_v41, %v994_v59  ;;  %v1137_v9 = vsel %vm1060_vm13, %v2970_v41, %v996_v62  ;;  %vm1201_vm2 = vcmp.eq.s32.totalorder %v3534_v63, 256  ;;  %vm1340_vm3 = vcmp.eq.s32.totalorder %v3531_v33, 17 }
 0x191   : > { %v1276_v47 = vsel %vm1199_vm15, %v2972_v42, %v1135_v8  ;;  %v1278_v36 = vsel %vm1201_vm2, %v2972_v42, %v1137_v9  ;;  %vm1342_vm4 = vcmp.eq.s32.totalorder %v3534_v63, 17  ;;  %vm1481_vm5 = vcmp.eq.s32.totalorder %v3531_v33, 16 }
 0x192   : > { %v1417_v38 = vsel %vm1340_vm3, %v2974_v43, %v1276_v47  ;;  %v1419_v51 = vsel %vm1342_vm4, %v2974_v43, %v1278_v36  ;;  %vm1483_vm6 = vcmp.eq.s32.totalorder %v3534_v63, 16  ;;  %vm1622_vm14 = vcmp.eq.s32.totalorder %v3531_v33, 1 }
 0x193   : > { %v1558_v4 = vsel %vm1481_vm5, %v2976_v44, %v1417_v38  ;;  %v1560_v3 = vsel %vm1483_vm6, %v2976_v44, %v1419_v51  ;;  %vm1624_vm7 = vcmp.eq.s32.totalorder %v3534_v63, 1  ;;  %vm1763_vm0 = vcmp.eq.s32.totalorder %v3531_v33, 0 }
 0x194   : > { %v1699_v31 = vsel %vm1622_vm14, %v2978_v45, %v1558_v4  ;;  %v1701_v5 = vsel %vm1624_vm7, %v2978_v45, %v1560_v3  ;;  %vm1765_vm8 = vcmp.eq.s32.totalorder %v3534_v63, 0  ;;  %vm775_vm1 = vcmp.eq.s32.totalorder %v3537_v34, 273 }
 0x195   : > { %v1839_v12 = vsel %vm1763_vm0, %v2980_v46, %v1699_v31  ;;  %v1841_v13 = vsel %vm1765_vm8, %v2980_v46, %v1701_v5  ;;  %vm777_vm9 = vcmp.eq.s32.totalorder %v3540_v35, 273  ;;  %v852_v15 = vsel %vm775_vm1, %v2982_v48, 0.0 }
 0x196   : > { %v2158_v14 = vpack.c.bf16 %v1841_v13, %v1839_v12  ;;  %v854_v1 = vsel %vm777_vm9, %v2982_v48, 0.0  ;;  %vm916_vm10 = vcmp.eq.s32.totalorder %v3537_v34, 272  ;;  %vm918_vm11 = vcmp.eq.s32.totalorder %v3540_v35, 272 }
 0x197   : > { %v993_v33 = vsel %vm916_vm10, %v2984_v49, %v852_v15  ;;  %vm1057_vm12 = vcmp.eq.s32.totalorder %v3537_v34, 257  ;;  %vm1059_vm13 = vcmp.eq.s32.totalorder %v3540_v35, 257  ;;  %v995_v63 = vsel %vm918_vm11, %v2984_v49, %v854_v1 }
 0x198   : > { %2159 = vmatprep.subr.bf16.mxu0 %v2158_v14  ;;  %v1134_v2 = vsel %vm1057_vm12, %v2986_v50, %v993_v33  ;;  %vm1198_vm15 = vcmp.eq.s32.totalorder %v3537_v34, 256  ;;  %vm1200_vm2 = vcmp.eq.s32.totalorder %v3540_v35, 256  ;;  %v1136_v16 = vsel %vm1059_vm13, %v2986_v50, %v995_v63 }
 0x199   : > { %v1275_v6 = vsel %vm1198_vm15, %v2988_v52, %v1134_v2  ;;  %vm1339_vm3 = vcmp.eq.s32.totalorder %v3537_v34, 17  ;;  %vm1341_vm4 = vcmp.eq.s32.totalorder %v3540_v35, 17  ;;  %v1277_v7 = vsel %vm1200_vm2, %v2988_v52, %v1136_v16 }
 0x19a   : > { %v1416_v17 = vsel %vm1339_vm3, %v2990_v53, %v1275_v6  ;;  %vm1480_vm5 = vcmp.eq.s32.totalorder %v3537_v34, 16  ;;  %vm1482_vm6 = vcmp.eq.s32.totalorder %v3540_v35, 16  ;;  %v1418_v10 = vsel %vm1341_vm4, %v2990_v53, %v1277_v7 }
 0x19b   : > { %v1557_v18 = vsel %vm1480_vm5, %v2992_v55, %v1416_v17  ;;  %vm1621_vm14 = vcmp.eq.s32.totalorder %v3537_v34, 1  ;;  %vm1623_vm7 = vcmp.eq.s32.totalorder %v3540_v35, 1  ;;  %v1559_v37 = vsel %vm1482_vm6, %v2992_v55, %v1418_v10 }
 0x19c   : > { %v1698_v58 = vsel %vm1621_vm14, %v2994_v56, %v1557_v18  ;;  %vm1762_vm0 = vcmp.eq.s32.totalorder %v3537_v34, 0  ;;  %vm1764_vm8 = vcmp.eq.s32.totalorder %v3540_v35, 0  ;;  %v1700_v19 = vsel %vm1623_vm7, %v2994_v56, %v1559_v37 }
 0x19d   : > { %v1838_v20 = vsel %vm1762_vm0, %v2996_v57, %v1698_v58  ;;  %v653_v21 = vadd.s32 168, %v2955_v27  ;;  %v716_v22 = vsub.s32 %v3520_v32, %v3004_v60  ;;  %v1840_v23 = vsel %vm1764_vm8, %v2996_v57, %v1700_v19 }
 0x19e   : > { %v3659_v24 = vsub.s32 %v3520_v32, %v3006_v61  ;;  %v3662_v25 = vadd.s32 176, %v2955_v27  ;;  %v3665_v34 = vadd.s32 184, %v2955_v27  ;;  %v2160_v35 = vpack.c.bf16 %v1840_v23, %v1838_v20 }
 0x19f   : > { %v718_v54 = vsub.s32 %v653_v21, %v3004_v60  ;;  %vm780_vm1 = vcmp.eq.s32.totalorder %v716_v22, 273  ;;  %vm921_vm9 = vcmp.eq.s32.totalorder %v716_v22, 272  ;;  %vm1062_vm10 = vcmp.eq.s32.totalorder %v716_v22, 257 }
 0x1a0   : > { %v857_v26 = vsel %vm780_vm1, %v2966_v39, 0.0  ;;  %vm1203_vm11 = vcmp.eq.s32.totalorder %v716_v22, 256  ;;  %vm1344_vm12 = vcmp.eq.s32.totalorder %v716_v22, 17  ;;  %2161 = vmatpush1.bf16.msra.mxu0 %v2160_v35  ;;  %vm1485_vm5 = vcmp.eq.s32.totalorder %v716_v22, 16 }
 0x1a1   : > { %vm782_vm13 = vcmp.eq.s32.totalorder %v718_v54, 273  ;;  %vm923_vm15 = vcmp.eq.s32.totalorder %v718_v54, 272  ;;  %v998_v32 = vsel %vm921_vm9, %v2968_v40, %v857_v26  ;;  %vm1064_vm2 = vcmp.eq.s32.totalorder %v718_v54, 257 }
 0x1a2   : > { %v859_v28 = vsel %vm782_vm13, %v2966_v39, 0.0  ;;  %v1139_v29 = vsel %vm1062_vm10, %v2970_v41, %v998_v32  ;;  %vm1205_vm3 = vcmp.eq.s32.totalorder %v718_v54, 256  ;;  %vm1346_vm4 = vcmp.eq.s32.totalorder %v718_v54, 17 }
 0x1a3   : > { %v1000_v30 = vsel %vm923_vm15, %v2968_v40, %v859_v28  ;;  %v1280_v11 = vsel %vm1203_vm11, %v2972_v42, %v1139_v29  ;;  %vm1487_vm6 = vcmp.eq.s32.totalorder %v718_v54, 16  ;;  %vm1626_vm14 = vcmp.eq.s32.totalorder %v716_v22, 1 }
 0x1a4   : > { %v1141_v0 = vsel %vm1064_vm2, %v2970_v41, %v1000_v30  ;;  %v1421_v59 = vsel %vm1344_vm12, %v2974_v43, %v1280_v11  ;;  %vm1628_vm7 = vcmp.eq.s32.totalorder %v718_v54, 1  ;;  %vm1767_vm0 = vcmp.eq.s32.totalorder %v716_v22, 0 }
 0x1a5   : > { %v1282_v62 = vsel %vm1205_vm3, %v2972_v42, %v1141_v0  ;;  %v1562_v8 = vsel %vm1485_vm5, %v2976_v44, %v1421_v59  ;;  %vm1769_vm8 = vcmp.eq.s32.totalorder %v718_v54, 0  ;;  %v717_v36 = vsub.s32 %v653_v21, %v3006_v61 }
 0x1a6   : > { %v1423_v9 = vsel %vm1346_vm4, %v2974_v43, %v1282_v62  ;;  %v1703_v47 = vsel %vm1626_vm14, %v2978_v45, %v1562_v8  ;;  %vm779_vm1 = vcmp.eq.s32.totalorder %v3659_v24, 273  ;;  %vm920_vm9 = vcmp.eq.s32.totalorder %v3659_v24, 272 }
 0x1a7   : > { %v1564_v38 = vsel %vm1487_vm6, %v2976_v44, %v1423_v9  ;;  %v1843_v51 = vsel %vm1767_vm0, %v2980_v46, %v1703_v47  ;;  %v856_v4 = vsel %vm779_vm1, %v2982_v48, 0.0  ;;  %vm781_vm10 = vcmp.eq.s32.totalorder %v717_v36, 273 }
 0x1a8   : > { %v1705_v3 = vsel %vm1628_vm7, %v2978_v45, %v1564_v38  ;;  %vm922_vm11 = vcmp.eq.s32.totalorder %v717_v36, 272  ;;  %v997_v31 = vsel %vm920_vm9, %v2984_v49, %v856_v4  ;;  %v858_v12 = vsel %vm781_vm10, %v2982_v48, 0.0 }
 0x1a9   : > { %v1845_v5 = vsel %vm1769_vm8, %v2980_v46, %v1705_v3  ;;  %vm1061_vm12 = vcmp.eq.s32.totalorder %v3659_v24, 257  ;;  %vm1063_vm13 = vcmp.eq.s32.totalorder %v717_v36, 257  ;;  %v999_v14 = vsel %vm922_vm11, %v2984_v49, %v858_v12 }
 0x1aa   : > { %v2162_v13 = vpack.c.bf16 %v1845_v5, %v1843_v51  ;;  %v1138_v15 = vsel %vm1061_vm12, %v2986_v50, %v997_v31  ;;  %vm1202_vm15 = vcmp.eq.s32.totalorder %v3659_v24, 256  ;;  %v1140_v1 = vsel %vm1063_vm13, %v2986_v50, %v999_v14 }
 0x1ab   : > { %vm1204_vm2 = vcmp.eq.s32.totalorder %v717_v36, 256  ;;  %v1279_v33 = vsel %vm1202_vm15, %v2988_v52, %v1138_v15  ;;  %vm1343_vm3 = vcmp.eq.s32.totalorder %v3659_v24, 17  ;;  %vm1345_vm4 = vcmp.eq.s32.totalorder %v717_v36, 17 }
 0x1ac   : > { %2163 = vmatprep.subr.bf16.mxu0 %v2162_v13  ;;  %v1281_v63 = vsel %vm1204_vm2, %v2988_v52, %v1140_v1  ;;  %v1420_v2 = vsel %vm1343_vm3, %v2990_v53, %v1279_v33  ;;  %vm1484_vm5 = vcmp.eq.s32.totalorder %v3659_v24, 16  ;;  %vm1486_vm6 = vcmp.eq.s32.totalorder %v717_v36, 16 }
 0x1ad   : > { %v1422_v16 = vsel %vm1345_vm4, %v2990_v53, %v1281_v63  ;;  %v1561_v6 = vsel %vm1484_vm5, %v2992_v55, %v1420_v2  ;;  %vm1625_vm14 = vcmp.eq.s32.totalorder %v3659_v24, 1  ;;  %vm1627_vm7 = vcmp.eq.s32.totalorder %v717_v36, 1 }
 0x1ae   : > { %v1563_v7 = vsel %vm1486_vm6, %v2992_v55, %v1422_v16  ;;  %v1702_v17 = vsel %vm1625_vm14, %v2994_v56, %v1561_v6  ;;  %vm1766_vm0 = vcmp.eq.s32.totalorder %v3659_v24, 0  ;;  %vm1768_vm8 = vcmp.eq.s32.totalorder %v717_v36, 0 }
 0x1af   : > { %v1704_v10 = vsel %vm1627_vm7, %v2994_v56, %v1563_v7  ;;  %v1842_v18 = vsel %vm1766_vm0, %v2996_v57, %v1702_v17  ;;  %v720_v37 = vsub.s32 %v3662_v25, %v3004_v60  ;;  %v722_v19 = vsub.s32 %v3665_v34, %v3004_v60 }
 0x1b0   : > { %v1844_v58 = vsel %vm1768_vm8, %v2996_v57, %v1704_v10  ;;  %v3715_v20 = vsub.s32 %v3662_v25, %v3006_v61  ;;  %v3719_v21 = vsub.s32 %v3665_v34, %v3006_v61  ;;  %v656_v16 = vadd.s32 192, %v2955_v27 }
 0x1b1   : > { %v2164_v22 = vpack.c.bf16 %v1844_v58, %v1842_v18  ;;  %vm784_vm1 = vcmp.eq.s32.totalorder %v720_v37, 273  ;;  %vm925_vm9 = vcmp.eq.s32.totalorder %v720_v37, 272  ;;  %vm1066_vm10 = vcmp.eq.s32.totalorder %v720_v37, 257 }
 0x1b2   : > { %vm786_vm11 = vcmp.eq.s32.totalorder %v722_v19, 273  ;;  %v861_v23 = vsel %vm784_vm1, %v2966_v39, 0.0  ;;  %vm927_vm12 = vcmp.eq.s32.totalorder %v722_v19, 272  ;;  %vm1068_vm13 = vcmp.eq.s32.totalorder %v722_v19, 257 }
 0x1b3   : > { %2165 = vmatpush1.bf16.msra.mxu0 %v2164_v22  ;;  %v863_v24 = vsel %vm786_vm11, %v2966_v39, 0.0  ;;  %v1002_v35 = vsel %vm925_vm9, %v2968_v40, %v861_v23  ;;  %vm1207_vm15 = vcmp.eq.s32.totalorder %v720_v37, 256  ;;  %vm1209_vm2 = vcmp.eq.s32.totalorder %v722_v19, 256 }
 0x1b4   : > { %v1004_v25 = vsel %vm927_vm12, %v2968_v40, %v863_v24  ;;  %v1143_v34 = vsel %vm1066_vm10, %v2970_v41, %v1002_v35  ;;  %vm1348_vm3 = vcmp.eq.s32.totalorder %v720_v37, 17  ;;  %vm1350_vm4 = vcmp.eq.s32.totalorder %v722_v19, 17 }
 0x1b5   : > { %v1145_v54 = vsel %vm1068_vm13, %v2970_v41, %v1004_v25  ;;  %v1284_v26 = vsel %vm1207_vm15, %v2972_v42, %v1143_v34  ;;  %vm1489_vm5 = vcmp.eq.s32.totalorder %v720_v37, 16  ;;  %vm1491_vm6 = vcmp.eq.s32.totalorder %v722_v19, 16 }
 0x1b6   : > { %v1286_v32 = vsel %vm1209_vm2, %v2972_v42, %v1145_v54  ;;  %v1425_v28 = vsel %vm1348_vm3, %v2974_v43, %v1284_v26  ;;  %vm1630_vm14 = vcmp.eq.s32.totalorder %v720_v37, 1  ;;  %vm1632_vm7 = vcmp.eq.s32.totalorder %v722_v19, 1 }
 0x1b7   : > { %v1427_v29 = vsel %vm1350_vm4, %v2974_v43, %v1286_v32  ;;  %v1566_v30 = vsel %vm1489_vm5, %v2976_v44, %v1425_v28  ;;  %vm1771_vm0 = vcmp.eq.s32.totalorder %v720_v37, 0  ;;  %vm1773_vm8 = vcmp.eq.s32.totalorder %v722_v19, 0 }
 0x1b8   : > { %v1568_v11 = vsel %vm1491_vm6, %v2976_v44, %v1427_v29  ;;  %v1707_v0 = vsel %vm1630_vm14, %v2978_v45, %v1566_v30  ;;  %vm783_vm1 = vcmp.eq.s32.totalorder %v3715_v20, 273  ;;  %vm785_vm9 = vcmp.eq.s32.totalorder %v3719_v21, 273 }
 0x1b9   : > { %v1709_v59 = vsel %vm1632_vm7, %v2978_v45, %v1568_v11  ;;  %v1847_v62 = vsel %vm1771_vm0, %v2980_v46, %v1707_v0  ;;  %v860_v8 = vsel %vm783_vm1, %v2982_v48, 0.0  ;;  %v862_v9 = vsel %vm785_vm9, %v2982_v48, 0.0 }
 0x1ba   : > { %v1849_v47 = vsel %vm1773_vm8, %v2980_v46, %v1709_v59  ;;  %vm924_vm10 = vcmp.eq.s32.totalorder %v3715_v20, 272  ;;  %vm926_vm11 = vcmp.eq.s32.totalorder %v3719_v21, 272  ;;  %vm1065_vm12 = vcmp.eq.s32.totalorder %v3715_v20, 257 }
 0x1bb   : > { %v2166_v36 = vpack.c.bf16 %v1849_v47, %v1847_v62  ;;  %v1001_v38 = vsel %vm924_vm10, %v2984_v49, %v860_v8  ;;  %v1003_v51 = vsel %vm926_vm11, %v2984_v49, %v862_v9  ;;  %vm1067_vm13 = vcmp.eq.s32.totalorder %v3719_v21, 257 }
 0x1bc   : > { %v1142_v4 = vsel %vm1065_vm12, %v2986_v50, %v1001_v38  ;;  %v1144_v3 = vsel %vm1067_vm13, %v2986_v50, %v1003_v51  ;;  %vm1206_vm15 = vcmp.eq.s32.totalorder %v3715_v20, 256  ;;  %vm1208_vm2 = vcmp.eq.s32.totalorder %v3719_v21, 256 }
 0x1bd   : > { %2167 = vmatprep.subr.bf16.mxu0 %v2166_v36  ;;  %v1283_v31 = vsel %vm1206_vm15, %v2988_v52, %v1142_v4  ;;  %v1285_v5 = vsel %vm1208_vm2, %v2988_v52, %v1144_v3  ;;  %vm1347_vm3 = vcmp.eq.s32.totalorder %v3715_v20, 17  ;;  %vm1349_vm4 = vcmp.eq.s32.totalorder %v3719_v21, 17 }
 0x1be   : > { %v1424_v12 = vsel %vm1347_vm3, %v2990_v53, %v1283_v31  ;;  %v1426_v13 = vsel %vm1349_vm4, %v2990_v53, %v1285_v5  ;;  %vm1488_vm5 = vcmp.eq.s32.totalorder %v3715_v20, 16  ;;  %vm1490_vm6 = vcmp.eq.s32.totalorder %v3719_v21, 16 }
 0x1bf   : > { %v1565_v14 = vsel %vm1488_vm5, %v2992_v55, %v1424_v12  ;;  %v1567_v15 = vsel %vm1490_vm6, %v2992_v55, %v1426_v13  ;;  %vm1629_vm14 = vcmp.eq.s32.totalorder %v3715_v20, 1  ;;  %vm1631_vm7 = vcmp.eq.s32.totalorder %v3719_v21, 1 }
 0x1c0   : > { %v1706_v1 = vsel %vm1629_vm14, %v2994_v56, %v1565_v14  ;;  %v1708_v33 = vsel %vm1631_vm7, %v2994_v56, %v1567_v15  ;;  %vm1770_vm0 = vcmp.eq.s32.totalorder %v3715_v20, 0  ;;  %vm1772_vm8 = vcmp.eq.s32.totalorder %v3719_v21, 0 }
 0x1c1   : > { %v1846_v63 = vsel %vm1770_vm0, %v2996_v57, %v1706_v1  ;;  %v1848_v2 = vsel %vm1772_vm8, %v2996_v57, %v1708_v33  ;;  %v657_v6 = vadd.s32 200, %v2955_v27  ;;  %v658_v17 = vadd.s32 208, %v2955_v27 }
 0x1c2   : > { %v2168_v7 = vpack.c.bf16 %v1848_v2, %v1846_v63  ;;  %v659_v10 = vadd.s32 216, %v2955_v27  ;;  %v3774_v18 = vadd.s32 224, %v2955_v27  ;;  %v724_v37 = vsub.s32 %v656_v16, %v3004_v60 }
 0x1c3   : > { %v726_v58 = vsub.s32 %v657_v6, %v3004_v60  ;;  %v3779_v19 = vsub.s32 %v656_v16, %v3006_v61  ;;  %v3782_v20 = vsub.s32 %v657_v6, %v3006_v61  ;;  %v3785_v21 = vsub.s32 %v658_v17, %v3004_v60 }
 0x1c4   : > { %2169 = vmatpush1.bf16.msra.mxu0 %v2168_v7  ;;  %v3788_v22 = vsub.s32 %v659_v10, %v3004_v60  ;;  %v3791_v23 = vsub.s32 %v658_v17, %v3006_v61  ;;  %v3794_v24 = vsub.s32 %v659_v10, %v3006_v61  ;;  %vm788_vm1 = vcmp.eq.s32.totalorder %v724_v37, 273 }
 0x1c5   : > { %vm790_vm9 = vcmp.eq.s32.totalorder %v726_v58, 273  ;;  %vm929_vm10 = vcmp.eq.s32.totalorder %v724_v37, 272  ;;  %vm931_vm11 = vcmp.eq.s32.totalorder %v726_v58, 272  ;;  %v865_v35 = vsel %vm788_vm1, %v2966_v39, 0.0 }
 0x1c6   : > { %v867_v25 = vsel %vm790_vm9, %v2966_v39, 0.0  ;;  %vm1070_vm12 = vcmp.eq.s32.totalorder %v724_v37, 257  ;;  %vm1072_vm13 = vcmp.eq.s32.totalorder %v726_v58, 257  ;;  %v1006_v34 = vsel %vm929_vm10, %v2968_v40, %v865_v35 }
 0x1c7   : > { %v1008_v54 = vsel %vm931_vm11, %v2968_v40, %v867_v25  ;;  %vm1211_vm15 = vcmp.eq.s32.totalorder %v724_v37, 256  ;;  %vm1213_vm2 = vcmp.eq.s32.totalorder %v726_v58, 256  ;;  %v1147_v26 = vsel %vm1070_vm12, %v2970_v41, %v1006_v34 }
 0x1c8   : > { %v1149_v32 = vsel %vm1072_vm13, %v2970_v41, %v1008_v54  ;;  %vm1352_vm3 = vcmp.eq.s32.totalorder %v724_v37, 17  ;;  %vm1354_vm4 = vcmp.eq.s32.totalorder %v726_v58, 17  ;;  %v1288_v28 = vsel %vm1211_vm15, %v2972_v42, %v1147_v26 }
 0x1c9   : > { %v1290_v29 = vsel %vm1213_vm2, %v2972_v42, %v1149_v32  ;;  %vm1493_vm5 = vcmp.eq.s32.totalorder %v724_v37, 16  ;;  %vm1495_vm6 = vcmp.eq.s32.totalorder %v726_v58, 16  ;;  %v1429_v30 = vsel %vm1352_vm3, %v2974_v43, %v1288_v28 }
 0x1ca   : > { %v1431_v11 = vsel %vm1354_vm4, %v2974_v43, %v1290_v29  ;;  %vm1634_vm14 = vcmp.eq.s32.totalorder %v724_v37, 1  ;;  %vm1636_vm7 = vcmp.eq.s32.totalorder %v726_v58, 1  ;;  %v1570_v0 = vsel %vm1493_vm5, %v2976_v44, %v1429_v30 }
 0x1cb   : > { %v1572_v59 = vsel %vm1495_vm6, %v2976_v44, %v1431_v11  ;;  %vm1775_vm0 = vcmp.eq.s32.totalorder %v724_v37, 0  ;;  %vm1777_vm8 = vcmp.eq.s32.totalorder %v726_v58, 0  ;;  %v1711_v62 = vsel %vm1634_vm14, %v2978_v45, %v1570_v0 }
 0x1cc   : > { %v1713_v8 = vsel %vm1636_vm7, %v2978_v45, %v1572_v59  ;;  %vm787_vm1 = vcmp.eq.s32.totalorder %v3779_v19, 273  ;;  %vm789_vm9 = vcmp.eq.s32.totalorder %v3782_v20, 273  ;;  %v1851_v9 = vsel %vm1775_vm0, %v2980_v46, %v1711_v62 }
 0x1cd   : > { %v1853_v47 = vsel %vm1777_vm8, %v2980_v46, %v1713_v8  ;;  %v864_v36 = vsel %vm787_vm1, %v2982_v48, 0.0  ;;  %v866_v38 = vsel %vm789_vm9, %v2982_v48, 0.0  ;;  %vm928_vm10 = vcmp.eq.s32.totalorder %v3779_v19, 272 }
 0x1ce   : > { %v2170_v51 = vpack.c.bf16 %v1853_v47, %v1851_v9  ;;  %vm930_vm11 = vcmp.eq.s32.totalorder %v3782_v20, 272  ;;  %vm1069_vm12 = vcmp.eq.s32.totalorder %v3779_v19, 257  ;;  %v1005_v4 = vsel %vm928_vm10, %v2984_v49, %v864_v36 }
 0x1cf   : > { %v1007_v3 = vsel %vm930_vm11, %v2984_v49, %v866_v38  ;;  %vm1071_vm13 = vcmp.eq.s32.totalorder %v3782_v20, 257  ;;  %vm1210_vm15 = vcmp.eq.s32.totalorder %v3779_v19, 256  ;;  %v1146_v31 = vsel %vm1069_vm12, %v2986_v50, %v1005_v4 }
 0x1d0   : > { %2171 = vmatprep.subr.bf16.mxu0 %v2170_v51  ;;  %v1148_v5 = vsel %vm1071_vm13, %v2986_v50, %v1007_v3  ;;  %vm1212_vm2 = vcmp.eq.s32.totalorder %v3782_v20, 256  ;;  %vm1351_vm3 = vcmp.eq.s32.totalorder %v3779_v19, 17  ;;  %v1287_v12 = vsel %vm1210_vm15, %v2988_v52, %v1146_v31 }
 0x1d1   : > { %v1289_v13 = vsel %vm1212_vm2, %v2988_v52, %v1148_v5  ;;  %vm1353_vm4 = vcmp.eq.s32.totalorder %v3782_v20, 17  ;;  %vm1492_vm5 = vcmp.eq.s32.totalorder %v3779_v19, 16  ;;  %v1428_v14 = vsel %vm1351_vm3, %v2990_v53, %v1287_v12 }
 0x1d2   : > { %v1430_v15 = vsel %vm1353_vm4, %v2990_v53, %v1289_v13  ;;  %vm1494_vm6 = vcmp.eq.s32.totalorder %v3782_v20, 16  ;;  %vm1633_vm14 = vcmp.eq.s32.totalorder %v3779_v19, 1  ;;  %v1569_v1 = vsel %vm1492_vm5, %v2992_v55, %v1428_v14 }
 0x1d3   : > { %v1571_v33 = vsel %vm1494_vm6, %v2992_v55, %v1430_v15  ;;  %vm1635_vm7 = vcmp.eq.s32.totalorder %v3782_v20, 1  ;;  %vm1774_vm0 = vcmp.eq.s32.totalorder %v3779_v19, 0  ;;  %v1710_v63 = vsel %vm1633_vm14, %v2994_v56, %v1569_v1 }
 0x1d4   : > { %v1712_v2 = vsel %vm1635_vm7, %v2994_v56, %v1571_v33  ;;  %vm1776_vm8 = vcmp.eq.s32.totalorder %v3782_v20, 0  ;;  %vm792_vm1 = vcmp.eq.s32.totalorder %v3785_v21, 273  ;;  %v1850_v16 = vsel %vm1774_vm0, %v2996_v57, %v1710_v63 }
 0x1d5   : > { %v1852_v6 = vsel %vm1776_vm8, %v2996_v57, %v1712_v2  ;;  %vm794_vm9 = vcmp.eq.s32.totalorder %v3788_v22, 273  ;;  %v869_v7 = vsel %vm792_vm1, %v2966_v39, 0.0  ;;  %vm933_vm10 = vcmp.eq.s32.totalorder %v3785_v21, 272 }
 0x1d6   : > { %v2172_v17 = vpack.c.bf16 %v1852_v6, %v1850_v16  ;;  %v871_v10 = vsel %vm794_vm9, %v2966_v39, 0.0  ;;  %vm935_vm11 = vcmp.eq.s32.totalorder %v3788_v22, 272  ;;  %v1010_v37 = vsel %vm933_vm10, %v2968_v40, %v869_v7 }
 0x1d7   : > { %v1012_v58 = vsel %vm935_vm11, %v2968_v40, %v871_v10  ;;  %vm1074_vm12 = vcmp.eq.s32.totalorder %v3785_v21, 257  ;;  %vm1076_vm13 = vcmp.eq.s32.totalorder %v3788_v22, 257  ;;  %vm1215_vm15 = vcmp.eq.s32.totalorder %v3785_v21, 256 }
 0x1d8   : > { %2173 = vmatpush1.bf16.msra.mxu0 %v2172_v17  ;;  %v1151_v19 = vsel %vm1074_vm12, %v2970_v41, %v1010_v37  ;;  %v1153_v20 = vsel %vm1076_vm13, %v2970_v41, %v1012_v58  ;;  %vm1217_vm2 = vcmp.eq.s32.totalorder %v3788_v22, 256  ;;  %vm1356_vm3 = vcmp.eq.s32.totalorder %v3785_v21, 17 }
 0x1d9   : > { %v1292_v35 = vsel %vm1215_vm15, %v2972_v42, %v1151_v19  ;;  %v1294_v25 = vsel %vm1217_vm2, %v2972_v42, %v1153_v20  ;;  %vm1358_vm4 = vcmp.eq.s32.totalorder %v3788_v22, 17  ;;  %vm1497_vm5 = vcmp.eq.s32.totalorder %v3785_v21, 16 }
 0x1da   : > { %v1433_v34 = vsel %vm1356_vm3, %v2974_v43, %v1292_v35  ;;  %v1435_v54 = vsel %vm1358_vm4, %v2974_v43, %v1294_v25  ;;  %vm1499_vm6 = vcmp.eq.s32.totalorder %v3788_v22, 16  ;;  %vm1638_vm14 = vcmp.eq.s32.totalorder %v3785_v21, 1 }
 0x1db   : > { %v1574_v26 = vsel %vm1497_vm5, %v2976_v44, %v1433_v34  ;;  %v1576_v32 = vsel %vm1499_vm6, %v2976_v44, %v1435_v54  ;;  %vm1640_vm7 = vcmp.eq.s32.totalorder %v3788_v22, 1  ;;  %vm1779_vm0 = vcmp.eq.s32.totalorder %v3785_v21, 0 }
 0x1dc   : > { %v1715_v28 = vsel %vm1638_vm14, %v2978_v45, %v1574_v26  ;;  %v1717_v29 = vsel %vm1640_vm7, %v2978_v45, %v1576_v32  ;;  %vm1781_vm8 = vcmp.eq.s32.totalorder %v3788_v22, 0  ;;  %vm791_vm1 = vcmp.eq.s32.totalorder %v3791_v23, 273 }
 0x1dd   : > { %v1855_v30 = vsel %vm1779_vm0, %v2980_v46, %v1715_v28  ;;  %v1857_v11 = vsel %vm1781_vm8, %v2980_v46, %v1717_v29  ;;  %vm793_vm9 = vcmp.eq.s32.totalorder %v3794_v24, 273  ;;  %v868_v59 = vsel %vm791_vm1, %v2982_v48, 0.0 }
 0x1de   : > { %v2174_v0 = vpack.c.bf16 %v1857_v11, %v1855_v30  ;;  %v870_v62 = vsel %vm793_vm9, %v2982_v48, 0.0  ;;  %vm932_vm10 = vcmp.eq.s32.totalorder %v3791_v23, 272  ;;  %vm934_vm11 = vcmp.eq.s32.totalorder %v3794_v24, 272 }
 0x1df   : > { %v1009_v21 = vsel %vm932_vm10, %v2984_v49, %v868_v59  ;;  %vm1073_vm12 = vcmp.eq.s32.totalorder %v3791_v23, 257  ;;  %vm1075_vm13 = vcmp.eq.s32.totalorder %v3794_v24, 257  ;;  %v1011_v22 = vsel %vm934_vm11, %v2984_v49, %v870_v62 }
 0x1e0   : > { %2175 = vmatprep.subr.bf16.mxu0 %v2174_v0  ;;  %v1150_v8 = vsel %vm1073_vm12, %v2986_v50, %v1009_v21  ;;  %vm1214_vm15 = vcmp.eq.s32.totalorder %v3791_v23, 256  ;;  %vm1216_vm2 = vcmp.eq.s32.totalorder %v3794_v24, 256  ;;  %v1152_v9 = vsel %vm1075_vm13, %v2986_v50, %v1011_v22 }
 0x1e1   : > { %v1291_v47 = vsel %vm1214_vm15, %v2988_v52, %v1150_v8  ;;  %vm1355_vm3 = vcmp.eq.s32.totalorder %v3791_v23, 17  ;;  %vm1357_vm4 = vcmp.eq.s32.totalorder %v3794_v24, 17  ;;  %v1293_v36 = vsel %vm1216_vm2, %v2988_v52, %v1152_v9 }
 0x1e2   : > { %v1432_v38 = vsel %vm1355_vm3, %v2990_v53, %v1291_v47  ;;  %vm1496_vm5 = vcmp.eq.s32.totalorder %v3791_v23, 16  ;;  %vm1498_vm6 = vcmp.eq.s32.totalorder %v3794_v24, 16  ;;  %v1434_v51 = vsel %vm1357_vm4, %v2990_v53, %v1293_v36 }
 0x1e3   : > { %v1573_v4 = vsel %vm1496_vm5, %v2992_v55, %v1432_v38  ;;  %vm1637_vm14 = vcmp.eq.s32.totalorder %v3791_v23, 1  ;;  %vm1639_vm7 = vcmp.eq.s32.totalorder %v3794_v24, 1  ;;  %v1575_v3 = vsel %vm1498_vm6, %v2992_v55, %v1434_v51 }
 0x1e4   : > { %v1714_v31 = vsel %vm1637_vm14, %v2994_v56, %v1573_v4  ;;  %vm1778_vm0 = vcmp.eq.s32.totalorder %v3791_v23, 0  ;;  %vm1780_vm8 = vcmp.eq.s32.totalorder %v3794_v24, 0  ;;  %v1716_v5 = vsel %vm1639_vm7, %v2994_v56, %v1575_v3 }
 0x1e5   : > { %v1854_v12 = vsel %vm1778_vm0, %v2996_v57, %v1714_v31  ;;  %v661_v13 = vadd.s32 232, %v2955_v27  ;;  %v732_v14 = vsub.s32 %v3774_v18, %v3004_v60  ;;  %v1856_v15 = vsel %vm1780_vm8, %v2996_v57, %v1716_v5 }
 0x1e6   : > { %v3913_v1 = vsub.s32 %v3774_v18, %v3006_v61  ;;  %v3916_v33 = vadd.s32 240, %v2955_v27  ;;  %v3919_v23 = vadd.s32 248, %v2955_v27  ;;  %v2176_v24 = vpack.c.bf16 %v1856_v15, %v1854_v12 }
 0x1e7   : > { %v734_v63 = vsub.s32 %v661_v13, %v3004_v60  ;;  %vm796_vm1 = vcmp.eq.s32.totalorder %v732_v14, 273  ;;  %vm937_vm9 = vcmp.eq.s32.totalorder %v732_v14, 272  ;;  %vm1078_vm10 = vcmp.eq.s32.totalorder %v732_v14, 257 }
 0x1e8   : > { %v873_v2 = vsel %vm796_vm1, %v2966_v39, 0.0  ;;  %vm1219_vm11 = vcmp.eq.s32.totalorder %v732_v14, 256  ;;  %vm1360_vm12 = vcmp.eq.s32.totalorder %v732_v14, 17  ;;  %2177 = vmatpush1.bf16.msra.mxu0 %v2176_v24  ;;  %vm1501_vm5 = vcmp.eq.s32.totalorder %v732_v14, 16 }
 0x1e9   : > { %vm798_vm13 = vcmp.eq.s32.totalorder %v734_v63, 273  ;;  %vm939_vm15 = vcmp.eq.s32.totalorder %v734_v63, 272  ;;  %v1014_v18 = vsel %vm937_vm9, %v2968_v40, %v873_v2  ;;  %vm1080_vm2 = vcmp.eq.s32.totalorder %v734_v63, 257 }
 0x1ea   : > { %v875_v16 = vsel %vm798_vm13, %v2966_v39, 0.0  ;;  %v1155_v27 = vsel %vm1078_vm10, %v2970_v41, %v1014_v18  ;;  %vm1221_vm3 = vcmp.eq.s32.totalorder %v734_v63, 256  ;;  %vm1362_vm4 = vcmp.eq.s32.totalorder %v734_v63, 17 }
 0x1eb   : > { %v1016_v6 = vsel %vm939_vm15, %v2968_v40, %v875_v16  ;;  %v1296_v7 = vsel %vm1219_vm11, %v2972_v42, %v1155_v27  ;;  %vm1503_vm6 = vcmp.eq.s32.totalorder %v734_v63, 16  ;;  %vm1642_vm14 = vcmp.eq.s32.totalorder %v732_v14, 1 }
 0x1ec   : > { %v1157_v17 = vsel %vm1080_vm2, %v2970_v41, %v1016_v6  ;;  %v1437_v10 = vsel %vm1360_vm12, %v2974_v43, %v1296_v7  ;;  %vm1644_vm7 = vcmp.eq.s32.totalorder %v734_v63, 1  ;;  %vm1783_vm0 = vcmp.eq.s32.totalorder %v732_v14, 0 }
 0x1ed   : > { %v1298_v37 = vsel %vm1221_vm3, %v2972_v42, %v1157_v17  ;;  %v1578_v58 = vsel %vm1501_vm5, %v2976_v44, %v1437_v10  ;;  %vm1785_vm8 = vcmp.eq.s32.totalorder %v734_v63, 0  ;;  %v733_v35 = vsub.s32 %v661_v13, %v3006_v61 }
 0x1ee   : > { %v1439_v19 = vsel %vm1362_vm4, %v2974_v43, %v1298_v37  ;;  %v1719_v20 = vsel %vm1642_vm14, %v2978_v45, %v1578_v58  ;;  %vm795_vm1 = vcmp.eq.s32.totalorder %v3913_v1, 273  ;;  %vm936_vm9 = vcmp.eq.s32.totalorder %v3913_v1, 272 }
 0x1ef   : > { %v1580_v25 = vsel %vm1503_vm6, %v2976_v44, %v1439_v19  ;;  %v1859_v34 = vsel %vm1783_vm0, %v2980_v46, %v1719_v20  ;;  %v872_v54 = vsel %vm795_vm1, %v2982_v48, 0.0  ;;  %vm797_vm10 = vcmp.eq.s32.totalorder %v733_v35, 273 }
 0x1f0   : > { %v1721_v26 = vsel %vm1644_vm7, %v2978_v45, %v1580_v25  ;;  %vm938_vm11 = vcmp.eq.s32.totalorder %v733_v35, 272  ;;  %v1013_v32 = vsel %vm936_vm9, %v2984_v49, %v872_v54  ;;  %v874_v29 = vsel %vm797_vm10, %v2982_v48, 0.0 }
 0x1f1   : > { %v1861_v28 = vsel %vm1785_vm8, %v2980_v46, %v1721_v26  ;;  %vm1077_vm12 = vcmp.eq.s32.totalorder %v3913_v1, 257  ;;  %vm1079_vm13 = vcmp.eq.s32.totalorder %v733_v35, 257  ;;  %v1015_v11 = vsel %vm938_vm11, %v2984_v49, %v874_v29 }
 0x1f2   : > { %v2178_v30 = vpack.c.bf16 %v1861_v28, %v1859_v34  ;;  %v1154_v0 = vsel %vm1077_vm12, %v2986_v50, %v1013_v32  ;;  %vm1218_vm15 = vcmp.eq.s32.totalorder %v3913_v1, 256  ;;  %v1156_v59 = vsel %vm1079_vm13, %v2986_v50, %v1015_v11  ;;  %v1866_v34 = vld [vmem:[#allocation2] sm:$0xff] }
 0x1f3   : > { %vm1220_vm2 = vcmp.eq.s32.totalorder %v733_v35, 256  ;;  %v1295_v62 = vsel %vm1218_vm15, %v2988_v52, %v1154_v0  ;;  %vm1359_vm3 = vcmp.eq.s32.totalorder %v3913_v1, 17  ;;  %vm1361_vm4 = vcmp.eq.s32.totalorder %v733_v35, 17 }
 0x1f4   : > { %2179 = vmatprep.subr.bf16.mxu0 %v2178_v30  ;;  %v1297_v21 = vsel %vm1220_vm2, %v2988_v52, %v1156_v59  ;;  %v1436_v22 = vsel %vm1359_vm3, %v2990_v53, %v1295_v62  ;;  %vm1500_vm5 = vcmp.eq.s32.totalorder %v3913_v1, 16  ;;  %vm1502_vm6 = vcmp.eq.s32.totalorder %v733_v35, 16 }
 0x1f5   : > { %v1438_v8 = vsel %vm1361_vm4, %v2990_v53, %v1297_v21  ;;  %v1577_v9 = vsel %vm1500_vm5, %v2992_v55, %v1436_v22  ;;  %vm1641_vm14 = vcmp.eq.s32.totalorder %v3913_v1, 1  ;;  %vm1643_vm7 = vcmp.eq.s32.totalorder %v733_v35, 1 }
 0x1f6   : > { %v1579_v47 = vsel %vm1502_vm6, %v2992_v55, %v1438_v8  ;;  %v1718_v36 = vsel %vm1641_vm14, %v2994_v56, %v1577_v9  ;;  %vm1782_vm0 = vcmp.eq.s32.totalorder %v3913_v1, 0  ;;  %vm1784_vm8 = vcmp.eq.s32.totalorder %v733_v35, 0 }
 0x1f7   : > { %v1720_v38 = vsel %vm1643_vm7, %v2994_v56, %v1579_v47  ;;  %v1858_v51 = vsel %vm1782_vm0, %v2996_v57, %v1718_v36  ;;  %v736_v4 = vsub.s32 %v3916_v33, %v3004_v60  ;;  %v738_v31 = vsub.s32 %v3919_v23, %v3004_v60 }
 0x1f8   : > { %v1860_v3 = vsel %vm1784_vm8, %v2996_v57, %v1720_v38  ;;  %v3969_v5 = vsub.s32 %v3916_v33, %v3006_v61  ;;  %v3973_v12 = vsub.s32 %v3919_v23, %v3006_v61 }
 0x1f9   : > { %v2180_v13 = vpack.c.bf16 %v1860_v3, %v1858_v51  ;;  %vm800_vm1 = vcmp.eq.s32.totalorder %v736_v4, 273  ;;  %vm941_vm9 = vcmp.eq.s32.totalorder %v736_v4, 272  ;;  %vm1082_vm10 = vcmp.eq.s32.totalorder %v736_v4, 257 }
 0x1fa   : > { %vm802_vm11 = vcmp.eq.s32.totalorder %v738_v31, 273  ;;  %v877_v14 = vsel %vm800_vm1, %v2966_v39, 0.0  ;;  %vm943_vm12 = vcmp.eq.s32.totalorder %v738_v31, 272  ;;  %vm1084_vm13 = vcmp.eq.s32.totalorder %v738_v31, 257 }
 0x1fb   : > { %2181 = vmatpush1.bf16.msra.mxu0 %v2180_v13  ;;  %v879_v60 = vsel %vm802_vm11, %v2966_v39, 0.0  ;;  %v1018_v15 = vsel %vm941_vm9, %v2968_v40, %v877_v14  ;;  %vm1223_vm15 = vcmp.eq.s32.totalorder %v736_v4, 256  ;;  %vm1225_vm2 = vcmp.eq.s32.totalorder %v738_v31, 256 }
 0x1fc   : > { %v1020_v1 = vsel %vm943_vm12, %v2968_v40, %v879_v60  ;;  %v1159_v61 = vsel %vm1082_vm10, %v2970_v41, %v1018_v15  ;;  %vm1364_vm3 = vcmp.eq.s32.totalorder %v736_v4, 17  ;;  %vm1366_vm4 = vcmp.eq.s32.totalorder %v738_v31, 17 }
 0x1fd   : > { %v1161_v33 = vsel %vm1084_vm13, %v2970_v41, %v1020_v1  ;;  %v1300_v23 = vsel %vm1223_vm15, %v2972_v42, %v1159_v61  ;;  %vm1505_vm5 = vcmp.eq.s32.totalorder %v736_v4, 16  ;;  %vm1507_vm6 = vcmp.eq.s32.totalorder %v738_v31, 16 }
 0x1fe   : > { %v1302_v24 = vsel %vm1225_vm2, %v2972_v42, %v1161_v33  ;;  %v1441_v39 = vsel %vm1364_vm3, %v2974_v43, %v1300_v23  ;;  %vm1646_vm14 = vcmp.eq.s32.totalorder %v736_v4, 1  ;;  %vm1648_vm7 = vcmp.eq.s32.totalorder %v738_v31, 1 }
 0x1ff   : > { %v1443_v63 = vsel %vm1366_vm4, %v2974_v43, %v1302_v24  ;;  %v1582_v40 = vsel %vm1505_vm5, %v2976_v44, %v1441_v39  ;;  %vm1787_vm0 = vcmp.eq.s32.totalorder %v736_v4, 0  ;;  %vm1789_vm8 = vcmp.eq.s32.totalorder %v738_v31, 0 }
 0x200   : > { %v1584_v2 = vsel %vm1507_vm6, %v2976_v44, %v1443_v63  ;;  %v1723_v41 = vsel %vm1646_vm14, %v2978_v45, %v1582_v40  ;;  %vm799_vm1 = vcmp.eq.s32.totalorder %v3969_v5, 273  ;;  %vm801_vm9 = vcmp.eq.s32.totalorder %v3973_v12, 273 }
 0x201   : > { %v1725_v42 = vsel %vm1648_vm7, %v2978_v45, %v1584_v2  ;;  %v1863_v18 = vsel %vm1787_vm0, %v2980_v46, %v1723_v41  ;;  %v876_v16 = vsel %vm799_vm1, %v2982_v48, 0.0  ;;  %v878_v43 = vsel %vm801_vm9, %v2982_v48, 0.0 }
 0x202   : > { %v1865_v27 = vsel %vm1789_vm8, %v2980_v46, %v1725_v42  ;;  %vm940_vm10 = vcmp.eq.s32.totalorder %v3969_v5, 272  ;;  %vm942_vm11 = vcmp.eq.s32.totalorder %v3973_v12, 272  ;;  %vm1081_vm12 = vcmp.eq.s32.totalorder %v3969_v5, 257 }
 0x203   : > { %v2182_v44 = vpack.c.bf16 %v1865_v27, %v1863_v18  ;;  %v1017_v6 = vsel %vm940_vm10, %v2984_v49, %v876_v16  ;;  %v1019_v45 = vsel %vm942_vm11, %v2984_v49, %v878_v43  ;;  %vm1083_vm13 = vcmp.eq.s32.totalorder %v3973_v12, 257 }
 0x204   : > { %v1158_v7 = vsel %vm1081_vm12, %v2986_v50, %v1017_v6  ;;  %v1160_v48 = vsel %vm1083_vm13, %v2986_v50, %v1019_v45  ;;  %vm1222_vm15 = vcmp.eq.s32.totalorder %v3969_v5, 256  ;;  %vm1224_vm2 = vcmp.eq.s32.totalorder %v3973_v12, 256  ;;  %v1867_v50 = vld [vmem:[%s219_s16] sm:$0xff] }
 0x205   : > { %2183 = vmatprep.subr.bf16.mxu0 %v2182_v44  ;;  %v1299_v46 = vsel %vm1222_vm15, %v2988_v52, %v1158_v7  ;;  %v1301_v17 = vsel %vm1224_vm2, %v2988_v52, %v1160_v48  ;;  %vm1363_vm3 = vcmp.eq.s32.totalorder %v3969_v5, 17  ;;  %vm1365_vm4 = vcmp.eq.s32.totalorder %v3973_v12, 17 }
 0x206   : > { %v1440_v49 = vsel %vm1363_vm3, %v2990_v53, %v1299_v46  ;;  %v1442_v10 = vsel %vm1365_vm4, %v2990_v53, %v1301_v17  ;;  %vm1504_vm5 = vcmp.eq.s32.totalorder %v3969_v5, 16  ;;  %vm1506_vm6 = vcmp.eq.s32.totalorder %v3973_v12, 16 }
 0x207   : > { %v1581_v37 = vsel %vm1504_vm5, %v2992_v55, %v1440_v49  ;;  %v1583_v58 = vsel %vm1506_vm6, %v2992_v55, %v1442_v10  ;;  %vm1645_vm14 = vcmp.eq.s32.totalorder %v3969_v5, 1  ;;  %vm1647_vm7 = vcmp.eq.s32.totalorder %v3973_v12, 1 }
 0x208   : > { %v1722_v52 = vsel %vm1645_vm14, %v2994_v56, %v1581_v37  ;;  %v1724_v19 = vsel %vm1647_vm7, %v2994_v56, %v1583_v58  ;;  %vm1786_vm0 = vcmp.eq.s32.totalorder %v3969_v5, 0  ;;  %vm1788_vm8 = vcmp.eq.s32.totalorder %v3973_v12, 0 }
 0x209   : > { %v1862_v53 = vsel %vm1786_vm0, %v2996_v57, %v1722_v52  ;;  %v1864_v20 = vsel %vm1788_vm8, %v2996_v57, %v1724_v19  ;;  %v1869_v35 = vcombine.high %v1867_v50, %v1867_v50 }
 0x20a   : > { %v2184_v25 = vpack.c.bf16 %v1864_v20, %v1862_v53 }
 0x20b   : > { %1935 = vmatprep.mubr.f32.mxu0 %v1869_v35 }
 0x20c   : > { %2185 = vmatpush1.bf16.msra.mxu0 %v2184_v25 }
 0x20f   : > { %1936 = vmatmul.mubr.f32.vlgmr.msra.gmra.mrb[0].mxu0 %v1867_v50 }
 0x2e2   : > { %v1937_v55 = vpop.f32.mrb[0].mxu0 }
 0x2e3   : > { %v1939_v54 = vpop.f32.mrb[1].mxu0 }
 0x2e4   : > { %v1944_v26 = vcombine.low %v1937_v55, %v1939_v54 }
 0x2e6   : > { %v1946_v32 = vadd.f32 %v1944_v26, %v1866_v34 }
 0x2e8   : > { %1947 = vst [vmem:[#allocation2] sm:$0xff] %v1946_v32 }
 0x2e9 PF: > { %p2115_p1 = scmp.ne.s32.totalorder %s2515_s11, 7 }
 0x2eb   : > { %1951 = sbr.rel (%p2115_p1) target bundleno = 754 (0x2f2), region = 44 }
 0x2ef   : > { %v1952_v56 = vld [vmem:[#allocation2] sm:$0xff] (!%p2115_p1) }
 0x2f0   : > { %1953 = vst [vmem:[%s248_s18] sm:$0xff] (!%p2115_p1), %v1952_v56 }
 0x2f2 PF: > { %s2118_s19 = sshll.u32 %s2519_s12, 3  ;;  %s1971_s22 = sshll.u32 %s248_s18, 4  ;;  %s4032_s22 = int_to_ptr.vmem [resolvable:$true] %s1971_s22 }
 0x2f3   : > { %s1967_s16 = sadd.s32 %s2118_s19, %s2791_s20  ;;  %s1955_s8 = scalar_lea.sflag [#allocation11], %s246_s7 }
 0x2f4   : > { %s2119_s14 = sshll.u32 %s1967_s16, 6  ;;  %s2399_s23 = scalar_lea.vmem %s4032_s22, 128 }
 0x2f5   : > { %s1969_s13 = scalar_lea.hbm %s4107_s5, %s2119_s14  ;;  %p2400_p6 = scmp.ne.s32.totalorder %s4032_s22, %s2399_s23 }
 0x2f6   : > { %p4150_p10 = scmp.ne.s32.totalorder %s4128_s26, 0  ;;  %s2548_s12 = smov [#allocation12]  }
 0x2f7   : > { %s2403_s20 = sshll.u32 %s2548_s12, 4  ;;  %s2404_s20 = int_to_ptr.vmem [resolvable:$false] %s2403_s20 }
 0x2f8   : > { %p2401_p12 = pnand %p2400_p6, %p4150_p10  ;;  %s2405_s1 = scalar_lea.vmem %s2404_s20, 256 }
 0x2f9   : > { %p2406_p2 = scmp.lt.s32.totalorder %s4032_s22, %s2404_s20  ;;  %p2407_p7 = scmp.lt.s32.totalorder %s2405_s1, %s2399_s23 }
 0x2fa   : > { %p2402_p0 = pneg %p2401_p12 }
 0x2fb   : > { %p2408_p8 = por %p2407_p7, %p2406_p2 }
 0x2fd   : > { %p2409_p4 = pnand %p2408_p8, %p2402_p0 }
 0x2ff   : > { %2412 = shalt.err (!%p2409_p4)
}
 0x300   : > { %s2413_s18 = scalar_lea.hbm %s1969_s13, 128  ;;  %s2417_s10 = scalar_lea.hbm %s4107_s5, 1024 }
 0x301   : > { %p2414_p5 = scmp.ne.s32.totalorder %s1969_s13, %s2413_s18  ;;  %p2418_p3 = scmp.lt.u32.totalorder %s1969_s13, %s4107_s5 }
 0x302   : > { %p2419_p11 = scmp.lt.u32.totalorder %s2417_s10, %s2413_s18  ;;  %p2421_p6 = scmp.lt.u32.totalorder %s2413_s18, %s1969_s13 }
 0x303   : > { %p2415_p9 = pnand %p2414_p5, %p4150_p10 }
 0x304   : > { %p2420_p1 = por %p2419_p11, %p2418_p3 }
 0x305   : > { %p2416_p13 = pneg %p2415_p9 }
 0x306   : > { %p2422_p12 = por %p2421_p6, %p2420_p1 }
 0x308   : > { %p2423_p0 = pnand %p2422_p12, %p2416_p13 }
 0x30a   : > { %2426 = shalt.err (!%p2423_p0)
}
 0x30b   : > { %2198 = dma.vmem_to_hbm [thread:$0]  (%p4150_p10), %s4032_s22, 128, %s1969_s13, %s1955_s8  }
 0x30c PF: > { %p2213_p2 = scmp.ge.s32.totalorder %s2539_s17, 2  ;;  %s1983_s25 = sand.u32 1, %s2491_s6  }
 0x30d   : > { %p4151_p7 = scmp.ne.s32.totalorder %s4130_s29, 0  ;;  %s1984_s21 = scalar_lea.sflag [#allocation11], %s1983_s25 }
 0x30f   : > { %p2209_p8 = pnand %p2213_p2, %p4151_p7 }
 0x311   : > { %2486 = dma.done.wait (!%p2209_p8), %s1984_s21, 128  }
 0x312   : > { %2488 = vsyncadd (!%p2209_p8), %s1984_s21, 4294967168  ;;  %s35_s17 = sadd.s32 1, %s2539_s17   ;;  %s4153_s26 = sld [smem:[#allocation20_spill]] }
 0x313   : > { %p4060_p4 = scmp.ge.s32.totalorder %s35_s17, 66   ;;  %s4154_s7 = sld [smem:[#allocation27_spill]] }
 0x314   : > { %s4155_s19 = sld [smem:[#allocation21_spill]]  ;;  %s4156_s10 = sld [smem:[#allocation28_spill]] }
 0x315   : > { %s4157_s11 = sld [smem:[#allocation22_spill]]  ;;  %s4158_s13 = sld [smem:[#allocation23_spill]] }
 0x316   : > { %s4159_s14 = sld [smem:[#allocation24_spill]]  ;;  %s4160_s29 = sld [smem:[#allocation25_spill]] }
 0x317   : > { %s4161_s16 = sld [smem:[#allocation26_spill]]  ;;  %s4162_s6 = smov %s2495_s2 }
 0x318   : > { %s4163_s2 = smov %s4153_s26  ;;  %s4164_s8 = smov %s2507_s9 }
 0x319   : > { %s4166_s12 = smov %s2531_s15  ;;  %34 = sbr.rel (!%p4060_p4) target bundleno = 45 (0x2d), region = 102 }
 0x31a   : > { %s4165_s9 = smov %s4155_s19 }
 0x31c   : > { %s4167_s15 = smov %s4160_s29 }
 0x320   :  { %1989 = vsyncpa [#allocation10], 1 }
 0x321   :  { %1991 = vsyncpa [#allocation10 + $0x1], 1 }
 0x322   :  { %1992 = vsyncpa [#allocation11], 1 }
 0x323   :  { %1994 = vsyncpa [#allocation11 + $0x1], 1 }

</bundles_post_ra>
